<compile_context>
chip_gen: v7x
topology: tpu7x:2x2x1
jax: 0.10.0
libtpu: 0.0.40
codegen_flags: <defaults>
</compile_context>

<pallas_src>
import numpy as np
import jax
import jax.numpy as jnp
from jax.experimental import pallas as pl
from jax.experimental.pallas import tpu as pltpu

C = 4            # channels
H = 16           # height
W = 16           # width
KH = KW = 3      # conv kernel size of the stand-in denoiser model
NTAP = KH * KW   # 9 conv taps

HP = H + 2                      # padded height (18)
WP = W + 2                      # padded width  (18)
OW = HP * WP                    # flattened padded spatial length (324)
OWP = ((OW + 127) // 128) * 128  # 384: lane-dense output width (multiple of 128)
PAD = WP + 1                    # 19 = max |tap shift| = (dy-1)*WP + (dx-1)
SW = OWP + 2 * PAD              # 422 = source lane width (slack so taps are in-bounds slices)


def _make_kernel(w_np, b_np, alpha, mc, nb):
    """Build the Pallas kernel and the per-sublane weight table.

    The R2R scale 1/(1-alpha) and the MC mean 1/MC are folded into the conv weights and
    the bias is added once at the end; this is exact because the stand-in model is a
    linear conv + bias.
    """
    # TODO(synk): for a nonlinear `model`, apply 1/(1-alpha) to y_plus before the model
    # and 1/MC to the accumulated output instead of folding them into the weights.
    cm = C * mc
    w_fold = np.asarray(w_np, np.float32) * (1.0 / ((1.0 - alpha) * mc))  # (KH,KW,Cin,Cout)
    b_vec = np.asarray(b_np, np.float32)                                  # (Cout,)

    # Weight table: column (dy*KW+dx)*C + co holds w_fold[dy, dx, :, co] tiled MC times,
    # matching the (m, ci) sublane row order of the packed y / noise blocks.
    wtab = np.zeros((cm, NTAP * C), np.float32)
    for dy in range(KH):
        for dx in range(KW):
            for co in range(C):
                wtab[:, (dy * KW + dx) * C + co] = np.tile(w_fold[dy, dx, :, co], mc)
    wtab = jnp.asarray(wtab)

    def kernel(w_ref, y_ref, n_ref, out_ref):
        # w_ref:   (CM, 9*C)    per-sublane folded conv weights
        # y_ref:   (NB, CM, SW) measurement, replicated across the MC rows
        # n_ref:   (NB, CM, SW) Beta noise, MC x C_in packed on the sublane axis
        # out_ref: (NB, C, OWP) conv output in flattened padded coordinates
        for b in range(nb):
            # R2R-Gamma reweighting for all channels and all MC samples in one pass
            # (the /(1-alpha) scale lives in the folded weights): y_plus = y * (1 - eps)
            yp = y_ref[b] * (1.0 - n_ref[b])                       # (CM, SW)

            # 3x3 "same" conv as 9 static lane-shifted FMAs over the packed rows.
            # Output channels are processed in pairs to keep live vregs bounded.
            for co in range(0, C, 2):
                acc0 = jnp.zeros((cm, OWP), jnp.float32)
                acc1 = jnp.zeros((cm, OWP), jnp.float32)
                for dy in range(KH):
                    for dx in range(KW):
                        a = PAD + (dy - 1) * WP + (dx - 1)         # static offset in [0, 2*PAD]
                        tap = yp[:, a:a + OWP]                     # (CM, OWP) lane-shifted view
                        col = (dy * KW + dx) * C + co
                        acc0 = acc0 + w_ref[:, col:col + 1] * tap
                        acc1 = acc1 + w_ref[:, col + 1:col + 2] * tap
                # Reduce over the packed (MC, C_in) rows at once; lane-dense (1, 384) stores.
                out_ref[b, co:co + 1, :] = (
                    jnp.sum(acc0, axis=0, keepdims=True) + float(b_vec[co])
                ).astype(out_ref.dtype)
                out_ref[b, co + 1:co + 2, :] = (
                    jnp.sum(acc1, axis=0, keepdims=True) + float(b_vec[co + 1])
                ).astype(out_ref.dtype)

    return kernel, wtab


def _pad_flatten(x):
    """(..., H, W) -> (..., SW): zero-pad spatial by 1 (3x3 SAME conv), flatten (HP, WP)
    onto the lane axis, and add PAD / (SW-OW-PAD) zero slack so every conv tap is a
    static, in-bounds lane slice inside the kernel."""
    lead = x.ndim - 2
    xp = jnp.pad(x, [(0, 0)] * lead + [(1, 1), (1, 1)])
    xf = xp.reshape(x.shape[:-2] + (OW,))
    return jnp.pad(xf, [(0, 0)] * lead + [(PAD, SW - OW - PAD)])


def r2r_gamma_forward(y, noise, w_np, b_np, alpha):
    """y: (N, C, H, W) f32 NCHW.  noise: (N, MC, C, H, W) Beta(l*a, l*(1-a)) samples."""
    n_batch = y.shape[0]
    mc = noise.shape[1]
    cm = C * mc

    # ---- layout plumbing (small XLA pads/reshapes; no transpose of the noise) ----
    noise_src = _pad_flatten(noise.reshape(n_batch, cm, H, W))            # (N, CM, SW)
    y_flat = _pad_flatten(y)                                              # (N, C,  SW)
    # Replicate y across the MC sublane rows so the kernel sees the same (CM, SW)
    # packing as the noise (row r = m*C + ci holds channel ci). Pure layout plumbing.
    y_rep = jnp.broadcast_to(y_flat[:, None], (n_batch, mc, C, SW)).reshape(n_batch, cm, SW)

    # 2 parallel programs when possible (one image per TensorCore on v7x); otherwise one
    # program for the whole batch (v5e/v6e are single-TC: fewer grid steps = less overhead).
    grid_n = 2 if (n_batch % 2 == 0 and n_batch >= 2) else 1
    nb = n_batch // grid_n

    kernel, wtab = _make_kernel(w_np, b_np, alpha, mc, nb)

    out_flat = pl.pallas_call(
        kernel,
        out_shape=jax.ShapeDtypeStruct((n_batch, C, OWP), jnp.float32),
        grid_spec=pltpu.PrefetchScalarGridSpec(
            num_scalar_prefetch=0,
            grid=(grid_n,),
            in_specs=[
                pl.BlockSpec((cm, NTAP * C), lambda g: (0, 0)),      # folded weight table
                pl.BlockSpec((nb, cm, SW), lambda g: (g, 0, 0)),     # replicated y
                pl.BlockSpec((nb, cm, SW), lambda g: (g, 0, 0)),     # Beta noise
            ],
            out_specs=pl.BlockSpec((nb, C, OWP), lambda g: (g, 0, 0)),
        ),
        compiler_params=pltpu.CompilerParams(
            dimension_semantics=("parallel",)),
    )(wtab, y_rep, noise_src)

    # Undo the layout: keep the first 324 lanes -> (N, C, 18, 18) -> central 16x16.
    return out_flat[:, :, :OW].reshape(n_batch, C, HP, WP)[:, :, 1:H + 1, 1:W + 1]


def reference(y, noise, w_np, b_np, alpha):
    """Pure-JAX reference matching the PyTorch forward (eval mode)."""
    mc = noise.shape[1]
    w = jnp.asarray(w_np)   # (KH, KW, Cin, Cout) == HWIO
    b = jnp.asarray(b_np)
    out = jnp.zeros_like(y)
    for m in range(mc):
        y_plus = y * (1.0 - noise[:, m]) / (1.0 - alpha)
        conv = jax.lax.conv_general_dilated(
            y_plus, w, window_strides=(1, 1), padding="SAME",
            dimension_numbers=("NCHW", "HWIO", "NCHW"))
        out = out + conv + b[None, :, None, None]
    return out / mc


if __name__ == "__main__":
    key = jax.random.PRNGKey(0)
    k_y, k_n, k_w, k_b = jax.random.split(key, 4)

    N = 2
    l_param = 10.0
    alpha = 0.5
    MC_samples = 5   # eval mode: MC = MC_samples (training mode would use MC = 1)

    # measurement y (positive, as for Gamma-noise data)
    y = jax.random.uniform(k_y, (N, C, H, W), jnp.float32, minval=0.1, maxval=1.0)

    # TODO(synk): Beta sampling (torch.distributions.Beta) has no Pallas primitive; the
    # iid Beta(l*alpha, l*(1-alpha)) draws are plain-JAX glue outside the kernel.
    noise = jax.random.beta(k_n, l_param * alpha, l_param * (1.0 - alpha),
                            (N, MC_samples, C, H, W), dtype=jnp.float32)

    # TODO(synk): `self.model` is an arbitrary denoiser nn.Module; stand-in here is a
    # deterministic 3x3 conv C->C + bias (the `physics` argument would be unused by it).
    w_np = np.asarray(jax.random.normal(k_w, (KH, KW, C, C), jnp.float32)) * 0.1
    b_np = np.asarray(jax.random.normal(k_b, (C,), jnp.float32)) * 0.01

    out = r2r_gamma_forward(y, noise, w_np, b_np, alpha)
    out = jax.block_until_ready(out)

    ref = reference(y, noise, w_np, b_np, alpha)
    assert out.shape == (N, C, H, W) and out.dtype == jnp.float32
    np.testing.assert_allclose(np.asarray(out), np.asarray(ref), rtol=5e-4, atol=1e-4)

    print("KERNEL_OK")
</pallas_src>

<mosaic_0001>
module attributes {stable_mosaic.version = 11 : i64} {
  func.func @kernel(%arg0: i32, %arg1: memref<20x36xf32, #tpu.memory_space<vmem>>, %arg2: memref<1x20x422xf32, #tpu.memory_space<vmem>>, %arg3: memref<1x20x422xf32, #tpu.memory_space<vmem>>, %arg4: memref<1x4x384xf32, #tpu.memory_space<vmem>>) attributes {dimension_semantics = [#tpu.dimension_semantics<parallel>], iteration_bounds = array<i64: 2>, scalar_prefetch = 0 : i64, scratch_operands = 0 : i64, tpu.core_type = #tpu.core_type<tc>, window_params = [{pipeline_mode = #tpu.pipeline_mode<synchronous>, transform_indices = @transform_0, window_bounds = array<i64: 20, 36>}, {transform_indices = @transform_1, window_bounds = array<i64: 1, 20, 422>}, {transform_indices = @transform_2, window_bounds = array<i64: 1, 20, 422>}, {transform_indices = @transform_3, window_bounds = array<i64: 1, 4, 384>}]} {
    %c0 = arith.constant 0 : index
    %c0_0 = arith.constant 0 : index
    %c0_1 = arith.constant 0 : index
    %0 = vector.load %arg2[%c0, %c0_0, %c0_1] : memref<1x20x422xf32, #tpu.memory_space<vmem>>, vector<1x20x422xf32>
    %1 = vector.shape_cast %0 : vector<1x20x422xf32> to vector<20x422xf32>
    %c0_2 = arith.constant 0 : index
    %c0_3 = arith.constant 0 : index
    %c0_4 = arith.constant 0 : index
    %2 = vector.load %arg3[%c0_2, %c0_3, %c0_4] : memref<1x20x422xf32, #tpu.memory_space<vmem>>, vector<1x20x422xf32>
    %3 = vector.shape_cast %2 : vector<1x20x422xf32> to vector<20x422xf32>
    %cst = arith.constant 1.000000e+00 : f32
    %4 = vector.broadcast %cst : f32 to vector<20x422xf32>
    %5 = arith.subf %4, %3 : vector<20x422xf32>
    %6 = arith.mulf %1, %5 : vector<20x422xf32>
    %cst_5 = arith.constant 0.000000e+00 : f32
    %7 = vector.broadcast %cst_5 : f32 to vector<20x384xf32>
    %cst_6 = arith.constant 0.000000e+00 : f32
    %8 = vector.broadcast %cst_6 : f32 to vector<20x384xf32>
    %9 = vector.extract_strided_slice %6 {offsets = [0, 0], sizes = [20, 384], strides = [1, 1]} : vector<20x422xf32> to vector<20x384xf32>
    %c0_7 = arith.constant 0 : index
    %c0_8 = arith.constant 0 : index
    %10 = vector.load %arg1[%c0_7, %c0_8] : memref<20x36xf32, #tpu.memory_space<vmem>>, vector<20x1xf32>
    %11 = vector.broadcast %10 : vector<20x1xf32> to vector<20x384xf32>
    %12 = arith.mulf %11, %9 : vector<20x384xf32>
    %13 = arith.addf %7, %12 : vector<20x384xf32>
    %c0_9 = arith.constant 0 : index
    %c1 = arith.constant 1 : index
    %14 = vector.load %arg1[%c0_9, %c1] : memref<20x36xf32, #tpu.memory_space<vmem>>, vector<20x1xf32>
    %15 = vector.broadcast %14 : vector<20x1xf32> to vector<20x384xf32>
    %16 = arith.mulf %15, %9 : vector<20x384xf32>
    %17 = arith.addf %8, %16 : vector<20x384xf32>
    %18 = vector.extract_strided_slice %6 {offsets = [0, 1], sizes = [20, 384], strides = [1, 1]} : vector<20x422xf32> to vector<20x384xf32>
    %c0_10 = arith.constant 0 : index
    %c4 = arith.constant 4 : index
    %19 = vector.load %arg1[%c0_10, %c4] : memref<20x36xf32, #tpu.memory_space<vmem>>, vector<20x1xf32>
    %20 = vector.broadcast %19 : vector<20x1xf32> to vector<20x384xf32>
    %21 = arith.mulf %20, %18 : vector<20x384xf32>
    %22 = arith.addf %13, %21 : vector<20x384xf32>
    %c0_11 = arith.constant 0 : index
    %c5 = arith.constant 5 : index
    %23 = vector.load %arg1[%c0_11, %c5] : memref<20x36xf32, #tpu.memory_space<vmem>>, vector<20x1xf32>
    %24 = vector.broadcast %23 : vector<20x1xf32> to vector<20x384xf32>
    %25 = arith.mulf %24, %18 : vector<20x384xf32>
    %26 = arith.addf %17, %25 : vector<20x384xf32>
    %27 = vector.extract_strided_slice %6 {offsets = [0, 2], sizes = [20, 384], strides = [1, 1]} : vector<20x422xf32> to vector<20x384xf32>
    %c0_12 = arith.constant 0 : index
    %c8 = arith.constant 8 : index
    %28 = vector.load %arg1[%c0_12, %c8] : memref<20x36xf32, #tpu.memory_space<vmem>>, vector<20x1xf32>
    %29 = vector.broadcast %28 : vector<20x1xf32> to vector<20x384xf32>
    %30 = arith.mulf %29, %27 : vector<20x384xf32>
    %31 = arith.addf %22, %30 : vector<20x384xf32>
    %c0_13 = arith.constant 0 : index
    %c9 = arith.constant 9 : index
    %32 = vector.load %arg1[%c0_13, %c9] : memref<20x36xf32, #tpu.memory_space<vmem>>, vector<20x1xf32>
    %33 = vector.broadcast %32 : vector<20x1xf32> to vector<20x384xf32>
    %34 = arith.mulf %33, %27 : vector<20x384xf32>
    %35 = arith.addf %26, %34 : vector<20x384xf32>
    %36 = vector.extract_strided_slice %6 {offsets = [0, 18], sizes = [20, 384], strides = [1, 1]} : vector<20x422xf32> to vector<20x384xf32>
    %c0_14 = arith.constant 0 : index
    %c12 = arith.constant 12 : index
    %37 = vector.load %arg1[%c0_14, %c12] : memref<20x36xf32, #tpu.memory_space<vmem>>, vector<20x1xf32>
    %38 = vector.broadcast %37 : vector<20x1xf32> to vector<20x384xf32>
    %39 = arith.mulf %38, %36 : vector<20x384xf32>
    %40 = arith.addf %31, %39 : vector<20x384xf32>
    %c0_15 = arith.constant 0 : index
    %c13 = arith.constant 13 : index
    %41 = vector.load %arg1[%c0_15, %c13] : memref<20x36xf32, #tpu.memory_space<vmem>>, vector<20x1xf32>
    %42 = vector.broadcast %41 : vector<20x1xf32> to vector<20x384xf32>
    %43 = arith.mulf %42, %36 : vector<20x384xf32>
    %44 = arith.addf %35, %43 : vector<20x384xf32>
    %45 = vector.extract_strided_slice %6 {offsets = [0, 19], sizes = [20, 384], strides = [1, 1]} : vector<20x422xf32> to vector<20x384xf32>
    %c0_16 = arith.constant 0 : index
    %c16 = arith.constant 16 : index
    %46 = vector.load %arg1[%c0_16, %c16] : memref<20x36xf32, #tpu.memory_space<vmem>>, vector<20x1xf32>
    %47 = vector.broadcast %46 : vector<20x1xf32> to vector<20x384xf32>
    %48 = arith.mulf %47, %45 : vector<20x384xf32>
    %49 = arith.addf %40, %48 : vector<20x384xf32>
    %c0_17 = arith.constant 0 : index
    %c17 = arith.constant 17 : index
    %50 = vector.load %arg1[%c0_17, %c17] : memref<20x36xf32, #tpu.memory_space<vmem>>, vector<20x1xf32>
    %51 = vector.broadcast %50 : vector<20x1xf32> to vector<20x384xf32>
    %52 = arith.mulf %51, %45 : vector<20x384xf32>
    %53 = arith.addf %44, %52 : vector<20x384xf32>
    %54 = vector.extract_strided_slice %6 {offsets = [0, 20], sizes = [20, 384], strides = [1, 1]} : vector<20x422xf32> to vector<20x384xf32>
    %c0_18 = arith.constant 0 : index
    %c20 = arith.constant 20 : index
    %55 = vector.load %arg1[%c0_18, %c20] : memref<20x36xf32, #tpu.memory_space<vmem>>, vector<20x1xf32>
    %56 = vector.broadcast %55 : vector<20x1xf32> to vector<20x384xf32>
    %57 = arith.mulf %56, %54 : vector<20x384xf32>
    %58 = arith.addf %49, %57 : vector<20x384xf32>
    %c0_19 = arith.constant 0 : index
    %c21 = arith.constant 21 : index
    %59 = vector.load %arg1[%c0_19, %c21] : memref<20x36xf32, #tpu.memory_space<vmem>>, vector<20x1xf32>
    %60 = vector.broadcast %59 : vector<20x1xf32> to vector<20x384xf32>
    %61 = arith.mulf %60, %54 : vector<20x384xf32>
    %62 = arith.addf %53, %61 : vector<20x384xf32>
    %63 = vector.extract_strided_slice %6 {offsets = [0, 36], sizes = [20, 384], strides = [1, 1]} : vector<20x422xf32> to vector<20x384xf32>
    %c0_20 = arith.constant 0 : index
    %c24 = arith.constant 24 : index
    %64 = vector.load %arg1[%c0_20, %c24] : memref<20x36xf32, #tpu.memory_space<vmem>>, vector<20x1xf32>
    %65 = vector.broadcast %64 : vector<20x1xf32> to vector<20x384xf32>
    %66 = arith.mulf %65, %63 : vector<20x384xf32>
    %67 = arith.addf %58, %66 : vector<20x384xf32>
    %c0_21 = arith.constant 0 : index
    %c25 = arith.constant 25 : index
    %68 = vector.load %arg1[%c0_21, %c25] : memref<20x36xf32, #tpu.memory_space<vmem>>, vector<20x1xf32>
    %69 = vector.broadcast %68 : vector<20x1xf32> to vector<20x384xf32>
    %70 = arith.mulf %69, %63 : vector<20x384xf32>
    %71 = arith.addf %62, %70 : vector<20x384xf32>
    %72 = vector.extract_strided_slice %6 {offsets = [0, 37], sizes = [20, 384], strides = [1, 1]} : vector<20x422xf32> to vector<20x384xf32>
    %c0_22 = arith.constant 0 : index
    %c28 = arith.constant 28 : index
    %73 = vector.load %arg1[%c0_22, %c28] : memref<20x36xf32, #tpu.memory_space<vmem>>, vector<20x1xf32>
    %74 = vector.broadcast %73 : vector<20x1xf32> to vector<20x384xf32>
    %75 = arith.mulf %74, %72 : vector<20x384xf32>
    %76 = arith.addf %67, %75 : vector<20x384xf32>
    %c0_23 = arith.constant 0 : index
    %c29 = arith.constant 29 : index
    %77 = vector.load %arg1[%c0_23, %c29] : memref<20x36xf32, #tpu.memory_space<vmem>>, vector<20x1xf32>
    %78 = vector.broadcast %77 : vector<20x1xf32> to vector<20x384xf32>
    %79 = arith.mulf %78, %72 : vector<20x384xf32>
    %80 = arith.addf %71, %79 : vector<20x384xf32>
    %81 = vector.extract_strided_slice %6 {offsets = [0, 38], sizes = [20, 384], strides = [1, 1]} : vector<20x422xf32> to vector<20x384xf32>
    %c0_24 = arith.constant 0 : index
    %c32 = arith.constant 32 : index
    %82 = vector.load %arg1[%c0_24, %c32] : memref<20x36xf32, #tpu.memory_space<vmem>>, vector<20x1xf32>
    %83 = vector.broadcast %82 : vector<20x1xf32> to vector<20x384xf32>
    %84 = arith.mulf %83, %81 : vector<20x384xf32>
    %85 = arith.addf %76, %84 : vector<20x384xf32>
    %c0_25 = arith.constant 0 : index
    %c33 = arith.constant 33 : index
    %86 = vector.load %arg1[%c0_25, %c33] : memref<20x36xf32, #tpu.memory_space<vmem>>, vector<20x1xf32>
    %87 = vector.broadcast %86 : vector<20x1xf32> to vector<20x384xf32>
    %88 = arith.mulf %87, %81 : vector<20x384xf32>
    %89 = arith.addf %80, %88 : vector<20x384xf32>
    %cst_26 = arith.constant dense<0.000000e+00> : vector<384xf32>
    %90 = vector.multi_reduction <add>, %85, %cst_26 [0] : vector<20x384xf32> to vector<384xf32>
    %91 = vector.shape_cast %90 : vector<384xf32> to vector<1x384xf32>
    %cst_27 = arith.constant -0.00621943595 : f32
    %92 = vector.broadcast %cst_27 : f32 to vector<1x384xf32>
    %93 = arith.addf %91, %92 : vector<1x384xf32>
    %c0_28 = arith.constant 0 : index
    %c0_29 = arith.constant 0 : index
    %c0_30 = arith.constant 0 : index
    %94 = vector.load %arg4[%c0_28, %c0_29, %c0_30] : memref<1x4x384xf32, #tpu.memory_space<vmem>>, vector<1x1x384xf32>
    %95 = vector.shape_cast %94 : vector<1x1x384xf32> to vector<1x384xf32>
    %96 = vector.shape_cast %93 : vector<1x384xf32> to vector<1x1x384xf32>
    tpu.vector_store %arg4[%c0_28, %c0_29, %c0_30], %96 {strides = array<i32>} : memref<1x4x384xf32, #tpu.memory_space<vmem>>, vector<1x1x384xf32>,
    %cst_31 = arith.constant dense<0.000000e+00> : vector<384xf32>
    %97 = vector.multi_reduction <add>, %89, %cst_31 [0] : vector<20x384xf32> to vector<384xf32>
    %98 = vector.shape_cast %97 : vector<384xf32> to vector<1x384xf32>
    %cst_32 = arith.constant 0.00624804059 : f32
    %99 = vector.broadcast %cst_32 : f32 to vector<1x384xf32>
    %100 = arith.addf %98, %99 : vector<1x384xf32>
    %c0_33 = arith.constant 0 : index
    %c1_34 = arith.constant 1 : index
    %c0_35 = arith.constant 0 : index
    %101 = vector.load %arg4[%c0_33, %c1_34, %c0_35] : memref<1x4x384xf32, #tpu.memory_space<vmem>>, vector<1x1x384xf32>
    %102 = vector.shape_cast %101 : vector<1x1x384xf32> to vector<1x384xf32>
    %103 = vector.shape_cast %100 : vector<1x384xf32> to vector<1x1x384xf32>
    tpu.vector_store %arg4[%c0_33, %c1_34, %c0_35], %103 {strides = array<i32>} : memref<1x4x384xf32, #tpu.memory_space<vmem>>, vector<1x1x384xf32>,
    %cst_36 = arith.constant 0.000000e+00 : f32
    %104 = vector.broadcast %cst_36 : f32 to vector<20x384xf32>
    %cst_37 = arith.constant 0.000000e+00 : f32
    %105 = vector.broadcast %cst_37 : f32 to vector<20x384xf32>
    %106 = vector.extract_strided_slice %6 {offsets = [0, 0], sizes = [20, 384], strides = [1, 1]} : vector<20x422xf32> to vector<20x384xf32>
    %c0_38 = arith.constant 0 : index
    %c2 = arith.constant 2 : index
    %107 = vector.load %arg1[%c0_38, %c2] : memref<20x36xf32, #tpu.memory_space<vmem>>, vector<20x1xf32>
    %108 = vector.broadcast %107 : vector<20x1xf32> to vector<20x384xf32>
    %109 = arith.mulf %108, %106 : vector<20x384xf32>
    %110 = arith.addf %104, %109 : vector<20x384xf32>
    %c0_39 = arith.constant 0 : index
    %c3 = arith.constant 3 : index
    %111 = vector.load %arg1[%c0_39, %c3] : memref<20x36xf32, #tpu.memory_space<vmem>>, vector<20x1xf32>
    %112 = vector.broadcast %111 : vector<20x1xf32> to vector<20x384xf32>
    %113 = arith.mulf %112, %106 : vector<20x384xf32>
    %114 = arith.addf %105, %113 : vector<20x384xf32>
    %115 = vector.extract_strided_slice %6 {offsets = [0, 1], sizes = [20, 384], strides = [1, 1]} : vector<20x422xf32> to vector<20x384xf32>
    %c0_40 = arith.constant 0 : index
    %c6 = arith.constant 6 : index
    %116 = vector.load %arg1[%c0_40, %c6] : memref<20x36xf32, #tpu.memory_space<vmem>>, vector<20x1xf32>
    %117 = vector.broadcast %116 : vector<20x1xf32> to vector<20x384xf32>
    %118 = arith.mulf %117, %115 : vector<20x384xf32>
    %119 = arith.addf %110, %118 : vector<20x384xf32>
    %c0_41 = arith.constant 0 : index
    %c7 = arith.constant 7 : index
    %120 = vector.load %arg1[%c0_41, %c7] : memref<20x36xf32, #tpu.memory_space<vmem>>, vector<20x1xf32>
    %121 = vector.broadcast %120 : vector<20x1xf32> to vector<20x384xf32>
    %122 = arith.mulf %121, %115 : vector<20x384xf32>
    %123 = arith.addf %114, %122 : vector<20x384xf32>
    %124 = vector.extract_strided_slice %6 {offsets = [0, 2], sizes = [20, 384], strides = [1, 1]} : vector<20x422xf32> to vector<20x384xf32>
    %c0_42 = arith.constant 0 : index
    %c10 = arith.constant 10 : index
    %125 = vector.load %arg1[%c0_42, %c10] : memref<20x36xf32, #tpu.memory_space<vmem>>, vector<20x1xf32>
    %126 = vector.broadcast %125 : vector<20x1xf32> to vector<20x384xf32>
    %127 = arith.mulf %126, %124 : vector<20x384xf32>
    %128 = arith.addf %119, %127 : vector<20x384xf32>
    %c0_43 = arith.constant 0 : index
    %c11 = arith.constant 11 : index
    %129 = vector.load %arg1[%c0_43, %c11] : memref<20x36xf32, #tpu.memory_space<vmem>>, vector<20x1xf32>
    %130 = vector.broadcast %129 : vector<20x1xf32> to vector<20x384xf32>
    %131 = arith.mulf %130, %124 : vector<20x384xf32>
    %132 = arith.addf %123, %131 : vector<20x384xf32>
    %133 = vector.extract_strided_slice %6 {offsets = [0, 18], sizes = [20, 384], strides = [1, 1]} : vector<20x422xf32> to vector<20x384xf32>
    %c0_44 = arith.constant 0 : index
    %c14 = arith.constant 14 : index
    %134 = vector.load %arg1[%c0_44, %c14] : memref<20x36xf32, #tpu.memory_space<vmem>>, vector<20x1xf32>
    %135 = vector.broadcast %134 : vector<20x1xf32> to vector<20x384xf32>
    %136 = arith.mulf %135, %133 : vector<20x384xf32>
    %137 = arith.addf %128, %136 : vector<20x384xf32>
    %c0_45 = arith.constant 0 : index
    %c15 = arith.constant 15 : index
    %138 = vector.load %arg1[%c0_45, %c15] : memref<20x36xf32, #tpu.memory_space<vmem>>, vector<20x1xf32>
    %139 = vector.broadcast %138 : vector<20x1xf32> to vector<20x384xf32>
    %140 = arith.mulf %139, %133 : vector<20x384xf32>
    %141 = arith.addf %132, %140 : vector<20x384xf32>
    %142 = vector.extract_strided_slice %6 {offsets = [0, 19], sizes = [20, 384], strides = [1, 1]} : vector<20x422xf32> to vector<20x384xf32>
    %c0_46 = arith.constant 0 : index
    %c18 = arith.constant 18 : index
    %143 = vector.load %arg1[%c0_46, %c18] : memref<20x36xf32, #tpu.memory_space<vmem>>, vector<20x1xf32>
    %144 = vector.broadcast %143 : vector<20x1xf32> to vector<20x384xf32>
    %145 = arith.mulf %144, %142 : vector<20x384xf32>
    %146 = arith.addf %137, %145 : vector<20x384xf32>
    %c0_47 = arith.constant 0 : index
    %c19 = arith.constant 19 : index
    %147 = vector.load %arg1[%c0_47, %c19] : memref<20x36xf32, #tpu.memory_space<vmem>>, vector<20x1xf32>
    %148 = vector.broadcast %147 : vector<20x1xf32> to vector<20x384xf32>
    %149 = arith.mulf %148, %142 : vector<20x384xf32>
    %150 = arith.addf %141, %149 : vector<20x384xf32>
    %151 = vector.extract_strided_slice %6 {offsets = [0, 20], sizes = [20, 384], strides = [1, 1]} : vector<20x422xf32> to vector<20x384xf32>
    %c0_48 = arith.constant 0 : index
    %c22 = arith.constant 22 : index
    %152 = vector.load %arg1[%c0_48, %c22] : memref<20x36xf32, #tpu.memory_space<vmem>>, vector<20x1xf32>
    %153 = vector.broadcast %152 : vector<20x1xf32> to vector<20x384xf32>
    %154 = arith.mulf %153, %151 : vector<20x384xf32>
    %155 = arith.addf %146, %154 : vector<20x384xf32>
    %c0_49 = arith.constant 0 : index
    %c23 = arith.constant 23 : index
    %156 = vector.load %arg1[%c0_49, %c23] : memref<20x36xf32, #tpu.memory_space<vmem>>, vector<20x1xf32>
    %157 = vector.broadcast %156 : vector<20x1xf32> to vector<20x384xf32>
    %158 = arith.mulf %157, %151 : vector<20x384xf32>
    %159 = arith.addf %150, %158 : vector<20x384xf32>
    %160 = vector.extract_strided_slice %6 {offsets = [0, 36], sizes = [20, 384], strides = [1, 1]} : vector<20x422xf32> to vector<20x384xf32>
    %c0_50 = arith.constant 0 : index
    %c26 = arith.constant 26 : index
    %161 = vector.load %arg1[%c0_50, %c26] : memref<20x36xf32, #tpu.memory_space<vmem>>, vector<20x1xf32>
    %162 = vector.broadcast %161 : vector<20x1xf32> to vector<20x384xf32>
    %163 = arith.mulf %162, %160 : vector<20x384xf32>
    %164 = arith.addf %155, %163 : vector<20x384xf32>
    %c0_51 = arith.constant 0 : index
    %c27 = arith.constant 27 : index
    %165 = vector.load %arg1[%c0_51, %c27] : memref<20x36xf32, #tpu.memory_space<vmem>>, vector<20x1xf32>
    %166 = vector.broadcast %165 : vector<20x1xf32> to vector<20x384xf32>
    %167 = arith.mulf %166, %160 : vector<20x384xf32>
    %168 = arith.addf %159, %167 : vector<20x384xf32>
    %169 = vector.extract_strided_slice %6 {offsets = [0, 37], sizes = [20, 384], strides = [1, 1]} : vector<20x422xf32> to vector<20x384xf32>
    %c0_52 = arith.constant 0 : index
    %c30 = arith.constant 30 : index
    %170 = vector.load %arg1[%c0_52, %c30] : memref<20x36xf32, #tpu.memory_space<vmem>>, vector<20x1xf32>
    %171 = vector.broadcast %170 : vector<20x1xf32> to vector<20x384xf32>
    %172 = arith.mulf %171, %169 : vector<20x384xf32>
    %173 = arith.addf %164, %172 : vector<20x384xf32>
    %c0_53 = arith.constant 0 : index
    %c31 = arith.constant 31 : index
    %174 = vector.load %arg1[%c0_53, %c31] : memref<20x36xf32, #tpu.memory_space<vmem>>, vector<20x1xf32>
    %175 = vector.broadcast %174 : vector<20x1xf32> to vector<20x384xf32>
    %176 = arith.mulf %175, %169 : vector<20x384xf32>
    %177 = arith.addf %168, %176 : vector<20x384xf32>
    %178 = vector.extract_strided_slice %6 {offsets = [0, 38], sizes = [20, 384], strides = [1, 1]} : vector<20x422xf32> to vector<20x384xf32>
    %c0_54 = arith.constant 0 : index
    %c34 = arith.constant 34 : index
    %179 = vector.load %arg1[%c0_54, %c34] : memref<20x36xf32, #tpu.memory_space<vmem>>, vector<20x1xf32>
    %180 = vector.broadcast %179 : vector<20x1xf32> to vector<20x384xf32>
    %181 = arith.mulf %180, %178 : vector<20x384xf32>
    %182 = arith.addf %173, %181 : vector<20x384xf32>
    %c0_55 = arith.constant 0 : index
    %c35 = arith.constant 35 : index
    %183 = vector.load %arg1[%c0_55, %c35] : memref<20x36xf32, #tpu.memory_space<vmem>>, vector<20x1xf32>
    %184 = vector.broadcast %183 : vector<20x1xf32> to vector<20x384xf32>
    %185 = arith.mulf %184, %178 : vector<20x384xf32>
    %186 = arith.addf %177, %185 : vector<20x384xf32>
    %cst_56 = arith.constant dense<0.000000e+00> : vector<384xf32>
    %187 = vector.multi_reduction <add>, %182, %cst_56 [0] : vector<20x384xf32> to vector<384xf32>
    %188 = vector.shape_cast %187 : vector<384xf32> to vector<1x384xf32>
    %cst_57 = arith.constant 0.0168207753 : f32
    %189 = vector.broadcast %cst_57 : f32 to vector<1x384xf32>
    %190 = arith.addf %188, %189 : vector<1x384xf32>
    %c0_58 = arith.constant 0 : index
    %c2_59 = arith.constant 2 : index
    %c0_60 = arith.constant 0 : index
    %191 = vector.load %arg4[%c0_58, %c2_59, %c0_60] : memref<1x4x384xf32, #tpu.memory_space<vmem>>, vector<1x1x384xf32>
    %192 = vector.shape_cast %191 : vector<1x1x384xf32> to vector<1x384xf32>
    %193 = vector.shape_cast %190 : vector<1x384xf32> to vector<1x1x384xf32>
    tpu.vector_store %arg4[%c0_58, %c2_59, %c0_60], %193 {strides = array<i32>} : memref<1x4x384xf32, #tpu.memory_space<vmem>>, vector<1x1x384xf32>,
    %cst_61 = arith.constant dense<0.000000e+00> : vector<384xf32>
    %194 = vector.multi_reduction <add>, %186, %cst_61 [0] : vector<20x384xf32> to vector<384xf32>
    %195 = vector.shape_cast %194 : vector<384xf32> to vector<1x384xf32>
    %cst_62 = arith.constant -0.00808012765 : f32
    %196 = vector.broadcast %cst_62 : f32 to vector<1x384xf32>
    %197 = arith.addf %195, %196 : vector<1x384xf32>
    %c0_63 = arith.constant 0 : index
    %c3_64 = arith.constant 3 : index
    %c0_65 = arith.constant 0 : index
    %198 = vector.load %arg4[%c0_63, %c3_64, %c0_65] : memref<1x4x384xf32, #tpu.memory_space<vmem>>, vector<1x1x384xf32>
    %199 = vector.shape_cast %198 : vector<1x1x384xf32> to vector<1x384xf32>
    %200 = vector.shape_cast %197 : vector<1x384xf32> to vector<1x1x384xf32>
    tpu.vector_store %arg4[%c0_63, %c3_64, %c0_65], %200 {strides = array<i32>} : memref<1x4x384xf32, #tpu.memory_space<vmem>>, vector<1x1x384xf32>,
    return
  }
  func.func @transform_0(%arg0: i32) -> (i32, i32) {
    %c0_i32 = arith.constant 0 : i32
    %c0_i32_0 = arith.constant 0 : i32
    %c0_i32_1 = arith.constant 0 : i32
    return %c0_i32, %c0_i32_0 : i32, i32
  }
  func.func @transform_1(%arg0: i32) -> (i32, i32, i32) {
    %c0_i32 = arith.constant 0 : i32
    %c0_i32_0 = arith.constant 0 : i32
    %c0_i32_1 = arith.constant 0 : i32
    return %arg0, %c0_i32, %c0_i32_0 : i32, i32, i32
  }
  func.func @transform_2(%arg0: i32) -> (i32, i32, i32) {
    %c0_i32 = arith.constant 0 : i32
    %c0_i32_0 = arith.constant 0 : i32
    %c0_i32_1 = arith.constant 0 : i32
    return %arg0, %c0_i32, %c0_i32_0 : i32, i32, i32
  }
  func.func @transform_3(%arg0: i32) -> (i32, i32, i32) {
    %c0_i32 = arith.constant 0 : i32
    %c0_i32_0 = arith.constant 0 : i32
    %c0_i32_1 = arith.constant 0 : i32
    return %arg0, %c0_i32, %c0_i32_0 : i32, i32, i32
  }
}

</mosaic_0001>

<bundles_post_ra>
// kernel: tpu_custom_call.1
= control target key start
LH: loop header
LB: loop body
LE: loop exit
PB: predicated region body
PF: predicated region fallthrough
CT: control target
= control target key end

     0   :  { %8 = vsyncpa [#allocation3], 0  ;;  %s6577_s0 = inlined_call_operand.vmem [shape: f32[20,36], index: 0, kind: input, shape index: {}]   ;;  %s6578_s1 = inlined_call_operand.vmem [shape: f32[2,20,422], index: 1, kind: input, shape index: {}]   ;;  %s6579_s2 = inlined_call_operand.vmem [shape: f32[2,20,422], index: 2, kind: input, shape index: {}]   ;;  %s6580_s3 = inlined_call_operand.hbm [shape: f32[2,4,384], index: 3, kind: output, shape index: {}]  }
   0x1   :  { %10 = vsyncpa [#allocation3 + $0x1], 0  ;;  %s3795_s12 = smov 0   ;;  %s3797_s13 = smov 0  }
   0x2   :  { %s3799_s14 = smov 0   ;;  %s3801_s15 = smov 0  }
   0x3 LB: > { %s3816_s16 = sadd.s32 4294967295, %s3727_s15   ;;  %s3487_s17 = sadd.s32 4294967294, %s3727_s15   ;;  %s3727_s15 = sphi %s3801_s15, %s7171_s15   ;;  %s3723_s14 = sphi %s3799_s14, %s7170_s14   ;;  %s3719_s13 = sphi %s3797_s13, %s7169_s13   ;;  %s3715_s12 = sphi %s3795_s12, %s7168_s12  }
   0x4   : > { %s3820_s18 = sadd.s32 1, %s3727_s15   ;;  %s96_s19 = sadd.s32 1, %s3723_s14 }
   0x5   : > { %s93_s20 = ssub.s32 %s3727_s15, %s3820_s18  ;;  %p106_p0 = scmp.ne.s32.totalorder %s3723_s14, %s3719_s13 }
   0x6   : > { %p94_p1 = scmp.eq.s32.totalorder %s93_s20, 0  ;;  %p107_p2 = scmp.eq.s32.totalorder %s3816_s16, 1 }
   0x7   : > { %p112_p3 = scmp.ne.s32.totalorder %s3719_s13, %s3715_s12  ;;  %p113_p4 = scmp.eq.s32.totalorder %s3487_s17, 1 }
   0x8   : > { %s3831_s21 = scalar_select %p94_p1, %s3723_s14, %s96_s19  }
   0x9   : > { %p3833_p5 = por %p107_p2, %p106_p0  ;;  %p3837_p6 = por %p113_p4, %p112_p3 }
   0xa   : > { %p3490_p7 = scmp.ge.s32.totalorder %s3727_s15, 1  ;;  %p150_p8 = scmp.lt.s32.totalorder %s3727_s15, 3 }
   0xc   : > { %p151_p9 = pnand %p3490_p7, %p150_p8 }
   0xe   : > { %154 = sbr.rel (%p151_p9) target bundleno = 4344 (0x10f8), region = 32 }
  0x15   : > { %v3846_v0 = vld [vmem:[%s6577_s0 + $0x10] sm:$0xf]  ;;  %v3851_v1 = vld [vmem:[%s6577_s0] sm:$0xff]  ;;  %v3729_v2 = vmov 0   ;;  %v3858_v3 = vld [vmem:[%s6577_s0 + $0x8] sm:$0xff]  ;;  %v3730_v4 = vmov 1  }
  0x16   : > { %3587 = vset.pattern.permute.xlu1 %v3729_v2  ;;  %3586 = vset.pattern.permute.xlu0 %v3729_v2  ;;  %v3731_v5 = vmov 4   ;;  %v3732_v6 = vmov 5   ;;  %v3733_v7 = vmov 8   ;;  %v3734_v8 = vmov 9   ;;  %p179_p10 = scmp.lt.s32.totalorder %s3816_s16, 1  ;;  %s3736_s11 = smov 127  }
  0x17   : > { %252 = vperm.xlu1 %3587, %v3846_v0   ;;  %242 = vperm.xlu0 %3586, %v3851_v1   ;;  %v3735_v9 = vmov 12   ;;  %s3737_s17 = smov 126   ;;  %s3739_s19 = smov 110   ;;  %vm363_vm0 = vcmask 1039360   ;;  %vm538_vm1 = vcmask 1031168   ;;  %vm713_vm2 = vcmask 900096  }
  0x18   : > { %s180_s30 = scalar_select %p179_p10, %s3816_s16, 1  ;;  %vm888_vm3 = vcmask 891904   ;;  %vm1063_vm4 = vcmask 883712   ;;  %vm1238_vm5 = vcmask 752640   ;;  %vm1413_vm6 = vcmask 744448  }
  0x19   : > { %s3742_s20 = smov 109   ;;  %s3745_s24 = smov 108   ;;  %vm1588_vm7 = vcmask 736256   ;;  %vm1704_vm8 = vcmask 1043456  }
  0x1a   : > { %s3500_s4 = smul.u32 96, %s180_s30  ;;  %s3751_s5 = smov 91  }
  0x1b   : > { %3588 = vset.pattern.permute.xlu1 %v3730_v4  ;;  %247 = vperm.xlu0 %3586, %v3858_v3   ;;  %s3754_s6 = smov 90   ;;  %s3774_s26 = smov [#allocation2]  }
  0x1c   : > { %274 = vperm.xlu1 %3588, %v3851_v1   ;;  %s3885_s7 = scalar_lea.vmem %s6579_s2, %s3500_s4  ;;  %s3897_s10 = scalar_lea.vmem %s6578_s1, %s3500_s4 }
  0x1d   : > { %v202_v13 = vld [vmem:[%s3885_s7 + $0x8] sm:$0xff]  ;;  %v201_v14 = vld [vmem:[%s3885_s7] sm:$0xff]  ;;  %v204_v16 = vld [vmem:[%s3885_s7 + $0x18] sm:$0xff]  ;;  %s3748_s4 = smov 92   ;;  %s3669_s27 = sshll.u32 %s3774_s26, 4  ;;  %s3670_s27 = int_to_ptr.vmem [resolvable:$false] %s3669_s27 }
  0x1e   : > { %v214_v17 = vsub.f32 1.0, %v202_v13  ;;  %v213_v19 = vsub.f32 1.0, %v201_v14  ;;  %v190_v20 = vld [vmem:[%s3897_s10 + $0x8] sm:$0xff]  ;;  %v203_v21 = vld [vmem:[%s3885_s7 + $0x10] sm:$0xff]  ;;  %v189_v22 = vld [vmem:[%s3897_s10] sm:$0xff]  ;;  %v216_v24 = vsub.f32 1.0, %v204_v16 }
  0x1f   : > { %3589 = vset.pattern.permute.xlu0 %v3730_v4  ;;  %v206_v23 = vld [vmem:[%s3885_s7 + $0x28] sm:$0xff]  ;;  %v192_v26 = vld [vmem:[%s3897_s10 + $0x18] sm:$0xff]  ;;  %v205_v27 = vld [vmem:[%s3885_s7 + $0x20] sm:$0xff]  ;;  %v215_v28 = vsub.f32 1.0, %v203_v21  ;;  %s3671_s28 = scalar_lea.vmem %s3670_s27, 384 }
  0x20   : > { %282 = vperm.xlu1 %3588, %v3846_v0   ;;  %278 = vperm.xlu0 %3589, %v3858_v3   ;;  %v3909_v29 = vmul.f32 %v214_v17, %v190_v20  ;;  %v3911_v30 = vmul.f32 %v213_v19, %v189_v22  ;;  %v191_v31 = vld [vmem:[%s3897_s10 + $0x10] sm:$0xff]  ;;  %v218_v32 = vsub.f32 1.0, %v206_v23  ;;  %v194_v34 = vld [vmem:[%s3897_s10 + $0x28] sm:$0xff]  ;;  %v3917_v37 = vmul.f32 %v216_v24, %v192_v26  ;;  %v193_v39 = vld [vmem:[%s3897_s10 + $0x20] sm:$0xff] }
  0x21   : > { %v217_v38 = vsub.f32 1.0, %v205_v27  ;;  %v208_v40 = vld [vmem:[%s3885_s7 + $0x38] sm:$0xff]  ;;  %v3921_v41 = vmul.f32 %v215_v28, %v191_v31  ;;  %v207_v42 = vld [vmem:[%s3885_s7 + $0x30] sm:$0xff]  ;;  %v210_v53 = vld [vmem:[%s3885_s7 + $0x48] sm:$0xf] }
  0x22   : > { %v3926_v43 = vmul.f32 %v218_v32, %v194_v34  ;;  %v220_v48 = vsub.f32 1.0, %v208_v40  ;;  %v196_v49 = vld [vmem:[%s3897_s10 + $0x38] sm:$0xff]  ;;  %v219_v50 = vsub.f32 1.0, %v207_v42  ;;  %v195_v54 = vld [vmem:[%s3897_s10 + $0x30] sm:$0xff]  ;;  %v209_v55 = vld [vmem:[%s3885_s7 + $0x40] sm:$0xf] }
  0x23   : > { %v3930_v47 = vmul.f32 %v217_v38, %v193_v39  ;;  %v212_v57 = vld [vmem:[%s3885_s7 + $0x58] sm:$0xf]  ;;  %v222_v58 = vsub.f32 1.0, %v210_v53  ;;  %v221_v60 = vsub.f32 1.0, %v209_v55  ;;  %v198_v61 = vld [vmem:[%s3897_s10 + $0x48] sm:$0xf] }
  0x24   : > { %3590 = vset.pattern.permute.xlu1 %v3731_v5  ;;  %3591 = vset.pattern.permute.xlu0 %v3731_v5  ;;  %v3940_v56 = vmul.f32 %v220_v48, %v196_v49  ;;  %v3943_v59 = vmul.f32 %v219_v50, %v195_v54  ;;  %v211_v62 = vld [vmem:[%s3885_s7 + $0x50] sm:$0xf]  ;;  %v197_v63 = vld [vmem:[%s3897_s10 + $0x40] sm:$0xf]  ;;  %v224_v5 = vsub.f32 1.0, %v212_v57  ;;  %s176_s7 = sand.u32 1, %s3719_s13  }
  0x25   : > { %304 = vperm.xlu1 %3590, %v3851_v1   ;;  %308 = vperm.xlu0 %3591, %v3858_v3   ;;  %v3957_v13 = vmul.f32 %v221_v60, %v197_v63  ;;  %v199_v14 = vld [vmem:[%s3897_s10 + $0x50] sm:$0xf]  ;;  %s3499_s8 = smul.u32 12, %s176_s7 }
  0x27   : > { %s4948_s9 = scalar_lea.vmem [#allocation2], %s3499_s8 }
  0x29   : > { %312 = vperm.xlu1 %3590, %v3846_v0   ;;  %3593 = vset.pattern.permute.xlu0 %v3732_v6 }
  0x2a   : > { %396 = vperm.xlu0 %3593, %v3858_v3  }
  0x2d   : > { %3592 = vset.pattern.permute.xlu1 %v3732_v6 }
  0x2e   : > { %392 = vperm.xlu1 %3592, %v3851_v1   ;;  %3595 = vset.pattern.permute.xlu0 %v3733_v7 }
  0x2f   : > { %483 = vperm.xlu0 %3595, %v3858_v3  }
  0x32   : > { %400 = vperm.xlu1 %3592, %v3846_v0  }
  0x33   : > { %3597 = vset.pattern.permute.xlu0 %v3734_v8 }
  0x34   : > { %571 = vperm.xlu0 %3597, %v3858_v3  }
  0x36   : > { %3594 = vset.pattern.permute.xlu1 %v3733_v7  ;;  %v200_v7 = vld [vmem:[%s3897_s10 + $0x58] sm:$0xf] }
  0x37   : > { %479 = vperm.xlu1 %3594, %v3851_v1   ;;  %v3962_v19 = vmul.f32 %v224_v5, %v200_v7 }
  0x38   : > { %3599 = vset.pattern.permute.xlu0 %v3735_v9 }
  0x3b   : > { %487 = vperm.xlu1 %3594, %v3846_v0  }
  0x3f   : > { %3596 = vset.pattern.permute.xlu1 %v3734_v8  ;;  %v223_v8 = vsub.f32 1.0, %v211_v62 }
  0x40   : > { %567 = vperm.xlu1 %3596, %v3851_v1  }
  0x41   : > { %v3964_v20 = vmul.f32 %v223_v8, %v199_v14 }
  0x44   : > { %575 = vperm.xlu1 %3596, %v3846_v0  }
  0x48   : > { %3598 = vset.pattern.permute.xlu1 %v3735_v9  ;;  %v3953_v9 = vmul.f32 %v222_v58, %v198_v61 }
  0x96   : > { %v3878_v10 = vpop.permute.xlu1 %252  ;;  %v3880_v11 = vpop.permute.xlu0 %242 }
  0x9a   : > { %v3891_v15 = vpop.permute.xlu0 %247 }
  0x9b   : > { %v3887_v12 = vpop.permute.xlu1 %274 }
  0x9c   : > { %6700 = vst [vmem:[#allocation5_spill] sm:$0xff] %v3887_v12 }
  0x9f   : > { %v3899_v18 = vpop.permute.xlu1 %282  ;;  %v3905_v25 = vpop.permute.xlu0 %278 }
  0xa0   : > { %6701 = vst [vmem:[#allocation6_spill] sm:$0xff] %v3899_v18  ;;  %6702 = vst [vmem:[#allocation7_spill] sm:$0xff] %v3905_v25 }
  0xa4   : > { %v305_v33 = vpop.permute.xlu1 %304  ;;  %v309_v44 = vpop.permute.xlu0 %308 }
  0xa5   : > { %v316_v35 = vmul.f32 %v305_v33, %v3909_v29  ;;  %v315_v36 = vmul.f32 %v305_v33, %v3911_v30  ;;  %v318_v45 = vmul.f32 %v305_v33, %v3917_v37  ;;  %v317_v46 = vmul.f32 %v305_v33, %v3921_v41 }
  0xa6   : > { %v320_v51 = vmul.f32 %v309_v44, %v3926_v43  ;;  %v319_v52 = vmul.f32 %v309_v44, %v3930_v47  ;;  %v322_v2 = vmul.f32 %v309_v44, %v3940_v56  ;;  %v321_v4 = vmul.f32 %v309_v44, %v3943_v59 }
  0xa7   : > { %341 = vrot.lane.b32.xlu0 %v316_v35, %s3736_s11  ;;  %339 = vrot.lane.b32.xlu1 %v315_v36, %s3736_s11 }
  0xa8   : > { %v313_v6 = vpop.permute.xlu1 %312 }
  0xa9   : > { %v324_v16 = vmul.f32 %v313_v6, %v3953_v9  ;;  %v323_v17 = vmul.f32 %v313_v6, %v3957_v13  ;;  %v326_v21 = vmul.f32 %v313_v6, %v3962_v19  ;;  %v325_v22 = vmul.f32 %v313_v6, %v3964_v20  ;;  %v397_v27 = vpop.permute.xlu0 %396 }
  0xaa   : > { %v408_v32 = vmul.f32 %v397_v27, %v3926_v43  ;;  %v407_v33 = vmul.f32 %v397_v27, %v3930_v47  ;;  %v410_v34 = vmul.f32 %v397_v27, %v3940_v56  ;;  %v409_v35 = vmul.f32 %v397_v27, %v3943_v59 }
  0xab   : > { %345 = vrot.lane.b32.xlu0 %v318_v45, %s3736_s11  ;;  %343 = vrot.lane.b32.xlu1 %v317_v46, %s3736_s11 }
  0xad   : > { %v393_v23 = vpop.permute.xlu1 %392 }
  0xae   : > { %v404_v24 = vmul.f32 %v393_v23, %v3909_v29  ;;  %v403_v26 = vmul.f32 %v393_v23, %v3911_v30  ;;  %v406_v28 = vmul.f32 %v393_v23, %v3917_v37  ;;  %v405_v31 = vmul.f32 %v393_v23, %v3921_v41  ;;  %v484_v48 = vpop.permute.xlu0 %483 }
  0xaf   : > { %349 = vrot.lane.b32.xlu0 %v320_v51, %s3736_s11  ;;  %347 = vrot.lane.b32.xlu1 %v319_v52, %s3736_s11  ;;  %v495_v51 = vmul.f32 %v484_v48, %v3926_v43  ;;  %v494_v52 = vmul.f32 %v484_v48, %v3930_v47  ;;  %v497_v53 = vmul.f32 %v484_v48, %v3940_v56 }
  0xb0   : > { %v496_v54 = vmul.f32 %v484_v48, %v3943_v59 }
  0xb1   : > { %v401_v36 = vpop.permute.xlu1 %400 }
  0xb2   : > { %v412_v38 = vmul.f32 %v401_v36, %v3953_v9  ;;  %v411_v39 = vmul.f32 %v401_v36, %v3957_v13  ;;  %v414_v40 = vmul.f32 %v401_v36, %v3962_v19  ;;  %v413_v42 = vmul.f32 %v401_v36, %v3964_v20 }
  0xb3   : > { %353 = vrot.lane.b32.xlu0 %v322_v2, %s3736_s11  ;;  %351 = vrot.lane.b32.xlu1 %v321_v4, %s3736_s11  ;;  %v572_v4 = vpop.permute.xlu0 %571 }
  0xb4   : > { %v583_v7 = vmul.f32 %v572_v4, %v3926_v43  ;;  %v582_v8 = vmul.f32 %v572_v4, %v3930_v47  ;;  %v585_v14 = vmul.f32 %v572_v4, %v3940_v56 }
  0xb6   : > { %v480_v44 = vpop.permute.xlu1 %479 }
  0xb7   : > { %357 = vrot.lane.b32.xlu0 %v324_v16, %s3736_s11  ;;  %355 = vrot.lane.b32.xlu1 %v323_v17, %s3736_s11  ;;  %v491_v45 = vmul.f32 %v480_v44, %v3909_v29  ;;  %v490_v46 = vmul.f32 %v480_v44, %v3911_v30  ;;  %v493_v49 = vmul.f32 %v480_v44, %v3917_v37 }
  0xb8   : > { %v492_v50 = vmul.f32 %v480_v44, %v3921_v41  ;;  %v584_v16 = vmul.f32 %v572_v4, %v3943_v59 }
  0xba   : > { %v488_v55 = vpop.permute.xlu1 %487 }
  0xbb   : > { %361 = vrot.lane.b32.xlu0 %v326_v21, %s3736_s11  ;;  %359 = vrot.lane.b32.xlu1 %v325_v22, %s3736_s11  ;;  %v499_v57 = vmul.f32 %v488_v55, %v3953_v9  ;;  %v498_v58 = vmul.f32 %v488_v55, %v3957_v13  ;;  %v501_v60 = vmul.f32 %v488_v55, %v3962_v19 }
  0xbc   : > { %v500_v61 = vmul.f32 %v488_v55, %v3964_v20 }
  0xbf   : > { %429 = vrot.lane.b32.xlu0 %v404_v24, %s3736_s11  ;;  %427 = vrot.lane.b32.xlu1 %v403_v26, %s3736_s11  ;;  %v568_v62 = vpop.permute.xlu1 %567 }
  0xc0   : > { %v579_v63 = vmul.f32 %v568_v62, %v3909_v29  ;;  %v578_v2 = vmul.f32 %v568_v62, %v3911_v30  ;;  %v581_v5 = vmul.f32 %v568_v62, %v3917_v37  ;;  %v580_v6 = vmul.f32 %v568_v62, %v3921_v41 }
  0xc3   : > { %433 = vrot.lane.b32.xlu0 %v406_v28, %s3736_s11  ;;  %431 = vrot.lane.b32.xlu1 %v405_v31, %s3736_s11  ;;  %v576_v17 = vpop.permute.xlu1 %575 }
  0xc4   : > { %v587_v21 = vmul.f32 %v576_v17, %v3953_v9  ;;  %v586_v22 = vmul.f32 %v576_v17, %v3957_v13  ;;  %v589_v23 = vmul.f32 %v576_v17, %v3962_v19  ;;  %v588_v24 = vmul.f32 %v576_v17, %v3964_v20 }
  0xc7   : > { %437 = vrot.lane.b32.xlu0 %v408_v32, %s3736_s11  ;;  %435 = vrot.lane.b32.xlu1 %v407_v33, %s3736_s11  ;;  %v3738_v32 = vmov 13  }
  0xcb   : > { %441 = vrot.lane.b32.xlu0 %v410_v34, %s3736_s11  ;;  %439 = vrot.lane.b32.xlu1 %v409_v35, %s3736_s11 }
  0xcf   : > { %445 = vrot.lane.b32.xlu0 %v412_v38, %s3736_s11  ;;  %443 = vrot.lane.b32.xlu1 %v411_v39, %s3736_s11 }
  0xd3   : > { %449 = vrot.lane.b32.xlu0 %v414_v40, %s3736_s11  ;;  %447 = vrot.lane.b32.xlu1 %v413_v42, %s3736_s11 }
  0xd7   : > { %516 = vrot.lane.b32.xlu0 %v491_v45, %s3737_s17  ;;  %514 = vrot.lane.b32.xlu1 %v490_v46, %s3737_s17 }
  0xdb   : > { %520 = vrot.lane.b32.xlu0 %v493_v49, %s3737_s17  ;;  %518 = vrot.lane.b32.xlu1 %v492_v50, %s3737_s17 }
  0xdf   : > { %524 = vrot.lane.b32.xlu0 %v495_v51, %s3737_s17  ;;  %522 = vrot.lane.b32.xlu1 %v494_v52, %s3737_s17 }
  0xe3   : > { %528 = vrot.lane.b32.xlu0 %v497_v53, %s3737_s17  ;;  %526 = vrot.lane.b32.xlu1 %v496_v54, %s3737_s17 }
  0xe7   : > { %532 = vrot.lane.b32.xlu0 %v499_v57, %s3737_s17  ;;  %530 = vrot.lane.b32.xlu1 %v498_v58, %s3737_s17 }
  0xeb   : > { %536 = vrot.lane.b32.xlu0 %v501_v60, %s3737_s17  ;;  %534 = vrot.lane.b32.xlu1 %v500_v61, %s3737_s17 }
  0xef   : > { %604 = vrot.lane.b32.xlu0 %v579_v63, %s3737_s17  ;;  %602 = vrot.lane.b32.xlu1 %v578_v2, %s3737_s17 }
  0xf3   : > { %608 = vrot.lane.b32.xlu0 %v581_v5, %s3737_s17  ;;  %606 = vrot.lane.b32.xlu1 %v580_v6, %s3737_s17 }
  0xf7   : > { %612 = vrot.lane.b32.xlu0 %v583_v7, %s3737_s17  ;;  %610 = vrot.lane.b32.xlu1 %v582_v8, %s3737_s17 }
  0xfb   : > { %616 = vrot.lane.b32.xlu0 %v585_v14, %s3737_s17  ;;  %614 = vrot.lane.b32.xlu1 %v584_v16, %s3737_s17 }
  0xff   : > { %620 = vrot.lane.b32.xlu0 %v587_v21, %s3737_s17  ;;  %618 = vrot.lane.b32.xlu1 %v586_v22, %s3737_s17 }
 0x103   : > { %624 = vrot.lane.b32.xlu0 %v589_v23, %s3737_s17  ;;  %622 = vrot.lane.b32.xlu1 %v588_v24, %s3737_s17 }
 0x107   : > { %654 = vperm.xlu1 %3598, %v3851_v1   ;;  %658 = vperm.xlu0 %3599, %v3858_v3  }
 0x10b   : > { %662 = vperm.xlu1 %3598, %v3846_v0   ;;  %3601 = vset.pattern.permute.xlu0 %v3738_v32 }
 0x10f   : > { %3600 = vset.pattern.permute.xlu1 %v3738_v32 }
 0x119   : > { %v4047_v26 = vpop.permute.xlu0 %341  ;;  %v4049_v27 = vpop.permute.xlu1 %339 }
 0x11d   : > { %v4051_v28 = vpop.permute.xlu0 %345  ;;  %v4053_v31 = vpop.permute.xlu1 %343 }
 0x121   : > { %v4055_v33 = vpop.permute.xlu0 %349  ;;  %v4057_v34 = vpop.permute.xlu1 %347 }
 0x125   : > { %v4059_v35 = vpop.permute.xlu0 %353  ;;  %v4061_v36 = vpop.permute.xlu1 %351 }
 0x129   : > { %v4063_v38 = vpop.permute.xlu0 %357  ;;  %v4065_v39 = vpop.permute.xlu1 %355 }
 0x12d   : > { %v4067_v40 = vpop.permute.xlu0 %361  ;;  %v4069_v42 = vpop.permute.xlu1 %359 }
 0x131   : > { %v4071_v44 = vpop.permute.xlu0 %429  ;;  %v4073_v45 = vpop.permute.xlu1 %427 }
 0x132   : > { %6703 = vst [vmem:[#allocation8_spill] sm:$0xff] %v4071_v44  ;;  %6704 = vst [vmem:[#allocation9_spill] sm:$0xff] %v4073_v45 }
 0x135   : > { %v4075_v46 = vpop.permute.xlu0 %433  ;;  %v4077_v48 = vpop.permute.xlu1 %431 }
 0x136   : > { %6705 = vst [vmem:[#allocation10_spill] sm:$0xff] %v4075_v46  ;;  %6706 = vst [vmem:[#allocation11_spill] sm:$0xff] %v4077_v48 }
 0x139   : > { %v4079_v49 = vpop.permute.xlu0 %437  ;;  %v4081_v50 = vpop.permute.xlu1 %435 }
 0x13a   : > { %6707 = vst [vmem:[#allocation12_spill] sm:$0xff] %v4079_v49  ;;  %6708 = vst [vmem:[#allocation13_spill] sm:$0xff] %v4081_v50 }
 0x13d   : > { %v4083_v51 = vpop.permute.xlu0 %441  ;;  %v4085_v52 = vpop.permute.xlu1 %439 }
 0x13e   : > { %6709 = vst [vmem:[#allocation14_spill] sm:$0xff] %v4083_v51  ;;  %6710 = vst [vmem:[#allocation15_spill] sm:$0xff] %v4085_v52 }
 0x141   : > { %v4087_v53 = vpop.permute.xlu0 %445  ;;  %v4089_v54 = vpop.permute.xlu1 %443 }
 0x142   : > { %6711 = vst [vmem:[#allocation16_spill] sm:$0xff] %v4087_v53  ;;  %6712 = vst [vmem:[#allocation17_spill] sm:$0xff] %v4089_v54 }
 0x145   : > { %v4091_v55 = vpop.permute.xlu0 %449  ;;  %v4093_v57 = vpop.permute.xlu1 %447 }
 0x146   : > { %6713 = vst [vmem:[#allocation18_spill] sm:$0xff] %v4091_v55  ;;  %6714 = vst [vmem:[#allocation19_spill] sm:$0xff] %v4093_v57 }
 0x149   : > { %v4095_v58 = vpop.permute.xlu0 %516  ;;  %v4097_v60 = vpop.permute.xlu1 %514 }
 0x14d   : > { %v4099_v61 = vpop.permute.xlu0 %520  ;;  %v4101_v62 = vpop.permute.xlu1 %518 }
 0x151   : > { %v4103_v63 = vpop.permute.xlu0 %524  ;;  %v4105_v2 = vpop.permute.xlu1 %522 }
 0x155   : > { %v4107_v4 = vpop.permute.xlu1 %526  ;;  %v4109_v5 = vpop.permute.xlu0 %528 }
 0x159   : > { %v4111_v6 = vpop.permute.xlu1 %530  ;;  %v4113_v7 = vpop.permute.xlu0 %532 }
 0x15d   : > { %v4115_v8 = vpop.permute.xlu1 %534  ;;  %v4117_v14 = vpop.permute.xlu0 %536 }
 0x161   : > { %v4119_v16 = vpop.permute.xlu1 %602  ;;  %v4121_v17 = vpop.permute.xlu0 %604 }
 0x162   : > { %6715 = vst [vmem:[#allocation20_spill] sm:$0xff] %v4119_v16  ;;  %6716 = vst [vmem:[#allocation21_spill] sm:$0xff] %v4121_v17 }
 0x165   : > { %v4123_v21 = vpop.permute.xlu1 %606  ;;  %v4125_v22 = vpop.permute.xlu0 %608 }
 0x166   : > { %6717 = vst [vmem:[#allocation22_spill] sm:$0xff] %v4123_v21  ;;  %6718 = vst [vmem:[#allocation23_spill] sm:$0xff] %v4125_v22 }
 0x169   : > { %v4127_v23 = vpop.permute.xlu1 %610  ;;  %v4129_v24 = vpop.permute.xlu0 %612 }
 0x16a   : > { %6719 = vst [vmem:[#allocation24_spill] sm:$0xff] %v4127_v23  ;;  %6720 = vst [vmem:[#allocation25_spill] sm:$0xff] %v4129_v24 }
 0x16d   : > { %v4131_v32 = vpop.permute.xlu1 %614  ;;  %v4133_v55 = vpop.permute.xlu0 %616 }
 0x16e   : > { %6721 = vst [vmem:[#allocation26_spill] sm:$0xff] %v4131_v32  ;;  %6722 = vst [vmem:[#allocation27_spill] sm:$0xff] %v4133_v55 }
 0x171   : > { %v4135_v57 = vpop.permute.xlu1 %618  ;;  %v4137_v54 = vpop.permute.xlu0 %620 }
 0x172   : > { %6723 = vst [vmem:[#allocation28_spill] sm:$0xff] %v4135_v57  ;;  %6724 = vst [vmem:[#allocation29_spill] sm:$0xff] %v4137_v54 }
 0x175   : > { %v4139_v53 = vpop.permute.xlu1 %622  ;;  %v4141_v16 = vpop.permute.xlu0 %624 }
 0x176   : > { %6725 = vst [vmem:[#allocation30_spill] sm:$0xff] %v4139_v53  ;;  %6726 = vst [vmem:[#allocation31_spill] sm:$0xff] %v4141_v16 }
 0x186   : > { %v655_v17 = vpop.permute.xlu1 %654  ;;  %v659_v32 = vpop.permute.xlu0 %658 }
 0x187   : > { %v666_v21 = vmul.f32 %v655_v17, %v3909_v29  ;;  %v665_v22 = vmul.f32 %v655_v17, %v3911_v30  ;;  %v668_v55 = vmul.f32 %v655_v17, %v3917_v37  ;;  %v667_v57 = vmul.f32 %v655_v17, %v3921_v41 }
 0x188   : > { %v670_v16 = vmul.f32 %v659_v32, %v3926_v43  ;;  %v669_v53 = vmul.f32 %v659_v32, %v3930_v47  ;;  %v3740_v17 = vmov 16  }
 0x189   : > { %691 = vrot.lane.b32.xlu0 %v666_v21, %s3739_s19  ;;  %689 = vrot.lane.b32.xlu1 %v665_v22, %s3739_s19  ;;  %v672_v21 = vmul.f32 %v659_v32, %v3940_v56  ;;  %v671_v22 = vmul.f32 %v659_v32, %v3943_v59 }
 0x18a   : > { %v663_v54 = vpop.permute.xlu1 %662 }
 0x18d   : > { %695 = vrot.lane.b32.xlu0 %v668_v55, %s3739_s19  ;;  %693 = vrot.lane.b32.xlu1 %v667_v57, %s3739_s19  ;;  %v674_v55 = vmul.f32 %v663_v54, %v3953_v9  ;;  %v673_v57 = vmul.f32 %v663_v54, %v3957_v13 }
 0x191   : > { %699 = vrot.lane.b32.xlu0 %v670_v16, %s3739_s19  ;;  %697 = vrot.lane.b32.xlu1 %v669_v53, %s3739_s19  ;;  %v676_v16 = vmul.f32 %v663_v54, %v3962_v19  ;;  %v675_v53 = vmul.f32 %v663_v54, %v3964_v20 }
 0x195   : > { %703 = vrot.lane.b32.xlu0 %v672_v21, %s3739_s19  ;;  %701 = vrot.lane.b32.xlu1 %v671_v22, %s3739_s19 }
 0x199   : > { %707 = vrot.lane.b32.xlu0 %v674_v55, %s3739_s19  ;;  %705 = vrot.lane.b32.xlu1 %v673_v57, %s3739_s19 }
 0x19d   : > { %711 = vrot.lane.b32.xlu0 %v676_v16, %s3739_s19  ;;  %709 = vrot.lane.b32.xlu1 %v675_v53, %s3739_s19 }
 0x1a1   : > { %742 = vperm.xlu1 %3600, %v3851_v1   ;;  %746 = vperm.xlu0 %3601, %v3858_v3  }
 0x1a5   : > { %750 = vperm.xlu1 %3600, %v3846_v0   ;;  %3603 = vset.pattern.permute.xlu0 %v3740_v17 }
 0x1a9   : > { %3602 = vset.pattern.permute.xlu1 %v3740_v17 }
 0x1fb   : > { %v4170_v32 = vpop.permute.xlu1 %689  ;;  %v4172_v21 = vpop.permute.xlu0 %691 }
 0x1ff   : > { %v4174_v22 = vpop.permute.xlu1 %693  ;;  %v4176_v54 = vpop.permute.xlu0 %695 }
 0x203   : > { %v4178_v55 = vpop.permute.xlu1 %697  ;;  %v4180_v57 = vpop.permute.xlu0 %699 }
 0x207   : > { %v4182_v16 = vpop.permute.xlu1 %701  ;;  %v4184_v53 = vpop.permute.xlu0 %703 }
 0x20b   : > { %v4186_v23 = vpop.permute.xlu1 %705  ;;  %v4188_v24 = vpop.permute.xlu0 %707 }
 0x20f   : > { %v4190_v17 = vpop.permute.xlu1 %709  ;;  %v4192_v51 = vpop.permute.xlu0 %711 }
 0x210   : > { %6727 = vst [vmem:[#allocation32_spill] sm:$0xff] %v4192_v51 }
 0x220   : > { %v743_v52 = vpop.permute.xlu1 %742  ;;  %v747_v46 = vpop.permute.xlu0 %746 }
 0x221   : > { %v754_v50 = vmul.f32 %v743_v52, %v3909_v29  ;;  %v753_v49 = vmul.f32 %v743_v52, %v3911_v30  ;;  %v756_v25 = vmul.f32 %v743_v52, %v3917_v37  ;;  %v755_v48 = vmul.f32 %v743_v52, %v3921_v41 }
 0x222   : > { %v758_v45 = vmul.f32 %v747_v46, %v3926_v43  ;;  %v757_v44 = vmul.f32 %v747_v46, %v3930_v47 }
 0x223   : > { %779 = vrot.lane.b32.xlu0 %v754_v50, %s3739_s19  ;;  %777 = vrot.lane.b32.xlu1 %v753_v49, %s3739_s19  ;;  %v760_v50 = vmul.f32 %v747_v46, %v3940_v56  ;;  %v759_v49 = vmul.f32 %v747_v46, %v3943_v59  ;;  %v3741_v46 = vmov 17  }
 0x224   : > { %v751_v18 = vpop.permute.xlu1 %750 }
 0x227   : > { %783 = vrot.lane.b32.xlu0 %v756_v25, %s3739_s19  ;;  %781 = vrot.lane.b32.xlu1 %v755_v48, %s3739_s19  ;;  %v762_v25 = vmul.f32 %v751_v18, %v3953_v9  ;;  %v761_v48 = vmul.f32 %v751_v18, %v3957_v13 }
 0x22b   : > { %787 = vrot.lane.b32.xlu0 %v758_v45, %s3739_s19  ;;  %785 = vrot.lane.b32.xlu1 %v757_v44, %s3739_s19  ;;  %v764_v45 = vmul.f32 %v751_v18, %v3962_v19  ;;  %v763_v44 = vmul.f32 %v751_v18, %v3964_v20 }
 0x22f   : > { %791 = vrot.lane.b32.xlu0 %v760_v50, %s3739_s19  ;;  %789 = vrot.lane.b32.xlu1 %v759_v49, %s3739_s19 }
 0x233   : > { %795 = vrot.lane.b32.xlu0 %v762_v25, %s3739_s19  ;;  %793 = vrot.lane.b32.xlu1 %v761_v48, %s3739_s19 }
 0x237   : > { %799 = vrot.lane.b32.xlu0 %v764_v45, %s3739_s19  ;;  %797 = vrot.lane.b32.xlu1 %v763_v44, %s3739_s19 }
 0x23b   : > { %829 = vperm.xlu1 %3602, %v3851_v1   ;;  %833 = vperm.xlu0 %3603, %v3858_v3  }
 0x23f   : > { %837 = vperm.xlu1 %3602, %v3846_v0   ;;  %3605 = vset.pattern.permute.xlu0 %v3741_v46 }
 0x243   : > { %3604 = vset.pattern.permute.xlu1 %v3741_v46 }
 0x295   : > { %v4221_v52 = vpop.permute.xlu1 %777  ;;  %v4223_v50 = vpop.permute.xlu0 %779 }
 0x296   : > { %6728 = vst [vmem:[#allocation33_spill] sm:$0xff] %v4221_v52  ;;  %6729 = vst [vmem:[#allocation34_spill] sm:$0xff] %v4223_v50 }
 0x299   : > { %v4225_v49 = vpop.permute.xlu1 %781  ;;  %v4227_v18 = vpop.permute.xlu0 %783 }
 0x29a   : > { %6730 = vst [vmem:[#allocation35_spill] sm:$0xff] %v4225_v49  ;;  %6731 = vst [vmem:[#allocation36_spill] sm:$0xff] %v4227_v18 }
 0x29d   : > { %v4229_v25 = vpop.permute.xlu1 %785  ;;  %v4231_v48 = vpop.permute.xlu0 %787 }
 0x29e   : > { %6732 = vst [vmem:[#allocation37_spill] sm:$0xff] %v4229_v25  ;;  %6733 = vst [vmem:[#allocation38_spill] sm:$0xff] %v4231_v48 }
 0x2a1   : > { %v4233_v45 = vpop.permute.xlu1 %789  ;;  %v4235_v44 = vpop.permute.xlu0 %791 }
 0x2a2   : > { %6734 = vst [vmem:[#allocation39_spill] sm:$0xff] %v4233_v45  ;;  %6735 = vst [vmem:[#allocation40_spill] sm:$0xff] %v4235_v44 }
 0x2a5   : > { %v4237_v12 = vpop.permute.xlu1 %793  ;;  %v4239_v51 = vpop.permute.xlu0 %795 }
 0x2a6   : > { %6736 = vst [vmem:[#allocation41_spill] sm:$0xff] %v4237_v12  ;;  %6737 = vst [vmem:[#allocation42_spill] sm:$0xff] %v4239_v51 }
 0x2a9   : > { %v4241_v46 = vpop.permute.xlu1 %797  ;;  %v4243_v52 = vpop.permute.xlu0 %799 }
 0x2aa   : > { %6738 = vst [vmem:[#allocation43_spill] sm:$0xff] %v4241_v46  ;;  %6739 = vst [vmem:[#allocation44_spill] sm:$0xff] %v4243_v52 }
 0x2ba   : > { %v830_v50 = vpop.permute.xlu1 %829  ;;  %v834_v45 = vpop.permute.xlu0 %833 }
 0x2bb   : > { %v841_v49 = vmul.f32 %v830_v50, %v3909_v29  ;;  %v840_v18 = vmul.f32 %v830_v50, %v3911_v30  ;;  %v843_v44 = vmul.f32 %v830_v50, %v3917_v37  ;;  %v842_v12 = vmul.f32 %v830_v50, %v3921_v41 }
 0x2bc   : > { %v845_v52 = vmul.f32 %v834_v45, %v3926_v43  ;;  %v844_v46 = vmul.f32 %v834_v45, %v3930_v47 }
 0x2bd   : > { %866 = vrot.lane.b32.xlu0 %v841_v49, %s3742_s20  ;;  %864 = vrot.lane.b32.xlu1 %v840_v18, %s3742_s20  ;;  %v847_v49 = vmul.f32 %v834_v45, %v3940_v56  ;;  %v846_v18 = vmul.f32 %v834_v45, %v3943_v59  ;;  %v3743_v45 = vmov 20  }
 0x2be   : > { %v838_v51 = vpop.permute.xlu1 %837 }
 0x2bf   : > { %v849_v50 = vmul.f32 %v838_v51, %v3953_v9 }
 0x2c1   : > { %870 = vrot.lane.b32.xlu0 %v843_v44, %s3742_s20  ;;  %868 = vrot.lane.b32.xlu1 %v842_v12, %s3742_s20  ;;  %v848_v12 = vmul.f32 %v838_v51, %v3957_v13  ;;  %v850_v44 = vmul.f32 %v838_v51, %v3964_v20 }
 0x2c5   : > { %874 = vrot.lane.b32.xlu0 %v845_v52, %s3742_s20  ;;  %872 = vrot.lane.b32.xlu1 %v844_v46, %s3742_s20  ;;  %v851_v52 = vmul.f32 %v838_v51, %v3962_v19 }
 0x2c9   : > { %878 = vrot.lane.b32.xlu0 %v847_v49, %s3742_s20  ;;  %876 = vrot.lane.b32.xlu1 %v846_v18, %s3742_s20 }
 0x2cd   : > { %882 = vrot.lane.b32.xlu0 %v849_v50, %s3742_s20  ;;  %880 = vrot.lane.b32.xlu1 %v848_v12, %s3742_s20 }
 0x2d1   : > { %886 = vrot.lane.b32.xlu0 %v851_v52, %s3742_s20  ;;  %884 = vrot.lane.b32.xlu1 %v850_v44, %s3742_s20 }
 0x2d5   : > { %917 = vperm.xlu1 %3604, %v3851_v1   ;;  %921 = vperm.xlu0 %3605, %v3858_v3  }
 0x2d9   : > { %925 = vperm.xlu1 %3604, %v3846_v0   ;;  %3607 = vset.pattern.permute.xlu0 %v3743_v45 }
 0x2dd   : > { %3606 = vset.pattern.permute.xlu1 %v3743_v45 }
 0x32f   : > { %v4272_v46 = vpop.permute.xlu1 %864  ;;  %v4274_v49 = vpop.permute.xlu0 %866 }
 0x330   : > { %6740 = vst [vmem:[#allocation45_spill] sm:$0xff] %v4272_v46  ;;  %6741 = vst [vmem:[#allocation46_spill] sm:$0xff] %v4274_v49 }
 0x333   : > { %v4276_v18 = vpop.permute.xlu1 %868  ;;  %v4278_v51 = vpop.permute.xlu0 %870 }
 0x334   : > { %6742 = vst [vmem:[#allocation47_spill] sm:$0xff] %v4276_v18  ;;  %6743 = vst [vmem:[#allocation48_spill] sm:$0xff] %v4278_v51 }
 0x337   : > { %v4280_v50 = vpop.permute.xlu1 %872  ;;  %v4282_v12 = vpop.permute.xlu0 %874 }
 0x338   : > { %6744 = vst [vmem:[#allocation49_spill] sm:$0xff] %v4280_v50  ;;  %6745 = vst [vmem:[#allocation50_spill] sm:$0xff] %v4282_v12 }
 0x33b   : > { %v4284_v52 = vpop.permute.xlu1 %876  ;;  %v4286_v44 = vpop.permute.xlu0 %878 }
 0x33c   : > { %6746 = vst [vmem:[#allocation51_spill] sm:$0xff] %v4284_v52  ;;  %6747 = vst [vmem:[#allocation52_spill] sm:$0xff] %v4286_v44 }
 0x33f   : > { %v4288_v25 = vpop.permute.xlu1 %880  ;;  %v4290_v48 = vpop.permute.xlu0 %882 }
 0x340   : > { %6748 = vst [vmem:[#allocation53_spill] sm:$0xff] %v4288_v25  ;;  %6749 = vst [vmem:[#allocation54_spill] sm:$0xff] %v4290_v48 }
 0x343   : > { %v4292_v45 = vpop.permute.xlu1 %884  ;;  %v4294_v46 = vpop.permute.xlu0 %886 }
 0x344   : > { %6750 = vst [vmem:[#allocation55_spill] sm:$0xff] %v4292_v45  ;;  %6751 = vst [vmem:[#allocation56_spill] sm:$0xff] %v4294_v46 }
 0x354   : > { %v918_v49 = vpop.permute.xlu1 %917  ;;  %v922_v52 = vpop.permute.xlu0 %921 }
 0x355   : > { %v929_v18 = vmul.f32 %v918_v49, %v3909_v29  ;;  %v928_v51 = vmul.f32 %v918_v49, %v3911_v30  ;;  %v931_v44 = vmul.f32 %v918_v49, %v3917_v37  ;;  %v930_v25 = vmul.f32 %v918_v49, %v3921_v41 }
 0x356   : > { %v933_v46 = vmul.f32 %v922_v52, %v3926_v43  ;;  %v932_v45 = vmul.f32 %v922_v52, %v3930_v47 }
 0x357   : > { %954 = vrot.lane.b32.xlu0 %v929_v18, %s3742_s20  ;;  %952 = vrot.lane.b32.xlu1 %v928_v51, %s3742_s20  ;;  %v935_v18 = vmul.f32 %v922_v52, %v3940_v56  ;;  %v934_v51 = vmul.f32 %v922_v52, %v3943_v59  ;;  %v3744_v52 = vmov 21  }
 0x358   : > { %v926_v48 = vpop.permute.xlu1 %925 }
 0x359   : > { %v937_v49 = vmul.f32 %v926_v48, %v3953_v9 }
 0x35b   : > { %958 = vrot.lane.b32.xlu0 %v931_v44, %s3742_s20  ;;  %956 = vrot.lane.b32.xlu1 %v930_v25, %s3742_s20  ;;  %v936_v25 = vmul.f32 %v926_v48, %v3957_v13  ;;  %v938_v44 = vmul.f32 %v926_v48, %v3964_v20 }
 0x35f   : > { %962 = vrot.lane.b32.xlu0 %v933_v46, %s3742_s20  ;;  %960 = vrot.lane.b32.xlu1 %v932_v45, %s3742_s20  ;;  %v939_v46 = vmul.f32 %v926_v48, %v3962_v19 }
 0x363   : > { %966 = vrot.lane.b32.xlu0 %v935_v18, %s3742_s20  ;;  %964 = vrot.lane.b32.xlu1 %v934_v51, %s3742_s20 }
 0x367   : > { %970 = vrot.lane.b32.xlu0 %v937_v49, %s3742_s20  ;;  %968 = vrot.lane.b32.xlu1 %v936_v25, %s3742_s20 }
 0x36b   : > { %974 = vrot.lane.b32.xlu0 %v939_v46, %s3742_s20  ;;  %972 = vrot.lane.b32.xlu1 %v938_v44, %s3742_s20 }
 0x36f   : > { %1004 = vperm.xlu1 %3606, %v3851_v1   ;;  %1008 = vperm.xlu0 %3607, %v3858_v3  }
 0x373   : > { %1012 = vperm.xlu1 %3606, %v3846_v0   ;;  %3609 = vset.pattern.permute.xlu0 %v3744_v52 }
 0x377   : > { %3608 = vset.pattern.permute.xlu1 %v3744_v52 }
 0x3c9   : > { %v4323_v45 = vpop.permute.xlu1 %952  ;;  %v4325_v18 = vpop.permute.xlu0 %954 }
 0x3ca   : > { %6752 = vst [vmem:[#allocation57_spill] sm:$0xff] %v4323_v45  ;;  %6753 = vst [vmem:[#allocation58_spill] sm:$0xff] %v4325_v18 }
 0x3cd   : > { %v4327_v51 = vpop.permute.xlu1 %956  ;;  %v4329_v48 = vpop.permute.xlu0 %958 }
 0x3ce   : > { %6754 = vst [vmem:[#allocation59_spill] sm:$0xff] %v4327_v51  ;;  %6755 = vst [vmem:[#allocation60_spill] sm:$0xff] %v4329_v48 }
 0x3d1   : > { %v4331_v49 = vpop.permute.xlu1 %960  ;;  %v4333_v25 = vpop.permute.xlu0 %962 }
 0x3d2   : > { %6756 = vst [vmem:[#allocation61_spill] sm:$0xff] %v4331_v49  ;;  %6757 = vst [vmem:[#allocation62_spill] sm:$0xff] %v4333_v25 }
 0x3d5   : > { %v4335_v46 = vpop.permute.xlu1 %964  ;;  %v4337_v44 = vpop.permute.xlu0 %966 }
 0x3d6   : > { %6758 = vst [vmem:[#allocation63_spill] sm:$0xff] %v4335_v46  ;;  %6759 = vst [vmem:[#allocation64_spill] sm:$0xff] %v4337_v44 }
 0x3d9   : > { %v4339_v50 = vpop.permute.xlu1 %968  ;;  %v4341_v12 = vpop.permute.xlu0 %970 }
 0x3da   : > { %6760 = vst [vmem:[#allocation65_spill] sm:$0xff] %v4339_v50  ;;  %6761 = vst [vmem:[#allocation66_spill] sm:$0xff] %v4341_v12 }
 0x3dd   : > { %v4343_v52 = vpop.permute.xlu1 %972  ;;  %v4345_v45 = vpop.permute.xlu0 %974 }
 0x3de   : > { %6762 = vst [vmem:[#allocation67_spill] sm:$0xff] %v4343_v52  ;;  %6763 = vst [vmem:[#allocation68_spill] sm:$0xff] %v4345_v45 }
 0x3ee   : > { %v1005_v18 = vpop.permute.xlu1 %1004  ;;  %v1009_v46 = vpop.permute.xlu0 %1008 }
 0x3ef   : > { %v1016_v51 = vmul.f32 %v1005_v18, %v3909_v29  ;;  %v1015_v48 = vmul.f32 %v1005_v18, %v3911_v30  ;;  %v1018_v44 = vmul.f32 %v1005_v18, %v3917_v37  ;;  %v1017_v50 = vmul.f32 %v1005_v18, %v3921_v41 }
 0x3f0   : > { %v1020_v45 = vmul.f32 %v1009_v46, %v3926_v43  ;;  %v1019_v52 = vmul.f32 %v1009_v46, %v3930_v47 }
 0x3f1   : > { %1041 = vrot.lane.b32.xlu0 %v1016_v51, %s3745_s24  ;;  %1039 = vrot.lane.b32.xlu1 %v1015_v48, %s3745_s24  ;;  %v1022_v51 = vmul.f32 %v1009_v46, %v3940_v56  ;;  %v1021_v48 = vmul.f32 %v1009_v46, %v3943_v59  ;;  %v3746_v46 = vmov 24  }
 0x3f2   : > { %v1013_v12 = vpop.permute.xlu1 %1012 }
 0x3f3   : > { %v1024_v18 = vmul.f32 %v1013_v12, %v3953_v9 }
 0x3f5   : > { %1045 = vrot.lane.b32.xlu0 %v1018_v44, %s3745_s24  ;;  %1043 = vrot.lane.b32.xlu1 %v1017_v50, %s3745_s24  ;;  %v1023_v50 = vmul.f32 %v1013_v12, %v3957_v13  ;;  %v1025_v44 = vmul.f32 %v1013_v12, %v3964_v20 }
 0x3f9   : > { %1049 = vrot.lane.b32.xlu0 %v1020_v45, %s3745_s24  ;;  %1047 = vrot.lane.b32.xlu1 %v1019_v52, %s3745_s24  ;;  %v1026_v45 = vmul.f32 %v1013_v12, %v3962_v19 }
 0x3fd   : > { %1053 = vrot.lane.b32.xlu0 %v1022_v51, %s3745_s24  ;;  %1051 = vrot.lane.b32.xlu1 %v1021_v48, %s3745_s24 }
 0x401   : > { %1057 = vrot.lane.b32.xlu0 %v1024_v18, %s3745_s24  ;;  %1055 = vrot.lane.b32.xlu1 %v1023_v50, %s3745_s24 }
 0x405   : > { %1061 = vrot.lane.b32.xlu0 %v1026_v45, %s3745_s24  ;;  %1059 = vrot.lane.b32.xlu1 %v1025_v44, %s3745_s24 }
 0x409   : > { %1092 = vperm.xlu1 %3608, %v3851_v1   ;;  %1096 = vperm.xlu0 %3609, %v3858_v3  }
 0x40d   : > { %1100 = vperm.xlu1 %3608, %v3846_v0   ;;  %3611 = vset.pattern.permute.xlu0 %v3746_v46 }
 0x411   : > { %3610 = vset.pattern.permute.xlu1 %v3746_v46 }
 0x463   : > { %v4374_v52 = vpop.permute.xlu1 %1039  ;;  %v4376_v51 = vpop.permute.xlu0 %1041 }
 0x464   : > { %6764 = vst [vmem:[#allocation69_spill] sm:$0xff] %v4374_v52  ;;  %6765 = vst [vmem:[#allocation70_spill] sm:$0xff] %v4376_v51 }
 0x467   : > { %v4378_v48 = vpop.permute.xlu1 %1043  ;;  %v4380_v12 = vpop.permute.xlu0 %1045 }
 0x468   : > { %6766 = vst [vmem:[#allocation71_spill] sm:$0xff] %v4378_v48  ;;  %6767 = vst [vmem:[#allocation72_spill] sm:$0xff] %v4380_v12 }
 0x46b   : > { %v4382_v18 = vpop.permute.xlu1 %1047  ;;  %v4384_v50 = vpop.permute.xlu0 %1049 }
 0x46c   : > { %6768 = vst [vmem:[#allocation73_spill] sm:$0xff] %v4382_v18  ;;  %6769 = vst [vmem:[#allocation74_spill] sm:$0xff] %v4384_v50 }
 0x46f   : > { %v4386_v1 = vpop.permute.xlu1 %1051  ;;  %v4388_v3 = vpop.permute.xlu0 %1053 }
 0x470   : > { %6770 = vst [vmem:[#allocation75_spill] sm:$0xff] %v4386_v1  ;;  %6771 = vst [vmem:[#allocation76_spill] sm:$0xff] %v4388_v3 }
 0x473   : > { %v4390_v0 = vpop.permute.xlu1 %1055  ;;  %v4392_v45 = vpop.permute.xlu0 %1057 }
 0x474   : > { %6772 = vst [vmem:[#allocation77_spill] sm:$0xff] %v4390_v0  ;;  %6773 = vst [vmem:[#allocation78_spill] sm:$0xff] %v4392_v45 }
 0x477   : > { %v4394_v44 = vpop.permute.xlu1 %1059  ;;  %v4396_v46 = vpop.permute.xlu0 %1061 }
 0x478   : > { %6774 = vst [vmem:[#allocation79_spill] sm:$0xff] %v4394_v44  ;;  %6775 = vst [vmem:[#allocation80_spill] sm:$0xff] %v4396_v46 }
 0x488   : > { %v1093_v49 = vpop.permute.xlu1 %1092  ;;  %v1097_v1 = vpop.permute.xlu0 %1096 }
 0x489   : > { %v1104_v25 = vmul.f32 %v1093_v49, %v3909_v29  ;;  %v1103_v12 = vmul.f32 %v1093_v49, %v3911_v30  ;;  %v1106_v3 = vmul.f32 %v1093_v49, %v3917_v37  ;;  %v1105_v0 = vmul.f32 %v1093_v49, %v3921_v41 }
 0x48a   : > { %v1108_v46 = vmul.f32 %v1097_v1, %v3926_v43  ;;  %v1107_v44 = vmul.f32 %v1097_v1, %v3930_v47 }
 0x48b   : > { %1129 = vrot.lane.b32.xlu0 %v1104_v25, %s3745_s24  ;;  %1127 = vrot.lane.b32.xlu1 %v1103_v12, %s3745_s24  ;;  %v1110_v25 = vmul.f32 %v1097_v1, %v3940_v56  ;;  %v1109_v12 = vmul.f32 %v1097_v1, %v3943_v59  ;;  %v4425_v1 = vld [vmem:[%s6577_s0] sm:$0xff] }
 0x48c   : > { %v1101_v45 = vpop.permute.xlu1 %1100 }
 0x48d   : > { %v1112_v49 = vmul.f32 %v1101_v45, %v3953_v9 }
 0x48f   : > { %1133 = vrot.lane.b32.xlu0 %v1106_v3, %s3745_s24  ;;  %1131 = vrot.lane.b32.xlu1 %v1105_v0, %s3745_s24  ;;  %v1111_v3 = vmul.f32 %v1101_v45, %v3957_v13  ;;  %v1114_v0 = vmul.f32 %v1101_v45, %v3962_v19 }
 0x493   : > { %1137 = vrot.lane.b32.xlu0 %v1108_v46, %s3745_s24  ;;  %1135 = vrot.lane.b32.xlu1 %v1107_v44, %s3745_s24  ;;  %v1113_v44 = vmul.f32 %v1101_v45, %v3964_v20  ;;  %v4431_v46 = vld [vmem:[%s6577_s0 + $0x8] sm:$0xff]  ;;  %v4437_v45 = vld [vmem:[%s6577_s0 + $0x10] sm:$0xf] }
 0x497   : > { %1141 = vrot.lane.b32.xlu0 %v1110_v25, %s3745_s24  ;;  %1139 = vrot.lane.b32.xlu1 %v1109_v12, %s3745_s24  ;;  %v3747_v25 = vmov 25  }
 0x49b   : > { %1145 = vrot.lane.b32.xlu0 %v1112_v49, %s3745_s24  ;;  %1143 = vrot.lane.b32.xlu1 %v1111_v3, %s3745_s24 }
 0x49f   : > { %1149 = vrot.lane.b32.xlu0 %v1114_v0, %s3745_s24  ;;  %1147 = vrot.lane.b32.xlu1 %v1113_v44, %s3745_s24 }
 0x4a3   : > { %1179 = vperm.xlu1 %3610, %v4425_v1   ;;  %1183 = vperm.xlu0 %3611, %v4431_v46  }
 0x4a7   : > { %1187 = vperm.xlu1 %3610, %v4437_v45   ;;  %3613 = vset.pattern.permute.xlu0 %v3747_v25 }
 0x4ab   : > { %3612 = vset.pattern.permute.xlu1 %v3747_v25 }
 0x4fd   : > { %v4440_v12 = vpop.permute.xlu1 %1127  ;;  %v4442_v49 = vpop.permute.xlu0 %1129 }
 0x4fe   : > { %6776 = vst [vmem:[#allocation81_spill] sm:$0xff] %v4440_v12  ;;  %6777 = vst [vmem:[#allocation82_spill] sm:$0xff] %v4442_v49 }
 0x501   : > { %v4444_v3 = vpop.permute.xlu1 %1131  ;;  %v4446_v0 = vpop.permute.xlu0 %1133 }
 0x502   : > { %6778 = vst [vmem:[#allocation83_spill] sm:$0xff] %v4444_v3  ;;  %6779 = vst [vmem:[#allocation84_spill] sm:$0xff] %v4446_v0 }
 0x505   : > { %v4448_v44 = vpop.permute.xlu1 %1135  ;;  %v4450_v18 = vpop.permute.xlu0 %1137 }
 0x506   : > { %6780 = vst [vmem:[#allocation85_spill] sm:$0xff] %v4448_v44  ;;  %6781 = vst [vmem:[#allocation86_spill] sm:$0xff] %v4450_v18 }
 0x509   : > { %v4452_v50 = vpop.permute.xlu1 %1139  ;;  %v4454_v48 = vpop.permute.xlu0 %1141 }
 0x50a   : > { %6782 = vst [vmem:[#allocation87_spill] sm:$0xff] %v4452_v50  ;;  %6783 = vst [vmem:[#allocation88_spill] sm:$0xff] %v4454_v48 }
 0x50d   : > { %v4456_v52 = vpop.permute.xlu1 %1143  ;;  %v4458_v51 = vpop.permute.xlu0 %1145 }
 0x50e   : > { %6784 = vst [vmem:[#allocation89_spill] sm:$0xff] %v4456_v52  ;;  %6785 = vst [vmem:[#allocation90_spill] sm:$0xff] %v4458_v51 }
 0x511   : > { %v4460_v25 = vpop.permute.xlu1 %1147  ;;  %v4462_v12 = vpop.permute.xlu0 %1149 }
 0x512   : > { %6786 = vst [vmem:[#allocation91_spill] sm:$0xff] %v4460_v25  ;;  %6787 = vst [vmem:[#allocation92_spill] sm:$0xff] %v4462_v12 }
 0x522   : > { %v1180_v49 = vpop.permute.xlu1 %1179  ;;  %v1184_v50 = vpop.permute.xlu0 %1183 }
 0x523   : > { %v1191_v3 = vmul.f32 %v1180_v49, %v3909_v29  ;;  %v1190_v0 = vmul.f32 %v1180_v49, %v3911_v30  ;;  %v1193_v48 = vmul.f32 %v1180_v49, %v3917_v37  ;;  %v1192_v52 = vmul.f32 %v1180_v49, %v3921_v41 }
 0x524   : > { %v1195_v12 = vmul.f32 %v1184_v50, %v3926_v43  ;;  %v1194_v25 = vmul.f32 %v1184_v50, %v3930_v47 }
 0x525   : > { %1216 = vrot.lane.b32.xlu0 %v1191_v3, %s3748_s4  ;;  %1214 = vrot.lane.b32.xlu1 %v1190_v0, %s3748_s4  ;;  %v1197_v3 = vmul.f32 %v1184_v50, %v3940_v56  ;;  %v1196_v0 = vmul.f32 %v1184_v50, %v3943_v59  ;;  %v3749_v50 = vmov 28  }
 0x526   : > { %v1188_v51 = vpop.permute.xlu1 %1187 }
 0x527   : > { %v1200_v49 = vmul.f32 %v1188_v51, %v3964_v20 }
 0x529   : > { %1220 = vrot.lane.b32.xlu0 %v1193_v48, %s3748_s4  ;;  %1218 = vrot.lane.b32.xlu1 %v1192_v52, %s3748_s4  ;;  %v1199_v48 = vmul.f32 %v1188_v51, %v3953_v9  ;;  %v1198_v52 = vmul.f32 %v1188_v51, %v3957_v13 }
 0x52d   : > { %1224 = vrot.lane.b32.xlu0 %v1195_v12, %s3748_s4  ;;  %1222 = vrot.lane.b32.xlu1 %v1194_v25, %s3748_s4  ;;  %v1201_v12 = vmul.f32 %v1188_v51, %v3962_v19 }
 0x531   : > { %1228 = vrot.lane.b32.xlu0 %v1197_v3, %s3748_s4  ;;  %1226 = vrot.lane.b32.xlu1 %v1196_v0, %s3748_s4 }
 0x535   : > { %1232 = vrot.lane.b32.xlu0 %v1199_v48, %s3748_s4  ;;  %1230 = vrot.lane.b32.xlu1 %v1198_v52, %s3748_s4 }
 0x539   : > { %1236 = vrot.lane.b32.xlu0 %v1201_v12, %s3748_s4  ;;  %1234 = vrot.lane.b32.xlu1 %v1200_v49, %s3748_s4 }
 0x53d   : > { %1267 = vperm.xlu1 %3612, %v4425_v1   ;;  %1271 = vperm.xlu0 %3613, %v4431_v46  }
 0x541   : > { %1275 = vperm.xlu1 %3612, %v4437_v45   ;;  %3615 = vset.pattern.permute.xlu0 %v3749_v50 }
 0x545   : > { %3614 = vset.pattern.permute.xlu1 %v3749_v50 }
 0x597   : > { %v4491_v25 = vpop.permute.xlu1 %1214  ;;  %v4493_v3 = vpop.permute.xlu0 %1216 }
 0x598   : > { %6788 = vst [vmem:[#allocation93_spill] sm:$0xff] %v4491_v25  ;;  %6789 = vst [vmem:[#allocation94_spill] sm:$0xff] %v4493_v3 }
 0x59b   : > { %v4495_v0 = vpop.permute.xlu1 %1218  ;;  %v4497_v51 = vpop.permute.xlu0 %1220 }
 0x59c   : > { %6790 = vst [vmem:[#allocation95_spill] sm:$0xff] %v4495_v0  ;;  %6791 = vst [vmem:[#allocation96_spill] sm:$0xff] %v4497_v51 }
 0x59f   : > { %v4499_v48 = vpop.permute.xlu1 %1222  ;;  %v4501_v52 = vpop.permute.xlu0 %1224 }
 0x5a0   : > { %6792 = vst [vmem:[#allocation97_spill] sm:$0xff] %v4499_v48  ;;  %6793 = vst [vmem:[#allocation98_spill] sm:$0xff] %v4501_v52 }
 0x5a3   : > { %v4503_v12 = vpop.permute.xlu1 %1226  ;;  %v4505_v49 = vpop.permute.xlu0 %1228 }
 0x5a4   : > { %6794 = vst [vmem:[#allocation99_spill] sm:$0xff] %v4503_v12  ;;  %6795 = vst [vmem:[#allocation100_spill] sm:$0xff] %v4505_v49 }
 0x5a7   : > { %v4507_v44 = vpop.permute.xlu1 %1230  ;;  %v4509_v18 = vpop.permute.xlu0 %1232 }
 0x5a8   : > { %6796 = vst [vmem:[#allocation101_spill] sm:$0xff] %v4507_v44  ;;  %6797 = vst [vmem:[#allocation102_spill] sm:$0xff] %v4509_v18 }
 0x5ab   : > { %v4511_v50 = vpop.permute.xlu1 %1234  ;;  %v4513_v25 = vpop.permute.xlu0 %1236 }
 0x5ac   : > { %6798 = vst [vmem:[#allocation103_spill] sm:$0xff] %v4511_v50  ;;  %6799 = vst [vmem:[#allocation104_spill] sm:$0xff] %v4513_v25 }
 0x5bc   : > { %v1268_v3 = vpop.permute.xlu1 %1267  ;;  %v1272_v12 = vpop.permute.xlu0 %1271 }
 0x5bd   : > { %v1279_v0 = vmul.f32 %v1268_v3, %v3909_v29  ;;  %v1278_v51 = vmul.f32 %v1268_v3, %v3911_v30  ;;  %v1281_v49 = vmul.f32 %v1268_v3, %v3917_v37  ;;  %v1280_v44 = vmul.f32 %v1268_v3, %v3921_v41 }
 0x5be   : > { %v1283_v25 = vmul.f32 %v1272_v12, %v3926_v43  ;;  %v1282_v50 = vmul.f32 %v1272_v12, %v3930_v47 }
 0x5bf   : > { %1304 = vrot.lane.b32.xlu0 %v1279_v0, %s3748_s4  ;;  %1302 = vrot.lane.b32.xlu1 %v1278_v51, %s3748_s4  ;;  %v1285_v0 = vmul.f32 %v1272_v12, %v3940_v56  ;;  %v1284_v51 = vmul.f32 %v1272_v12, %v3943_v59  ;;  %v3750_v12 = vmov 29  }
 0x5c0   : > { %v1276_v18 = vpop.permute.xlu1 %1275 }
 0x5c1   : > { %v1287_v3 = vmul.f32 %v1276_v18, %v3953_v9 }
 0x5c3   : > { %1308 = vrot.lane.b32.xlu0 %v1281_v49, %s3748_s4  ;;  %1306 = vrot.lane.b32.xlu1 %v1280_v44, %s3748_s4  ;;  %v1286_v44 = vmul.f32 %v1276_v18, %v3957_v13  ;;  %v1288_v49 = vmul.f32 %v1276_v18, %v3964_v20 }
 0x5c7   : > { %1312 = vrot.lane.b32.xlu0 %v1283_v25, %s3748_s4  ;;  %1310 = vrot.lane.b32.xlu1 %v1282_v50, %s3748_s4  ;;  %v1289_v25 = vmul.f32 %v1276_v18, %v3962_v19 }
 0x5cb   : > { %1316 = vrot.lane.b32.xlu0 %v1285_v0, %s3748_s4  ;;  %1314 = vrot.lane.b32.xlu1 %v1284_v51, %s3748_s4 }
 0x5cf   : > { %1320 = vrot.lane.b32.xlu0 %v1287_v3, %s3748_s4  ;;  %1318 = vrot.lane.b32.xlu1 %v1286_v44, %s3748_s4 }
 0x5d3   : > { %1324 = vrot.lane.b32.xlu0 %v1289_v25, %s3748_s4  ;;  %1322 = vrot.lane.b32.xlu1 %v1288_v49, %s3748_s4 }
 0x5d7   : > { %1354 = vperm.xlu1 %3614, %v4425_v1   ;;  %1358 = vperm.xlu0 %3615, %v4431_v46  }
 0x5db   : > { %1362 = vperm.xlu1 %3614, %v4437_v45   ;;  %3617 = vset.pattern.permute.xlu0 %v3750_v12 }
 0x5df   : > { %3616 = vset.pattern.permute.xlu1 %v3750_v12 }
 0x631   : > { %v4542_v50 = vpop.permute.xlu1 %1302  ;;  %v4544_v0 = vpop.permute.xlu0 %1304 }
 0x632   : > { %6800 = vst [vmem:[#allocation105_spill] sm:$0xff] %v4542_v50  ;;  %6801 = vst [vmem:[#allocation106_spill] sm:$0xff] %v4544_v0 }
 0x635   : > { %v4546_v51 = vpop.permute.xlu1 %1306  ;;  %v4548_v18 = vpop.permute.xlu0 %1308 }
 0x636   : > { %6802 = vst [vmem:[#allocation107_spill] sm:$0xff] %v4546_v51  ;;  %6803 = vst [vmem:[#allocation108_spill] sm:$0xff] %v4548_v18 }
 0x639   : > { %v4550_v3 = vpop.permute.xlu1 %1310  ;;  %v4552_v44 = vpop.permute.xlu0 %1312 }
 0x63a   : > { %6804 = vst [vmem:[#allocation109_spill] sm:$0xff] %v4550_v3  ;;  %6805 = vst [vmem:[#allocation110_spill] sm:$0xff] %v4552_v44 }
 0x63d   : > { %v4554_v25 = vpop.permute.xlu1 %1314  ;;  %v4556_v49 = vpop.permute.xlu0 %1316 }
 0x63e   : > { %6806 = vst [vmem:[#allocation111_spill] sm:$0xff] %v4554_v25  ;;  %6807 = vst [vmem:[#allocation112_spill] sm:$0xff] %v4556_v49 }
 0x641   : > { %v4558_v48 = vpop.permute.xlu1 %1318  ;;  %v4560_v52 = vpop.permute.xlu0 %1320 }
 0x642   : > { %6808 = vst [vmem:[#allocation113_spill] sm:$0xff] %v4558_v48  ;;  %6809 = vst [vmem:[#allocation114_spill] sm:$0xff] %v4560_v52 }
 0x645   : > { %v4562_v12 = vpop.permute.xlu1 %1322  ;;  %v4564_v50 = vpop.permute.xlu0 %1324 }
 0x646   : > { %6810 = vst [vmem:[#allocation115_spill] sm:$0xff] %v4562_v12  ;;  %6811 = vst [vmem:[#allocation116_spill] sm:$0xff] %v4564_v50 }
 0x656   : > { %v1355_v0 = vpop.permute.xlu1 %1354  ;;  %v1359_v25 = vpop.permute.xlu0 %1358 }
 0x657   : > { %v1366_v51 = vmul.f32 %v1355_v0, %v3909_v29  ;;  %v1365_v18 = vmul.f32 %v1355_v0, %v3911_v30  ;;  %v1368_v49 = vmul.f32 %v1355_v0, %v3917_v37  ;;  %v1367_v48 = vmul.f32 %v1355_v0, %v3921_v41 }
 0x658   : > { %v1370_v50 = vmul.f32 %v1359_v25, %v3926_v43  ;;  %v1369_v12 = vmul.f32 %v1359_v25, %v3930_v47 }
 0x659   : > { %1391 = vrot.lane.b32.xlu0 %v1366_v51, %s3751_s5  ;;  %1389 = vrot.lane.b32.xlu1 %v1365_v18, %s3751_s5  ;;  %v1372_v51 = vmul.f32 %v1359_v25, %v3940_v56  ;;  %v1371_v18 = vmul.f32 %v1359_v25, %v3943_v59  ;;  %v3752_v25 = vmov 32  }
 0x65a   : > { %v1363_v52 = vpop.permute.xlu1 %1362 }
 0x65b   : > { %v1374_v0 = vmul.f32 %v1363_v52, %v3953_v9 }
 0x65d   : > { %1395 = vrot.lane.b32.xlu0 %v1368_v49, %s3751_s5  ;;  %1393 = vrot.lane.b32.xlu1 %v1367_v48, %s3751_s5  ;;  %v1373_v48 = vmul.f32 %v1363_v52, %v3957_v13  ;;  %v1375_v49 = vmul.f32 %v1363_v52, %v3964_v20 }
 0x661   : > { %1399 = vrot.lane.b32.xlu0 %v1370_v50, %s3751_s5  ;;  %1397 = vrot.lane.b32.xlu1 %v1369_v12, %s3751_s5  ;;  %v1376_v50 = vmul.f32 %v1363_v52, %v3962_v19 }
 0x665   : > { %1403 = vrot.lane.b32.xlu0 %v1372_v51, %s3751_s5  ;;  %1401 = vrot.lane.b32.xlu1 %v1371_v18, %s3751_s5 }
 0x669   : > { %1407 = vrot.lane.b32.xlu0 %v1374_v0, %s3751_s5  ;;  %1405 = vrot.lane.b32.xlu1 %v1373_v48, %s3751_s5 }
 0x66d   : > { %1411 = vrot.lane.b32.xlu0 %v1376_v50, %s3751_s5  ;;  %1409 = vrot.lane.b32.xlu1 %v1375_v49, %s3751_s5 }
 0x671   : > { %1442 = vperm.xlu1 %3616, %v4425_v1   ;;  %1446 = vperm.xlu0 %3617, %v4431_v46  }
 0x675   : > { %1450 = vperm.xlu1 %3616, %v4437_v45   ;;  %3619 = vset.pattern.permute.xlu0 %v3752_v25 }
 0x679   : > { %3618 = vset.pattern.permute.xlu1 %v3752_v25 }
 0x6cb   : > { %v4593_v12 = vpop.permute.xlu1 %1389  ;;  %v4595_v51 = vpop.permute.xlu0 %1391 }
 0x6cc   : > { %6812 = vst [vmem:[#allocation117_spill] sm:$0xff] %v4593_v12  ;;  %6813 = vst [vmem:[#allocation118_spill] sm:$0xff] %v4595_v51 }
 0x6cf   : > { %v4597_v18 = vpop.permute.xlu1 %1393  ;;  %v4599_v52 = vpop.permute.xlu0 %1395 }
 0x6d0   : > { %6814 = vst [vmem:[#allocation119_spill] sm:$0xff] %v4597_v18  ;;  %6815 = vst [vmem:[#allocation120_spill] sm:$0xff] %v4599_v52 }
 0x6d3   : > { %v4601_v0 = vpop.permute.xlu1 %1397  ;;  %v4603_v48 = vpop.permute.xlu0 %1399 }
 0x6d4   : > { %6816 = vst [vmem:[#allocation121_spill] sm:$0xff] %v4601_v0  ;;  %6817 = vst [vmem:[#allocation122_spill] sm:$0xff] %v4603_v48 }
 0x6d7   : > { %v4605_v50 = vpop.permute.xlu1 %1401  ;;  %v4607_v49 = vpop.permute.xlu0 %1403 }
 0x6d8   : > { %6818 = vst [vmem:[#allocation123_spill] sm:$0xff] %v4605_v50  ;;  %6819 = vst [vmem:[#allocation124_spill] sm:$0xff] %v4607_v49 }
 0x6db   : > { %v4609_v3 = vpop.permute.xlu1 %1405  ;;  %v4611_v44 = vpop.permute.xlu0 %1407 }
 0x6dc   : > { %6820 = vst [vmem:[#allocation125_spill] sm:$0xff] %v4609_v3  ;;  %6821 = vst [vmem:[#allocation126_spill] sm:$0xff] %v4611_v44 }
 0x6df   : > { %v4613_v25 = vpop.permute.xlu1 %1409  ;;  %v4615_v12 = vpop.permute.xlu0 %1411 }
 0x6e0   : > { %6822 = vst [vmem:[#allocation127_spill] sm:$0xff] %v4613_v25  ;;  %6823 = vst [vmem:[#allocation128_spill] sm:$0xff] %v4615_v12 }
 0x6f0   : > { %v1443_v51 = vpop.permute.xlu1 %1442  ;;  %v1447_v50 = vpop.permute.xlu0 %1446 }
 0x6f1   : > { %v1454_v18 = vmul.f32 %v1443_v51, %v3909_v29  ;;  %v1453_v52 = vmul.f32 %v1443_v51, %v3911_v30  ;;  %v1456_v49 = vmul.f32 %v1443_v51, %v3917_v37  ;;  %v1455_v3 = vmul.f32 %v1443_v51, %v3921_v41 }
 0x6f2   : > { %v1458_v12 = vmul.f32 %v1447_v50, %v3926_v43  ;;  %v1457_v25 = vmul.f32 %v1447_v50, %v3930_v47 }
 0x6f3   : > { %1479 = vrot.lane.b32.xlu0 %v1454_v18, %s3751_s5  ;;  %1477 = vrot.lane.b32.xlu1 %v1453_v52, %s3751_s5  ;;  %v1460_v18 = vmul.f32 %v1447_v50, %v3940_v56  ;;  %v1459_v52 = vmul.f32 %v1447_v50, %v3943_v59  ;;  %v3753_v50 = vmov 33  }
 0x6f4   : > { %v1451_v44 = vpop.permute.xlu1 %1450 }
 0x6f5   : > { %v1462_v51 = vmul.f32 %v1451_v44, %v3953_v9 }
 0x6f7   : > { %1483 = vrot.lane.b32.xlu0 %v1456_v49, %s3751_s5  ;;  %1481 = vrot.lane.b32.xlu1 %v1455_v3, %s3751_s5  ;;  %v1461_v3 = vmul.f32 %v1451_v44, %v3957_v13  ;;  %v1463_v49 = vmul.f32 %v1451_v44, %v3964_v20 }
 0x6fb   : > { %1487 = vrot.lane.b32.xlu0 %v1458_v12, %s3751_s5  ;;  %1485 = vrot.lane.b32.xlu1 %v1457_v25, %s3751_s5  ;;  %v1464_v12 = vmul.f32 %v1451_v44, %v3962_v19 }
 0x6ff   : > { %1491 = vrot.lane.b32.xlu0 %v1460_v18, %s3751_s5  ;;  %1489 = vrot.lane.b32.xlu1 %v1459_v52, %s3751_s5 }
 0x703   : > { %1495 = vrot.lane.b32.xlu0 %v1462_v51, %s3751_s5  ;;  %1493 = vrot.lane.b32.xlu1 %v1461_v3, %s3751_s5 }
 0x707   : > { %1499 = vrot.lane.b32.xlu0 %v1464_v12, %s3751_s5  ;;  %1497 = vrot.lane.b32.xlu1 %v1463_v49, %s3751_s5 }
 0x70b   : > { %1529 = vperm.xlu1 %3618, %v4425_v1   ;;  %1533 = vperm.xlu0 %3619, %v4431_v46  }
 0x70f   : > { %1537 = vperm.xlu1 %3618, %v4437_v45   ;;  %3621 = vset.pattern.permute.xlu0 %v3753_v50 }
 0x713   : > { %3620 = vset.pattern.permute.xlu1 %v3753_v50 }
 0x765   : > { %v4644_v25 = vpop.permute.xlu1 %1477  ;;  %v4646_v18 = vpop.permute.xlu0 %1479 }
 0x766   : > { %6824 = vst [vmem:[#allocation129_spill] sm:$0xff] %v4644_v25  ;;  %6825 = vst [vmem:[#allocation130_spill] sm:$0xff] %v4646_v18 }
 0x769   : > { %v4648_v52 = vpop.permute.xlu1 %1481  ;;  %v4650_v44 = vpop.permute.xlu0 %1483 }
 0x76a   : > { %6826 = vst [vmem:[#allocation131_spill] sm:$0xff] %v4648_v52  ;;  %6827 = vst [vmem:[#allocation132_spill] sm:$0xff] %v4650_v44 }
 0x76d   : > { %v4652_v51 = vpop.permute.xlu1 %1485  ;;  %v4654_v3 = vpop.permute.xlu0 %1487 }
 0x76e   : > { %6828 = vst [vmem:[#allocation133_spill] sm:$0xff] %v4652_v51  ;;  %v370_v51 = vsel %vm363_vm0, %v4065_v39, %v4063_v38  ;;  %v541_v39 = vsel %vm538_vm1, %v4101_v62, %v4099_v61  ;;  %v545_v61 = vsel %vm538_vm1, %v4111_v6, %v4113_v7 }
 0x771   : > { %v4656_v12 = vpop.permute.xlu1 %1489  ;;  %v4658_v49 = vpop.permute.xlu0 %1491 }
 0x772   : > { %6829 = vst [vmem:[#allocation134_spill] sm:$0xff] %v4656_v12  ;;  %6830 = vst [vmem:[#allocation135_spill] sm:$0xff] %v4658_v49 }
 0x775   : > { %v4660_v0 = vpop.permute.xlu1 %1493  ;;  %v4662_v48 = vpop.permute.xlu0 %1495 }
 0x776   : > { %6831 = vst [vmem:[#allocation136_spill] sm:$0xff] %v4660_v0  ;;  %6832 = vst [vmem:[#allocation137_spill] sm:$0xff] %v4662_v48 }
 0x779   : > { %v4664_v50 = vpop.permute.xlu1 %1497  ;;  %v4666_v25 = vpop.permute.xlu0 %1499 }
 0x77a   : > { %6833 = vst [vmem:[#allocation138_spill] sm:$0xff] %v4664_v50  ;;  %6834 = vst [vmem:[#allocation139_spill] sm:$0xff] %v4666_v25 }
 0x78a   : > { %v1530_v18 = vpop.permute.xlu1 %1529  ;;  %v1534_v12 = vpop.permute.xlu0 %1533 }
 0x78b   : > { %v1541_v52 = vmul.f32 %v1530_v18, %v3909_v29  ;;  %v1540_v44 = vmul.f32 %v1530_v18, %v3911_v30  ;;  %v1543_v49 = vmul.f32 %v1530_v18, %v3917_v37  ;;  %v1542_v0 = vmul.f32 %v1530_v18, %v3921_v41 }
 0x78c   : > { %v1545_v25 = vmul.f32 %v1534_v12, %v3926_v43  ;;  %v1544_v50 = vmul.f32 %v1534_v12, %v3930_v47 }
 0x78d   : > { %1566 = vrot.lane.b32.xlu0 %v1541_v52, %s3754_s6  ;;  %1564 = vrot.lane.b32.xlu1 %v1540_v44, %s3754_s6  ;;  %v1547_v52 = vmul.f32 %v1534_v12, %v3940_v56  ;;  %v1546_v44 = vmul.f32 %v1534_v12, %v3943_v59  ;;  %v3755_v12 = vmov 2  }
 0x78e   : > { %v1538_v48 = vpop.permute.xlu1 %1537 }
 0x78f   : > { %v1549_v18 = vmul.f32 %v1538_v48, %v3953_v9 }
 0x791   : > { %1570 = vrot.lane.b32.xlu0 %v1543_v49, %s3754_s6  ;;  %1568 = vrot.lane.b32.xlu1 %v1542_v0, %s3754_s6  ;;  %v1548_v0 = vmul.f32 %v1538_v48, %v3957_v13  ;;  %v1550_v49 = vmul.f32 %v1538_v48, %v3964_v20 }
 0x795   : > { %1574 = vrot.lane.b32.xlu0 %v1545_v25, %s3754_s6  ;;  %1572 = vrot.lane.b32.xlu1 %v1544_v50, %s3754_s6  ;;  %v1551_v25 = vmul.f32 %v1538_v48, %v3962_v19  ;;  %v262_v50 = vmul.f32 %v3878_v10, %v3953_v9  ;;  %v263_v48 = vmul.f32 %v3878_v10, %v3964_v20 }
 0x799   : > { %1578 = vrot.lane.b32.xlu0 %v1547_v52, %s3754_s6  ;;  %1576 = vrot.lane.b32.xlu1 %v1546_v44, %s3754_s6  ;;  %v256_v52 = vmul.f32 %v3880_v11, %v3909_v29  ;;  %v259_v44 = vmul.f32 %v3891_v15, %v3926_v43 }
 0x79d   : > { %1582 = vrot.lane.b32.xlu0 %v1549_v18, %s3754_s6  ;;  %1580 = vrot.lane.b32.xlu1 %v1548_v0, %s3754_s6  ;;  %v255_v18 = vmul.f32 %v3880_v11, %v3911_v30  ;;  %v366_v0 = vsel %vm363_vm0, %v4053_v31, %v4051_v28  ;;  %v258_v28 = vmul.f32 %v3891_v15, %v3930_v47 }
 0x7a1   : > { %1586 = vrot.lane.b32.xlu0 %v1551_v25, %s3754_s6  ;;  %1584 = vrot.lane.b32.xlu1 %v1550_v49, %s3754_s6  ;;  %v261_v25 = vmul.f32 %v3878_v10, %v3957_v13  ;;  %v368_v49 = vsel %vm363_vm0, %v4055_v33, %v4061_v36  ;;  %v369_v10 = vsel %vm363_vm0, %v4061_v36, %v4059_v35 }
 0x7a2   : > { %v540_v35 = vsel %vm538_vm1, %v4095_v58, %v4101_v62 }
 0x7a5   : > { %1617 = vperm.xlu1 %3620, %v4425_v1   ;;  %1621 = vperm.xlu0 %3621, %v4431_v46   ;;  %v257_v1 = vmul.f32 %v3880_v11, %v3921_v41  ;;  %v364_v46 = vsel %vm363_vm0, %v4049_v27, %v4047_v26  ;;  %v260_v27 = vmul.f32 %v3891_v15, %v3943_v59 }
 0x7a6   : > { %v382_v11 = vadd.f32 %v364_v46, %v255_v18  ;;  %v386_v46 = vadd.f32 %v368_v49, %v259_v44  ;;  %v539_v15 = vsel %vm538_vm1, %v4097_v60, %v4095_v58  ;;  %v544_v58 = vsel %vm538_vm1, %v4107_v4, %v4109_v5  ;;  %v6836_v49 = vld [vmem:[#allocation46_spill] sm:$0xff] }
 0x7a7   : > { %v387_v36 = vadd.f32 %v369_v10, %v260_v27  ;;  %v716_v5 = vsel %vm713_vm2, %v4174_v22, %v4176_v54 }
 0x7a9   : > { %1625 = vperm.xlu1 %3620, %v4437_v45   ;;  %3623 = vset.pattern.permute.xlu0 %v3755_v12  ;;  %v365_v45 = vsel %vm363_vm0, %v4047_v26, %v4053_v31  ;;  %v367_v26 = vsel %vm363_vm0, %v4057_v34, %v4055_v33  ;;  %v384_v31 = vadd.f32 %v366_v0, %v257_v1 }
 0x7aa   : > { %v371_v34 = vsel %vm363_vm0, %v4063_v38, %v4069_v42  ;;  %v372_v33 = vsel %vm363_vm0, %v4069_v42, %v4067_v40  ;;  %v542_v38 = vsel %vm538_vm1, %v4105_v2, %v4103_v63  ;;  %v543_v40 = vsel %vm538_vm1, %v4103_v63, %v4107_v4 }
 0x7ab   : > { %v388_v42 = vadd.f32 %v370_v51, %v261_v25  ;;  %v389_v1 = vadd.f32 %v371_v34, %v262_v50  ;;  %v390_v60 = vadd.f32 %v372_v33, %v263_v48  ;;  %v559_v62 = vadd.f32 %v541_v39, %v384_v31  ;;  %v6839_v31 = vld [vmem:[#allocation48_spill] sm:$0xff]  ;;  %v6841_v33 = vld [vmem:[#allocation49_spill] sm:$0xff] }
 0x7ac   : > { %v561_v18 = vadd.f32 %v543_v40, %v386_v46  ;;  %v546_v63 = vsel %vm538_vm1, %v4113_v7, %v4115_v8  ;;  %v547_v51 = vsel %vm538_vm1, %v4115_v8, %v4117_v14  ;;  %v714_v50 = vsel %vm713_vm2, %v4170_v32, %v4172_v21  ;;  %v6843_v39 = vld [vmem:[#allocation52_spill] sm:$0xff] }
 0x7ad   : > { %3622 = vset.pattern.permute.xlu1 %v3755_v12  ;;  %v383_v12 = vadd.f32 %v365_v45, %v256_v52  ;;  %v385_v52 = vadd.f32 %v367_v26, %v258_v28  ;;  %v557_v45 = vadd.f32 %v539_v15, %v382_v11  ;;  %v715_v4 = vsel %vm713_vm2, %v4172_v21, %v4174_v22  ;;  %v6835_v26 = vld [vmem:[#allocation32_spill] sm:$0xff]  ;;  %v6837_v11 = vld [vmem:[#allocation45_spill] sm:$0xff]  ;;  %v6838_v28 = vld [vmem:[#allocation47_spill] sm:$0xff] }
 0x7ae   : > { %v562_v6 = vadd.f32 %v544_v58, %v387_v36  ;;  %v563_v48 = vadd.f32 %v545_v61, %v388_v42  ;;  %v717_v7 = vsel %vm713_vm2, %v4178_v55, %v4180_v57  ;;  %v564_v8 = vadd.f32 %v546_v63, %v389_v1  ;;  %v6844_v42 = vld [vmem:[#allocation54_spill] sm:$0xff]  ;;  %v6845_v1 = vld [vmem:[#allocation53_spill] sm:$0xff]  ;;  %v6847_v58 = vld [vmem:[#allocation56_spill] sm:$0xff] }
 0x7af   : > { %v558_v44 = vadd.f32 %v540_v35, %v383_v12  ;;  %v560_v2 = vadd.f32 %v542_v38, %v385_v52  ;;  %v718_v14 = vsel %vm713_vm2, %v4180_v57, %v4182_v16  ;;  %v719_v32 = vsel %vm713_vm2, %v4182_v16, %v4184_v53 }
 0x7b0   : > { %v720_v21 = vsel %vm713_vm2, %v4186_v23, %v4188_v24  ;;  %v565_v22 = vadd.f32 %v547_v51, %v390_v60  ;;  %v732_v54 = vadd.f32 %v714_v50, %v557_v45  ;;  %v734_v25 = vadd.f32 %v716_v5, %v559_v62  ;;  %v6846_v45 = vld [vmem:[#allocation55_spill] sm:$0xff]  ;;  %v6848_v50 = vld [vmem:[#allocation70_spill] sm:$0xff] }
 0x7b1   : > { %v733_v0 = vadd.f32 %v715_v4, %v558_v44  ;;  %v735_v27 = vadd.f32 %v717_v7, %v560_v2  ;;  %v721_v55 = vsel %vm713_vm2, %v4188_v24, %v4190_v17  ;;  %v722_v57 = vsel %vm713_vm2, %v4190_v17, %v6835_v26  ;;  %v6840_v24 = vld [vmem:[#allocation50_spill] sm:$0xff]  ;;  %v6842_v17 = vld [vmem:[#allocation51_spill] sm:$0xff]  ;;  %v6849_v4 = vld [vmem:[#allocation69_spill] sm:$0xff] }
 0x7b2   : > { %v889_v16 = vsel %vm888_vm3, %v6837_v11, %v6836_v49  ;;  %v736_v53 = vadd.f32 %v718_v14, %v561_v18  ;;  %v737_v12 = vadd.f32 %v719_v32, %v562_v6  ;;  %v738_v23 = vadd.f32 %v720_v21, %v563_v48  ;;  %v6850_v48 = vld [vmem:[#allocation71_spill] sm:$0xff]  ;;  %v6852_v32 = vld [vmem:[#allocation74_spill] sm:$0xff]  ;;  %v6853_v21 = vld [vmem:[#allocation73_spill] sm:$0xff] }
 0x7b3   : > { %v890_v10 = vsel %vm888_vm3, %v6836_v49, %v6838_v28  ;;  %v891_v34 = vsel %vm888_vm3, %v6838_v28, %v6839_v31  ;;  %v892_v52 = vsel %vm888_vm3, %v6841_v33, %v6840_v24  ;;  %v893_v46 = vsel %vm888_vm3, %v6840_v24, %v6842_v17  ;;  %v6856_v11 = vld [vmem:[#allocation78_spill] sm:$0xff]  ;;  %v6859_v33 = vld [vmem:[#allocation80_spill] sm:$0xff] }
 0x7b4   : > { %v739_v15 = vadd.f32 %v721_v55, %v564_v8  ;;  %v740_v35 = vadd.f32 %v722_v57, %v565_v22  ;;  %v907_v36 = vadd.f32 %v889_v16, %v732_v54  ;;  %v894_v38 = vsel %vm888_vm3, %v6842_v17, %v6843_v39  ;;  %v6851_v8 = vld [vmem:[#allocation72_spill] sm:$0xff]  ;;  %v6854_v55 = vld [vmem:[#allocation75_spill] sm:$0xff]  ;;  %v6857_v16 = vld [vmem:[#allocation77_spill] sm:$0xff] }
 0x7b5   : > { %v908_v40 = vadd.f32 %v890_v10, %v733_v0  ;;  %v895_v60 = vsel %vm888_vm3, %v6845_v1, %v6844_v42  ;;  %v896_v44 = vsel %vm888_vm3, %v6844_v42, %v6846_v45  ;;  %v897_v61 = vsel %vm888_vm3, %v6846_v45, %v6847_v58  ;;  %v6855_v57 = vld [vmem:[#allocation76_spill] sm:$0xff]  ;;  %v6860_v17 = vld [vmem:[#allocation94_spill] sm:$0xff]  ;;  %v6865_v45 = vld [vmem:[#allocation97_spill] sm:$0xff] }
 0x7b6   : > { %v909_v18 = vadd.f32 %v891_v34, %v734_v25  ;;  %v910_v63 = vadd.f32 %v892_v52, %v735_v27  ;;  %v911_v51 = vadd.f32 %v893_v46, %v736_v53  ;;  %v1064_v5 = vsel %vm1063_vm4, %v6849_v4, %v6848_v50  ;;  %v6858_v34 = vld [vmem:[#allocation79_spill] sm:$0xff]  ;;  %v6861_v46 = vld [vmem:[#allocation93_spill] sm:$0xff]  ;;  %v6863_v39 = vld [vmem:[#allocation96_spill] sm:$0xff] }
 0x7b7   : > { %v912_v6 = vadd.f32 %v894_v38, %v737_v12  ;;  %v1065_v7 = vsel %vm1063_vm4, %v6848_v50, %v6850_v48  ;;  %v1066_v14 = vsel %vm1063_vm4, %v6850_v48, %v6851_v8  ;;  %v1067_v22 = vsel %vm1063_vm4, %v6853_v21, %v6852_v32 }
 0x7b8   : > { %v913_v54 = vadd.f32 %v895_v60, %v738_v23  ;;  %v914_v0 = vadd.f32 %v896_v44, %v739_v15  ;;  %v915_v25 = vadd.f32 %v897_v61, %v740_v35  ;;  %v1082_v27 = vadd.f32 %v1064_v5, %v907_v36  ;;  %v6862_v35 = vld [vmem:[#allocation95_spill] sm:$0xff]  ;;  %v6864_v60 = vld [vmem:[#allocation98_spill] sm:$0xff] }
 0x7b9   : > { %v1068_v26 = vsel %vm1063_vm4, %v6852_v32, %v6854_v55  ;;  %v1069_v49 = vsel %vm1063_vm4, %v6854_v55, %v6855_v57  ;;  %v1070_v53 = vsel %vm1063_vm4, %v6857_v16, %v6856_v11  ;;  %v1083_v23 = vadd.f32 %v1065_v7, %v908_v40  ;;  %v6866_v61 = vld [vmem:[#allocation99_spill] sm:$0xff]  ;;  %v6869_v32 = vld [vmem:[#allocation101_spill] sm:$0xff] }
 0x7ba   : > { %v1084_v10 = vadd.f32 %v1066_v14, %v909_v18  ;;  %v1085_v31 = vadd.f32 %v1067_v22, %v910_v63  ;;  %v1071_v24 = vsel %vm1063_vm4, %v6856_v11, %v6858_v34  ;;  %v1072_v52 = vsel %vm1063_vm4, %v6858_v34, %v6859_v33  ;;  %v6867_v63 = vld [vmem:[#allocation100_spill] sm:$0xff]  ;;  %v6868_v14 = vld [vmem:[#allocation102_spill] sm:$0xff]  ;;  %v6870_v22 = vld [vmem:[#allocation103_spill] sm:$0xff] }
 0x7bb   : > { %v1239_v15 = vsel %vm1238_vm5, %v6861_v46, %v6860_v17  ;;  %v1240_v36 = vsel %vm1238_vm5, %v6860_v17, %v6862_v35  ;;  %v1241_v38 = vsel %vm1238_vm5, %v6862_v35, %v6863_v39  ;;  %v1086_v40 = vadd.f32 %v1068_v26, %v911_v51  ;;  %v6872_v55 = vld [vmem:[#allocation121_spill] sm:$0xff]  ;;  %v6873_v11 = vld [vmem:[#allocation118_spill] sm:$0xff]  ;;  %v6875_v16 = vld [vmem:[#allocation123_spill] sm:$0xff] }
 0x7bc   : > { %v1087_v42 = vadd.f32 %v1069_v49, %v912_v6  ;;  %v1088_v1 = vadd.f32 %v1070_v53, %v913_v54  ;;  %v1242_v44 = vsel %vm1238_vm5, %v6865_v45, %v6864_v60  ;;  %v1089_v58 = vadd.f32 %v1071_v24, %v914_v0  ;;  %v6871_v0 = vld [vmem:[#allocation122_spill] sm:$0xff]  ;;  %v6878_v34 = vld [vmem:[#allocation125_spill] sm:$0xff] }
 0x7bd   : > { %v1243_v18 = vsel %vm1238_vm5, %v6864_v60, %v6866_v61  ;;  %v1244_v50 = vsel %vm1238_vm5, %v6866_v61, %v6867_v63  ;;  %v1090_v48 = vadd.f32 %v1072_v52, %v915_v25  ;;  %v1257_v51 = vadd.f32 %v1239_v15, %v1082_v27  ;;  %v6874_v25 = vld [vmem:[#allocation117_spill] sm:$0xff]  ;;  %v6879_v15 = vld [vmem:[#allocation104_spill] sm:$0xff] }
 0x7be   : > { %v1258_v6 = vadd.f32 %v1240_v36, %v1083_v23  ;;  %v1259_v7 = vadd.f32 %v1241_v38, %v1084_v10  ;;  %v1260_v8 = vadd.f32 %v1242_v44, %v1085_v31  ;;  %v1245_v21 = vsel %vm1238_vm5, %v6869_v32, %v6868_v14  ;;  %v6876_v23 = vld [vmem:[#allocation124_spill] sm:$0xff]  ;;  %v6877_v31 = vld [vmem:[#allocation126_spill] sm:$0xff] }
 0x7bf   : > { %v1246_v54 = vsel %vm1238_vm5, %v6868_v14, %v6870_v22  ;;  %v1417_v26 = vsel %vm1413_vm6, %v6872_v55, %v6871_v0  ;;  %v1261_v57 = vadd.f32 %v1243_v18, %v1086_v40  ;;  %v1262_v49 = vadd.f32 %v1244_v50, %v1087_v42  ;;  %v6880_v40 = vld [vmem:[#allocation119_spill] sm:$0xff]  ;;  %v6881_v60 = vld [vmem:[#allocation120_spill] sm:$0xff] }
 0x7c0   : > { %v1414_v27 = vsel %vm1413_vm6, %v6874_v25, %v6873_v11  ;;  %v1418_v53 = vsel %vm1413_vm6, %v6871_v0, %v6875_v16  ;;  %v1419_v10 = vsel %vm1413_vm6, %v6875_v16, %v6876_v23  ;;  %v1420_v24 = vsel %vm1413_vm6, %v6878_v34, %v6877_v31  ;;  %v6882_v50 = vld [vmem:[#allocation127_spill] sm:$0xff] }
 0x7c1   : > { %v1263_v46 = vadd.f32 %v1245_v21, %v1088_v1  ;;  %v1247_v35 = vsel %vm1238_vm5, %v6870_v22, %v6879_v15  ;;  %v1264_v36 = vadd.f32 %v1246_v54, %v1089_v58  ;;  %v1435_v39 = vadd.f32 %v1417_v26, %v1260_v8 }
 0x7c2   : > { %v1432_v38 = vadd.f32 %v1414_v27, %v1257_v51  ;;  %v1415_v42 = vsel %vm1413_vm6, %v6873_v11, %v6880_v40  ;;  %v1416_v45 = vsel %vm1413_vm6, %v6880_v40, %v6881_v60  ;;  %v1436_v1 = vadd.f32 %v1418_v53, %v1261_v57 }
 0x7c3   : > { %v1437_v61 = vadd.f32 %v1419_v10, %v1262_v49  ;;  %v1438_v18 = vadd.f32 %v1420_v24, %v1263_v46  ;;  %v1421_v58 = vsel %vm1413_vm6, %v6877_v31, %v6882_v50  ;;  %v1265_v0 = vadd.f32 %v1247_v35, %v1090_v48 }
 0x7c4   : > { %v1433_v55 = vadd.f32 %v1415_v42, %v1258_v6  ;;  %v1434_v49 = vadd.f32 %v1416_v45, %v1259_v7  ;;  %v1439_v27 = vadd.f32 %v1421_v58, %v1264_v36  ;;  %v1741_v45 = vlaneseq }
 0x7c6   : > { %vm4941_vm9 = vcmp.lt.s32.totalorder %v1741_v45, 384 }
 0x7ff   : > { %v4821_v62 = vpop.permute.xlu0 %1566  ;;  %v4823_v2 = vpop.permute.xlu1 %1564 }
 0x800   : > { %v1589_v44 = vsel %vm1588_vm7, %v4823_v2, %v4821_v62 }
 0x801   : > { %v1607_v22 = vadd.f32 %v1589_v44, %v1432_v38 }
 0x803   : > { %v4846_v12 = vpop.permute.xlu0 %1570  ;;  %v1569_v28 = vpop.permute.xlu1 %1568 }
 0x804   : > { %v1590_v2 = vsel %vm1588_vm7, %v4821_v62, %v1569_v28  ;;  %v1591_v26 = vsel %vm1588_vm7, %v1569_v28, %v4846_v12 }
 0x805   : > { %v1608_v53 = vadd.f32 %v1590_v2, %v1433_v55  ;;  %v1609_v31 = vadd.f32 %v1591_v26, %v1434_v49 }
 0x807   : > { %v1575_v4 = vpop.permute.xlu0 %1574  ;;  %v1573_v5 = vpop.permute.xlu1 %1572 }
 0x808   : > { %v1592_v33 = vsel %vm1588_vm7, %v1573_v5, %v1575_v4  ;;  %v6883_v5 = vld [vmem:[#allocation128_spill] sm:$0xff] }
 0x809   : > { %v1610_v63 = vadd.f32 %v1592_v33, %v1435_v39  ;;  %v1422_v51 = vsel %vm1413_vm6, %v6882_v50, %v6883_v5  ;;  %v1742_v5 = vshrl.u32 %v1741_v45, 7 }
 0x80a   : > { %v1440_v16 = vadd.f32 %v1422_v51, %v1265_v0 }
 0x80b   : > { %v1579_v52 = vpop.permute.xlu0 %1578  ;;  %v1577_v17 = vpop.permute.xlu1 %1576  ;;  %v1703_v11 = vadd.f32 %v1610_v63, %v1607_v22 }
 0x80c   : > { %v1593_v8 = vsel %vm1588_vm7, %v1575_v4, %v1577_v17  ;;  %v1594_v14 = vsel %vm1588_vm7, %v1577_v17, %v1579_v52 }
 0x80d   : > { %v1611_v4 = vadd.f32 %v1593_v8, %v1436_v1  ;;  %v1612_v25 = vadd.f32 %v1594_v14, %v1437_v61  ;;  %v3756_v1 = vmov 1966171168  }
 0x80e   : > { %v1739_v61 = vunpack.c.l.s4 %v3756_v1  ;;  %v6891_v1 = vld [vmem:[#allocation9_spill] sm:$0xff] }
 0x80f   : > { %v1583_v32 = vpop.permute.xlu0 %1582  ;;  %v1581_v21 = vpop.permute.xlu1 %1580  ;;  %v1713_v28 = vadd.f32 %v1611_v4, %v1608_v53  ;;  %v1722_v7 = vadd.f32 %v1612_v25, %v1609_v31  ;;  %v6885_v31 = vmov 0 }
 0x810   : > { %v1595_v54 = vsel %vm1588_vm7, %v1581_v21, %v1583_v32  ;;  %v1740_v8 = vunpack.c.0.s8 %v1739_v61  ;;  %v6886_v31 = vsel %vm4941_vm9, 4294967295, %v6885_v31 }
 0x811   : > { %v1613_v57 = vadd.f32 %v1595_v54, %v1438_v18  ;;  %6887 = vst [vmem:[#allocation46_spill] sm:$0xff] %v6886_v31 }
 0x812   : > { %v4927_v26 = vsub.s32 %v1740_v8, %v1742_v5  ;;  %v6894_v8 = vld [vmem:[#allocation10_spill] sm:$0xff] }
 0x813   : > { %v1705_v23 = vsel %vm1704_vm8, %v1613_v57, 0.0  ;;  %v1587_v10 = vpop.permute.xlu0 %1586  ;;  %v1585_v62 = vpop.permute.xlu1 %1584 }
 0x814   : > { %v1706_v34 = vadd.f32 %v1705_v23, %v1703_v11  ;;  %v1596_v48 = vsel %vm1588_vm7, %v1583_v32, %v1585_v62  ;;  %v1597_v6 = vsel %vm1588_vm7, %v1585_v62, %v1587_v10  ;;  %6884 = vst [vmem:[#allocation32_spill] sm:$0xff] %v4927_v26 }
 0x815   : > { %v1614_v24 = vadd.f32 %v1596_v48, %v1439_v27  ;;  %v1615_v12 = vadd.f32 %v1597_v6, %v1440_v16 }
 0x816   : > { %v1707_v33 = vrot.slane %v1706_v34, 4 }
 0x817   : > { %v1714_v52 = vsel %vm1704_vm8, %v1614_v24, 0.0  ;;  %v1723_v17 = vsel %vm1704_vm8, %v1615_v12, 0.0 }
 0x818   : > { %v1708_v46 = vadd.f32 %v1707_v33, %v1706_v34  ;;  %v1715_v15 = vadd.f32 %v1714_v52, %v1713_v28  ;;  %v1724_v35 = vadd.f32 %v1723_v17, %v1722_v7  ;;  %v4968_v52 = vld [vmem:[%s6577_s0] sm:$0xff]  ;;  %v4973_v17 = vld [vmem:[%s6577_s0 + $0x8] sm:$0xff] }
 0x81a   : > { %v1709_v36 = vrot.slane %v1708_v46, 2  ;;  %v1716_v39 = vrot.slane %v1715_v15, 4  ;;  %v1725_v38 = vrot.slane %v1724_v35, 4 }
 0x81c   : > { %v1710_v40 = vadd.f32 %v1709_v36, %v1708_v46  ;;  %v1717_v42 = vadd.f32 %v1716_v39, %v1715_v15  ;;  %v1726_v60 = vadd.f32 %v1725_v38, %v1724_v35  ;;  %v4980_v46 = vld [vmem:[%s6577_s0 + $0x10] sm:$0xf]  ;;  %v3757_v15 = vmov 3   ;;  %v6888_v39 = vld [vmem:[#allocation5_spill] sm:$0xff] }
 0x81d   : > { %v3758_v35 = vmov 6   ;;  %v3759_v36 = vmov 7   ;;  %v286_v38 = vmul.f32 %v6888_v39, %v3909_v29  ;;  %v285_v45 = vmul.f32 %v6888_v39, %v3911_v30 }
 0x81e   : > { %v1711_v44 = vrot.slane %v1710_v40, 1  ;;  %v1718_v18 = vrot.slane %v1717_v42, 2  ;;  %v1727_v63 = vrot.slane %v1726_v60, 2 }
 0x820   : > { %v1719_v50 = vadd.f32 %v1718_v18, %v1717_v42  ;;  %v1728_v58 = vadd.f32 %v1727_v63, %v1726_v60  ;;  %v1712_v51 = vadd.f32 %v1711_v44, %v1710_v40  ;;  %v287_v40 = vmul.f32 %v6888_v39, %v3921_v41  ;;  %v6889_v42 = vld [vmem:[#allocation6_spill] sm:$0xff]  ;;  %v6890_v44 = vld [vmem:[#allocation8_spill] sm:$0xff]  ;;  %v6892_v18 = vld [vmem:[#allocation11_spill] sm:$0xff] }
 0x821   : > { %v292_v60 = vmul.f32 %v6889_v42, %v3953_v9  ;;  %v451_v61 = vsel %vm363_vm0, %v6891_v1, %v6890_v44  ;;  %v452_v63 = vsel %vm363_vm0, %v6890_v44, %v6892_v18 }
 0x822   : > { %v1720_v14 = vrot.slane %v1719_v50, 1  ;;  %v1729_v32 = vrot.slane %v1728_v58, 1  ;;  %v1731_v55 = vadd.f32 -0.006219436, %v1712_v51 }
 0x824   : > { %v1721_v21 = vadd.f32 %v1720_v14, %v1719_v50  ;;  %v1730_v22 = vadd.f32 %v1729_v32, %v1728_v58  ;;  %v1618_v2 = vpop.permute.xlu1 %1617  ;;  %v1622_v4 = vpop.permute.xlu0 %1621  ;;  %v293_v50 = vmul.f32 %v6889_v42, %v3964_v20  ;;  %v6893_v58 = vld [vmem:[#allocation7_spill] sm:$0xff]  ;;  %v453_v14 = vsel %vm363_vm0, %v6892_v18, %v6894_v8 }
 0x825   : > { %v1629_v54 = vmul.f32 %v1618_v2, %v3909_v29  ;;  %v1628_v0 = vmul.f32 %v1618_v2, %v3911_v30  ;;  %v1631_v25 = vmul.f32 %v1618_v2, %v3917_v37  ;;  %v1630_v27 = vmul.f32 %v1618_v2, %v3921_v41 }
 0x826   : > { %v1732_v57 = vadd.f32 -0.006219436, %v1721_v21  ;;  %v1733_v49 = vadd.f32 -0.006219436, %v1730_v22  ;;  %v1633_v23 = vmul.f32 %v1622_v4, %v3926_v43  ;;  %v1632_v10 = vmul.f32 %v1622_v4, %v3930_v47  ;;  %v6895_v21 = vld [vmem:[#allocation12_spill] sm:$0xff]  ;;  %v6896_v22 = vld [vmem:[#allocation13_spill] sm:$0xff] }
 0x827   : > { %1654 = vrot.lane.b32.xlu0 %v1629_v54, %s3754_s6  ;;  %1652 = vrot.lane.b32.xlu1 %v1628_v0, %s3754_s6  ;;  %v1635_v48 = vmul.f32 %v1622_v4, %v3940_v56  ;;  %v1634_v6 = vmul.f32 %v1622_v4, %v3943_v59  ;;  %v289_v5 = vmul.f32 %v6893_v58, %v3926_v43  ;;  %v6897_v54 = vld [vmem:[#allocation15_spill] sm:$0xff] }
 0x828   : > { %v1737_v11 = vcombine.low %v1731_v55, %v1732_v57  ;;  %v1751_v53 = vrot.slane %v1733_v49, %v4927_v26  ;;  %v1626_v24 = vpop.permute.xlu1 %1625  ;;  %v290_v51 = vmul.f32 %v6893_v58, %v3943_v59  ;;  %v288_v32 = vmul.f32 %v6893_v58, %v3930_v47 }
 0x829   : > { %v1637_v12 = vmul.f32 %v1626_v24, %v3953_v9  ;;  %v1636_v28 = vmul.f32 %v1626_v24, %v3957_v13  ;;  %v1639_v7 = vmul.f32 %v1626_v24, %v3962_v19  ;;  %v1638_v33 = vmul.f32 %v1626_v24, %v3964_v20 }
 0x82a   : > { %v1744_v16 = vrot.slane %v1737_v11, %v4927_v26  ;;  %v454_v2 = vsel %vm363_vm0, %v6896_v22, %v6895_v21  ;;  %v455_v0 = vsel %vm363_vm0, %v6895_v21, %v6897_v54  ;;  %v291_v55 = vmul.f32 %v6889_v42, %v3957_v13  ;;  %v6898_v11 = vld [vmem:[#allocation14_spill] sm:$0xff] }
 0x82b   : > { %1658 = vrot.lane.b32.xlu0 %v1631_v25, %s3754_s6  ;;  %1656 = vrot.lane.b32.xlu1 %v1630_v27, %s3754_s6  ;;  %v469_v57 = vadd.f32 %v451_v61, %v285_v45  ;;  %v470_v49 = vadd.f32 %v452_v63, %v286_v38  ;;  %v456_v4 = vsel %vm363_vm0, %v6897_v54, %v6898_v11  ;;  %v6899_v25 = vld [vmem:[#allocation16_spill] sm:$0xff]  ;;  %v6900_v27 = vld [vmem:[#allocation17_spill] sm:$0xff]  ;;  %v6909_v45 = vld [vmem:[#allocation26_spill] sm:$0xff] }
 0x82c   : > { %v1752_v62 = vcombine.low %v1744_v16, %v1751_v53  ;;  %v457_v16 = vsel %vm363_vm0, %v6900_v27, %v6899_v25  ;;  %v471_v53 = vadd.f32 %v453_v14, %v287_v40  ;;  %v6907_v38 = vld [vmem:[#allocation25_spill] sm:$0xff]  ;;  %v6908_v40 = vld [vmem:[#allocation24_spill] sm:$0xff]  ;;  %v6910_v63 = vld [vmem:[#allocation27_spill] sm:$0xff] }
 0x82d   : > { %v475_v39 = vadd.f32 %v457_v16, %v291_v55  ;;  %v629_v42 = vsel %vm538_vm1, %v6908_v40, %v6907_v38  ;;  %v630_v44 = vsel %vm538_vm1, %v6907_v38, %v6909_v45  ;;  %v631_v58 = vsel %vm538_vm1, %v6909_v45, %v6910_v63  ;;  %v6911_v14 = vld [vmem:[#allocation29_spill] sm:$0xff]  ;;  %v6913_v21 = vld [vmem:[#allocation30_spill] sm:$0xff]  ;;  %v6917_v11 = vld [vmem:[#allocation35_spill] sm:$0xff] }
 0x82e   : > { %v1759_v34 = vrot.slane %v1752_v62, %v4927_v26  ;;  %v6902_v62 = vld [vmem:[#allocation18_spill] sm:$0xff]  ;;  %v633_v22 = vsel %vm538_vm1, %v6911_v14, %v6913_v21  ;;  %v6916_v55 = vld [vmem:[#allocation33_spill] sm:$0xff] }
 0x82f   : > { %1662 = vrot.lane.b32.xlu0 %v1633_v23, %s3754_s6  ;;  %1660 = vrot.lane.b32.xlu1 %v1632_v10, %s3754_s6  ;;  %v6901_v23 = vld [vmem:[#allocation19_spill] sm:$0xff]  ;;  %v6919_v16 = vld [vmem:[#allocation38_spill] sm:$0xff] }
 0x830   : > { %1765 = vst.msk [vmem:[%s4948_s9] ss:$4 sm:$0x7] %vm4941_vm9, %v1759_v34  ;;  %v458_v10 = vsel %vm363_vm0, %v6899_v25, %v6901_v23  ;;  %v459_v34 = vsel %vm363_vm0, %v6901_v23, %v6902_v62  ;;  %v6918_v25 = vld [vmem:[#allocation36_spill] sm:$0xff]  ;;  %v6927_v63 = vld [vmem:[#allocation58_spill] sm:$0xff] }
 0x831   : > { %v476_v1 = vadd.f32 %v458_v10, %v292_v60  ;;  %v477_v61 = vadd.f32 %v459_v34, %v293_v50  ;;  %v6915_v50 = vld [vmem:[#allocation34_spill] sm:$0xff]  ;;  %v803_v27 = vsel %vm713_vm2, %v6917_v11, %v6918_v25  ;;  %v6921_v34 = vld [vmem:[#allocation39_spill] sm:$0xff] }
 0x833   : > { %1666 = vrot.lane.b32.xlu0 %v1635_v48, %s3754_s6  ;;  %1664 = vrot.lane.b32.xlu1 %v1634_v6, %s3754_s6  ;;  %v6903_v48 = vld [vmem:[#allocation21_spill] sm:$0xff]  ;;  %v6904_v6 = vld [vmem:[#allocation20_spill] sm:$0xff]  ;;  %v651_v62 = vadd.f32 %v633_v22, %v476_v1 }
 0x834   : > { %v626_v24 = vsel %vm538_vm1, %v6904_v6, %v6903_v48  ;;  %v6922_v6 = vld [vmem:[#allocation40_spill] sm:$0xff]  ;;  %v6932_v22 = vld [vmem:[#allocation61_spill] sm:$0xff] }
 0x835   : > { %v644_v18 = vadd.f32 %v626_v24, %v469_v57  ;;  %v801_v57 = vsel %vm713_vm2, %v6916_v55, %v6915_v50  ;;  %v806_v24 = vsel %vm713_vm2, %v6921_v34, %v6922_v6  ;;  %v6939_v6 = vld [vmem:[#allocation82_spill] sm:$0xff] }
 0x837   : > { %1670 = vrot.lane.b32.xlu0 %v1637_v12, %s3754_s6  ;;  %1668 = vrot.lane.b32.xlu1 %v1636_v28, %s3754_s6  ;;  %v472_v12 = vadd.f32 %v454_v2, %v288_v32  ;;  %v473_v28 = vadd.f32 %v455_v0, %v289_v5  ;;  %v6914_v0 = vld [vmem:[#allocation31_spill] sm:$0xff] }
 0x838   : > { %v634_v60 = vsel %vm538_vm1, %v6913_v21, %v6914_v0  ;;  %v6930_v21 = vld [vmem:[#allocation60_spill] sm:$0xff]  ;;  %v6933_v0 = vld [vmem:[#allocation63_spill] sm:$0xff] }
 0x839   : > { %v647_v2 = vadd.f32 %v629_v42, %v472_v12  ;;  %v648_v54 = vadd.f32 %v630_v44, %v473_v28  ;;  %v652_v12 = vadd.f32 %v634_v60, %v477_v61  ;;  %v819_v28 = vadd.f32 %v801_v57, %v644_v18  ;;  %v6926_v42 = vld [vmem:[#allocation44_spill] sm:$0xff]  ;;  %v6928_v61 = vld [vmem:[#allocation57_spill] sm:$0xff]  ;;  %v6935_v57 = vld [vmem:[#allocation66_spill] sm:$0xff] }
 0x83a   : > { %v976_v18 = vsel %vm888_vm3, %v6928_v61, %v6927_v63  ;;  %v6945_v61 = vld [vmem:[#allocation87_spill] sm:$0xff] }
 0x83b   : > { %1674 = vrot.lane.b32.xlu0 %v1639_v7, %s3754_s6  ;;  %1672 = vrot.lane.b32.xlu1 %v1638_v33, %s3754_s6  ;;  %v6905_v7 = vld [vmem:[#allocation22_spill] sm:$0xff] }
 0x83c   : > { %v627_v33 = vsel %vm538_vm1, %v6903_v48, %v6905_v7  ;;  %v805_v48 = vsel %vm713_vm2, %v6919_v16, %v6921_v34 }
 0x83d   : > { %v645_v5 = vadd.f32 %v627_v33, %v470_v49  ;;  %v6924_v33 = vld [vmem:[#allocation41_spill] sm:$0xff]  ;;  %v823_v44 = vadd.f32 %v805_v48, %v648_v54 }
 0x83f   : > { %1830 = vperm.xlu1 %3622, %v4968_v52   ;;  %1835 = vperm.xlu0 %3623, %v4973_v17  }
 0x843   : > { %1840 = vperm.xlu1 %3622, %v4980_v46   ;;  %3625 = vset.pattern.permute.xlu0 %v3757_v15 }
 0x844   : > { %1866 = vperm.xlu0 %3625, %v4973_v17  }
 0x847   : > { %3624 = vset.pattern.permute.xlu1 %v3757_v15  ;;  %v6906_v15 = vld [vmem:[#allocation23_spill] sm:$0xff] }
 0x848   : > { %1862 = vperm.xlu1 %3624, %v4968_v52   ;;  %3627 = vset.pattern.permute.xlu0 %v3758_v35 }
 0x849   : > { %1896 = vperm.xlu0 %3627, %v4973_v17  }
 0x84c   : > { %1870 = vperm.xlu1 %3624, %v4980_v46  }
 0x84d   : > { %3629 = vset.pattern.permute.xlu0 %v3759_v36 }
 0x850   : > { %3626 = vset.pattern.permute.xlu1 %v3758_v35  ;;  %v628_v35 = vsel %vm538_vm1, %v6905_v7, %v6906_v15  ;;  %v6923_v7 = vld [vmem:[#allocation42_spill] sm:$0xff] }
 0x851   : > { %1892 = vperm.xlu1 %3626, %v4968_v52   ;;  %v646_v8 = vadd.f32 %v628_v35, %v471_v53  ;;  %v6920_v53 = vld [vmem:[#allocation37_spill] sm:$0xff]  ;;  %v807_v15 = vsel %vm713_vm2, %v6924_v33, %v6923_v7  ;;  %v6925_v35 = vld [vmem:[#allocation43_spill] sm:$0xff] }
 0x852   : > { %v804_v23 = vsel %vm713_vm2, %v6920_v53, %v6919_v16  ;;  %v809_v45 = vsel %vm713_vm2, %v6925_v35, %v6926_v42  ;;  %v6937_v53 = vld [vmem:[#allocation67_spill] sm:$0xff] }
 0x853   : > { %v821_v38 = vadd.f32 %v803_v27, %v646_v8  ;;  %v822_v40 = vadd.f32 %v804_v23, %v647_v2  ;;  %v6931_v8 = vld [vmem:[#allocation62_spill] sm:$0xff]  ;;  %v827_v54 = vadd.f32 %v809_v45, %v652_v12  ;;  %v994_v27 = vadd.f32 %v976_v18, %v819_v28 }
 0x854   : > { %v979_v2 = vsel %vm888_vm3, %v6932_v22, %v6931_v8  ;;  %v980_v60 = vsel %vm888_vm3, %v6931_v8, %v6933_v0  ;;  %v983_v23 = vsel %vm888_vm3, %v6935_v57, %v6937_v53 }
 0x855   : > { %1900 = vperm.xlu1 %3626, %v4980_v46   ;;  %v997_v48 = vadd.f32 %v979_v2, %v822_v40  ;;  %v998_v28 = vadd.f32 %v980_v60, %v823_v44  ;;  %v6949_v2 = vld [vmem:[#allocation91_spill] sm:$0xff] }
 0x859   : > { %3628 = vset.pattern.permute.xlu1 %v3759_v36  ;;  %v474_v36 = vadd.f32 %v456_v4, %v290_v51  ;;  %v6912_v51 = vld [vmem:[#allocation28_spill] sm:$0xff]  ;;  %v802_v4 = vsel %vm713_vm2, %v6915_v50, %v6917_v11 }
 0x85a   : > { %v632_v32 = vsel %vm538_vm1, %v6912_v51, %v6911_v14  ;;  %v6934_v50 = vld [vmem:[#allocation64_spill] sm:$0xff] }
 0x85b   : > { %v649_v49 = vadd.f32 %v631_v58, %v474_v36  ;;  %v650_v10 = vadd.f32 %v632_v32, %v475_v39  ;;  %v808_v36 = vsel %vm713_vm2, %v6923_v7, %v6925_v35  ;;  %v820_v39 = vadd.f32 %v802_v4, %v645_v5  ;;  %v6929_v58 = vld [vmem:[#allocation59_spill] sm:$0xff] }
 0x85c   : > { %v977_v14 = vsel %vm888_vm3, %v6927_v63, %v6929_v58  ;;  %v826_v32 = vadd.f32 %v808_v36, %v651_v62  ;;  %v978_v5 = vsel %vm888_vm3, %v6929_v58, %v6930_v21  ;;  %v981_v55 = vsel %vm888_vm3, %v6933_v0, %v6934_v50  ;;  %v6941_v7 = vld [vmem:[#allocation83_spill] sm:$0xff]  ;;  %v6942_v36 = vld [vmem:[#allocation84_spill] sm:$0xff]  ;;  %v6943_v63 = vld [vmem:[#allocation86_spill] sm:$0xff] }
 0x85d   : > { %v824_v1 = vadd.f32 %v806_v24, %v649_v49  ;;  %v825_v51 = vadd.f32 %v807_v15, %v650_v10  ;;  %v6936_v49 = vld [vmem:[#allocation65_spill] sm:$0xff]  ;;  %v995_v16 = vadd.f32 %v977_v14, %v820_v39  ;;  %v6938_v10 = vld [vmem:[#allocation68_spill] sm:$0xff]  ;;  %v996_v34 = vadd.f32 %v978_v5, %v821_v38  ;;  %v6947_v5 = vld [vmem:[#allocation90_spill] sm:$0xff] }
 0x85e   : > { %v982_v11 = vsel %vm888_vm3, %v6936_v49, %v6935_v57  ;;  %v984_v62 = vsel %vm888_vm3, %v6937_v53, %v6938_v10  ;;  %v6940_v24 = vld [vmem:[#allocation81_spill] sm:$0xff]  ;;  %v1152_v33 = vsel %vm1063_vm4, %v6939_v6, %v6941_v7  ;;  %v1153_v39 = vsel %vm1063_vm4, %v6941_v7, %v6942_v36  ;;  %v6950_v0 = vld [vmem:[#allocation92_spill] sm:$0xff]  ;;  %v6951_v50 = vld [vmem:[#allocation106_spill] sm:$0xff] }
 0x85f   : > { %v1151_v12 = vsel %vm1063_vm4, %v6940_v24, %v6939_v6  ;;  %v999_v15 = vadd.f32 %v981_v55, %v824_v1  ;;  %v1000_v35 = vadd.f32 %v982_v11, %v825_v51  ;;  %v1001_v42 = vadd.f32 %v983_v23, %v826_v32  ;;  %v6944_v38 = vld [vmem:[#allocation85_spill] sm:$0xff]  ;;  %v6946_v51 = vld [vmem:[#allocation88_spill] sm:$0xff] }
 0x860   : > { %v1002_v45 = vadd.f32 %v984_v62, %v827_v54  ;;  %v1154_v40 = vsel %vm1063_vm4, %v6944_v38, %v6943_v63  ;;  %v1155_v18 = vsel %vm1063_vm4, %v6943_v63, %v6945_v61  ;;  %v1169_v44 = vadd.f32 %v1151_v12, %v994_v27  ;;  %v6948_v32 = vld [vmem:[#allocation89_spill] sm:$0xff]  ;;  %v6953_v27 = vld [vmem:[#allocation107_spill] sm:$0xff]  ;;  %v6954_v53 = vld [vmem:[#allocation108_spill] sm:$0xff] }
 0x861   : > { %v1170_v1 = vadd.f32 %v1152_v33, %v995_v16  ;;  %v1156_v21 = vsel %vm1063_vm4, %v6945_v61, %v6946_v51  ;;  %v1157_v8 = vsel %vm1063_vm4, %v6948_v32, %v6947_v5  ;;  %v1171_v22 = vadd.f32 %v1153_v39, %v996_v34  ;;  %v6952_v55 = vld [vmem:[#allocation105_spill] sm:$0xff]  ;;  %v6955_v34 = vld [vmem:[#allocation110_spill] sm:$0xff]  ;;  %v6957_v12 = vld [vmem:[#allocation111_spill] sm:$0xff] }
 0x862   : > { %v1158_v54 = vsel %vm1063_vm4, %v6947_v5, %v6949_v2  ;;  %v1159_v60 = vsel %vm1063_vm4, %v6949_v2, %v6950_v0  ;;  %v1326_v57 = vsel %vm1238_vm5, %v6952_v55, %v6951_v50  ;;  %v1172_v49 = vadd.f32 %v1154_v40, %v997_v48  ;;  %v6956_v6 = vld [vmem:[#allocation109_spill] sm:$0xff]  ;;  %v6958_v63 = vld [vmem:[#allocation112_spill] sm:$0xff]  ;;  %v6966_v0 = vld [vmem:[#allocation135_spill] sm:$0xff] }
 0x863   : > { %v1173_v11 = vadd.f32 %v1155_v18, %v998_v28  ;;  %v1327_v16 = vsel %vm1238_vm5, %v6951_v50, %v6953_v27  ;;  %v1328_v23 = vsel %vm1238_vm5, %v6953_v27, %v6954_v53  ;;  %v1174_v10 = vadd.f32 %v1156_v21, %v999_v15  ;;  %v6960_v61 = vld [vmem:[#allocation113_spill] sm:$0xff] }
 0x864   : > { %v1175_v62 = vadd.f32 %v1157_v8, %v1000_v35  ;;  %v1329_v24 = vsel %vm1238_vm5, %v6956_v6, %v6955_v34  ;;  %v1330_v7 = vsel %vm1238_vm5, %v6955_v34, %v6957_v12  ;;  %v1176_v28 = vadd.f32 %v1158_v54, %v1001_v42  ;;  %v6959_v35 = vld [vmem:[#allocation114_spill] sm:$0xff]  ;;  %v6961_v51 = vld [vmem:[#allocation133_spill] sm:$0xff]  ;;  %v6962_v8 = vld [vmem:[#allocation115_spill] sm:$0xff] }
 0x865   : > { %v1177_v36 = vadd.f32 %v1159_v60, %v1002_v45  ;;  %v1344_v39 = vadd.f32 %v1326_v57, %v1169_v44  ;;  %v1331_v38 = vsel %vm1238_vm5, %v6957_v12, %v6958_v63  ;;  %v1345_v40 = vadd.f32 %v1327_v16, %v1170_v1  ;;  %v6963_v45 = vld [vmem:[#allocation130_spill] sm:$0xff]  ;;  %v6964_v44 = vld [vmem:[#allocation129_spill] sm:$0xff]  ;;  %v6970_v6 = vld [vmem:[#allocation131_spill] sm:$0xff] }
 0x866   : > { %v1346_v15 = vadd.f32 %v1328_v23, %v1171_v22  ;;  %v1332_v18 = vsel %vm1238_vm5, %v6960_v61, %v6959_v35  ;;  %v1504_v21 = vsel %vm1413_vm6, %v6961_v51, %v4654_v3  ;;  %v1347_v5 = vadd.f32 %v1329_v24, %v1172_v49  ;;  %v6965_v22 = vld [vmem:[#allocation134_spill] sm:$0xff]  ;;  %v6968_v53 = vld [vmem:[#allocation137_spill] sm:$0xff]  ;;  %v6969_v23 = vld [vmem:[#allocation136_spill] sm:$0xff] }
 0x867   : > { %v1348_v32 = vadd.f32 %v1330_v7, %v1173_v11  ;;  %v1333_v42 = vsel %vm1238_vm5, %v6959_v35, %v6962_v8  ;;  %v1501_v2 = vsel %vm1413_vm6, %v6964_v44, %v6963_v45  ;;  %v1349_v1 = vadd.f32 %v1331_v38, %v1174_v10  ;;  %v6967_v11 = vld [vmem:[#allocation116_spill] sm:$0xff]  ;;  %v6972_v61 = vld [vmem:[#allocation138_spill] sm:$0xff] }
 0x868   : > { %v1505_v54 = vsel %vm1413_vm6, %v4654_v3, %v6965_v22  ;;  %v1506_v60 = vsel %vm1413_vm6, %v6965_v22, %v6966_v0  ;;  %v1350_v49 = vadd.f32 %v1332_v18, %v1175_v62  ;;  %v1334_v27 = vsel %vm1238_vm5, %v6962_v8, %v6967_v11  ;;  %v6971_v62 = vld [vmem:[#allocation132_spill] sm:$0xff] }
 0x869   : > { %v1522_v16 = vadd.f32 %v1504_v21, %v1347_v5  ;;  %v1507_v10 = vsel %vm1413_vm6, %v6969_v23, %v6968_v53  ;;  %v1351_v34 = vadd.f32 %v1333_v42, %v1176_v28  ;;  %v1519_v3 = vadd.f32 %v1501_v2, %v1344_v39  ;;  %v6973_v5 = vld [vmem:[#allocation139_spill] sm:$0xff] }
 0x86a   : > { %v1502_v24 = vsel %vm1413_vm6, %v6963_v45, %v6970_v6  ;;  %v1503_v7 = vsel %vm1413_vm6, %v6970_v6, %v6971_v62  ;;  %v1524_v63 = vadd.f32 %v1506_v60, %v1349_v1  ;;  %v1525_v35 = vadd.f32 %v1507_v10, %v1350_v49 }
 0x86b   : > { %v1508_v28 = vsel %vm1413_vm6, %v6968_v53, %v6972_v61  ;;  %v1352_v45 = vadd.f32 %v1334_v27, %v1177_v36  ;;  %v1520_v44 = vadd.f32 %v1502_v24, %v1345_v40  ;;  %v1521_v1 = vadd.f32 %v1503_v7, %v1346_v15 }
 0x86c   : > { %v1526_v60 = vadd.f32 %v1508_v28, %v1351_v34 }
 0x899   : > { %v5109_v4 = vpop.permute.xlu0 %1654  ;;  %v5111_v25 = vpop.permute.xlu1 %1652 }
 0x89a   : > { %v1676_v12 = vsel %vm1588_vm7, %v5111_v25, %v5109_v4  ;;  %v1509_v25 = vsel %vm1413_vm6, %v6972_v61, %v6973_v5 }
 0x89b   : > { %v1694_v8 = vadd.f32 %v1676_v12, %v1519_v3 }
 0x89d   : > { %v5134_v58 = vpop.permute.xlu0 %1658  ;;  %v1657_v14 = vpop.permute.xlu1 %1656 }
 0x89e   : > { %v1678_v2 = vsel %vm1588_vm7, %v1657_v14, %v5134_v58 }
 0x8a1   : > { %v1663_v48 = vpop.permute.xlu0 %1662  ;;  %v1661_v33 = vpop.permute.xlu1 %1660 }
 0x8a2   : > { %v1679_v50 = vsel %vm1588_vm7, %v1661_v33, %v1663_v48  ;;  %v1523_v33 = vadd.f32 %v1505_v54, %v1348_v32  ;;  %v1677_v32 = vsel %vm1588_vm7, %v5109_v4, %v1657_v14  ;;  %v1696_v4 = vadd.f32 %v1678_v2, %v1521_v1 }
 0x8a3   : > { %v1697_v38 = vadd.f32 %v1679_v50, %v1522_v16  ;;  %v1527_v50 = vadd.f32 %v1509_v25, %v1352_v45 }
 0x8a5   : > { %v1667_v55 = vpop.permute.xlu0 %1666  ;;  %v1665_v57 = vpop.permute.xlu1 %1664  ;;  %v1766_v22 = vadd.f32 %v1697_v38, %v1694_v8 }
 0x8a6   : > { %v1680_v39 = vsel %vm1588_vm7, %v1663_v48, %v1665_v57  ;;  %v1681_v18 = vsel %vm1588_vm7, %v1665_v57, %v1667_v55  ;;  %v1695_v55 = vadd.f32 %v1677_v32, %v1520_v44 }
 0x8a7   : > { %v1698_v54 = vadd.f32 %v1680_v39, %v1523_v33  ;;  %v1699_v0 = vadd.f32 %v1681_v18, %v1524_v63 }
 0x8a9   : > { %v1671_v51 = vpop.permute.xlu0 %1670  ;;  %v1669_v21 = vpop.permute.xlu1 %1668  ;;  %v1775_v14 = vadd.f32 %v1698_v54, %v1695_v55  ;;  %v1784_v15 = vadd.f32 %v1699_v0, %v1696_v4 }
 0x8aa   : > { %v1682_v42 = vsel %vm1588_vm7, %v1669_v21, %v1671_v51 }
 0x8ab   : > { %v1700_v48 = vadd.f32 %v1682_v42, %v1525_v35 }
 0x8ad   : > { %v1767_v57 = vsel %vm1704_vm8, %v1700_v48, 0.0  ;;  %v1675_v49 = vpop.permute.xlu0 %1674  ;;  %v1673_v11 = vpop.permute.xlu1 %1672 }
 0x8ae   : > { %v1768_v16 = vadd.f32 %v1767_v57, %v1766_v22  ;;  %v1683_v36 = vsel %vm1588_vm7, %v1671_v51, %v1673_v11  ;;  %v1684_v40 = vsel %vm1588_vm7, %v1673_v11, %v1675_v49 }
 0x8af   : > { %v1701_v27 = vadd.f32 %v1683_v36, %v1526_v60  ;;  %v1702_v58 = vadd.f32 %v1684_v40, %v1527_v50 }
 0x8b0   : > { %v1769_v53 = vrot.slane %v1768_v16, 4 }
 0x8b1   : > { %v1776_v23 = vsel %vm1704_vm8, %v1701_v27, 0.0  ;;  %v1785_v10 = vsel %vm1704_vm8, %v1702_v58, 0.0 }
 0x8b2   : > { %v1770_v34 = vadd.f32 %v1769_v53, %v1768_v16  ;;  %v1777_v3 = vadd.f32 %v1776_v23, %v1775_v14  ;;  %v1786_v6 = vadd.f32 %v1785_v10, %v1784_v15 }
 0x8b4   : > { %v1771_v24 = vrot.slane %v1770_v34, 2  ;;  %v1778_v12 = vrot.slane %v1777_v3, 4  ;;  %v1787_v62 = vrot.slane %v1786_v6, 4 }
 0x8b6   : > { %v1772_v7 = vadd.f32 %v1771_v24, %v1770_v34  ;;  %v1779_v33 = vadd.f32 %v1778_v12, %v1777_v3  ;;  %v1788_v63 = vadd.f32 %v1787_v62, %v1786_v6  ;;  %v3760_v3 = vmov 10  }
 0x8b8   : > { %v1773_v38 = vrot.slane %v1772_v7, 1  ;;  %v1780_v35 = vrot.slane %v1779_v33, 2  ;;  %v1789_v61 = vrot.slane %v1788_v63, 2 }
 0x8ba   : > { %v1781_v28 = vadd.f32 %v1780_v35, %v1779_v33  ;;  %v1790_v39 = vadd.f32 %v1789_v61, %v1788_v63  ;;  %v1774_v18 = vadd.f32 %v1773_v38, %v1772_v7 }
 0x8bc   : > { %v1782_v51 = vrot.slane %v1781_v28, 1  ;;  %v1791_v21 = vrot.slane %v1790_v39, 1  ;;  %v1793_v32 = vadd.f32 0.0062480406, %v1774_v18 }
 0x8be   : > { %v1783_v5 = vadd.f32 %v1782_v51, %v1781_v28  ;;  %v1792_v25 = vadd.f32 %v1791_v21, %v1790_v39  ;;  %v5218_v8 = vpop.permute.xlu1 %1830  ;;  %v5226_v0 = vpop.permute.xlu0 %1835 }
 0x8bf   : > { %6974 = vst [vmem:[#allocation45_spill] sm:$0xff] %v5218_v8  ;;  %6976 = vst [vmem:[#allocation48_spill] sm:$0xff] %v5226_v0 }
 0x8c0   : > { %v1794_v42 = vadd.f32 0.0062480406, %v1783_v5  ;;  %v1795_v45 = vadd.f32 0.0062480406, %v1792_v25 }
 0x8c2   : > { %v1799_v44 = vcombine.low %v1793_v32, %v1794_v42  ;;  %v5220_v2 = vpop.permute.xlu1 %1840  ;;  %v1813_v1 = vrot.slane %v1795_v45, %v4927_v26 }
 0x8c3   : > { %6975 = vst [vmem:[#allocation47_spill] sm:$0xff] %v5220_v2  ;;  %v5234_v55 = vpop.permute.xlu0 %1866 }
 0x8c4   : > { %v1806_v48 = vrot.slane %v1799_v44, %v4927_v26 }
 0x8c6   : > { %v1814_v22 = vcombine.low %v1806_v48, %v1813_v1 }
 0x8c7   : > { %v5224_v54 = vpop.permute.xlu1 %1862 }
 0x8c8   : > { %v1821_v60 = vrot.slane %v1814_v22, %v4927_v26  ;;  %v1897_v4 = vpop.permute.xlu0 %1896 }
 0x8c9   : > { %v1908_v40 = vmul.f32 %v1897_v4, %v3926_v43  ;;  %v1907_v27 = vmul.f32 %v1897_v4, %v3930_v47  ;;  %v1910_v58 = vmul.f32 %v1897_v4, %v3940_v56  ;;  %v1909_v14 = vmul.f32 %v1897_v4, %v3943_v59 }
 0x8ca   : > { %3493 = vst.msk [vmem:[%s4948_s9 + $0x1] ss:$4 sm:$0x7] %vm4941_vm9, %v1821_v60 }
 0x8cb   : > { %v5232_v50 = vpop.permute.xlu1 %1870 }
 0x8cc   : > { %6977 = vst [vmem:[#allocation50_spill] sm:$0xff] %v5232_v50 }
 0x8d0   : > { %v1893_v57 = vpop.permute.xlu1 %1892 }
 0x8d1   : > { %v1904_v49 = vmul.f32 %v1893_v57, %v3909_v29  ;;  %v1903_v11 = vmul.f32 %v1893_v57, %v3911_v30  ;;  %v1906_v16 = vmul.f32 %v1893_v57, %v3917_v37  ;;  %v1905_v36 = vmul.f32 %v1893_v57, %v3921_v41 }
 0x8d3   : > { %1929 = vrot.lane.b32.xlu0 %v1904_v49, %s3736_s11  ;;  %1927 = vrot.lane.b32.xlu1 %v1903_v11, %s3736_s11  ;;  %v3761_v11 = vmov 11  }
 0x8d4   : > { %v1901_v15 = vpop.permute.xlu1 %1900 }
 0x8d5   : > { %v1912_v53 = vmul.f32 %v1901_v15, %v3953_v9  ;;  %v1911_v23 = vmul.f32 %v1901_v15, %v3957_v13  ;;  %v1914_v10 = vmul.f32 %v1901_v15, %v3962_v19  ;;  %v1913_v34 = vmul.f32 %v1901_v15, %v3964_v20 }
 0x8d7   : > { %1933 = vrot.lane.b32.xlu0 %v1906_v16, %s3736_s11  ;;  %1931 = vrot.lane.b32.xlu1 %v1905_v36, %s3736_s11 }
 0x8db   : > { %1937 = vrot.lane.b32.xlu0 %v1908_v40, %s3736_s11  ;;  %1935 = vrot.lane.b32.xlu1 %v1907_v27, %s3736_s11 }
 0x8df   : > { %1941 = vrot.lane.b32.xlu0 %v1910_v58, %s3736_s11  ;;  %1939 = vrot.lane.b32.xlu1 %v1909_v14, %s3736_s11 }
 0x8e3   : > { %1945 = vrot.lane.b32.xlu0 %v1912_v53, %s3736_s11  ;;  %1943 = vrot.lane.b32.xlu1 %v1911_v23, %s3736_s11 }
 0x8e7   : > { %1949 = vrot.lane.b32.xlu0 %v1914_v10, %s3736_s11  ;;  %1947 = vrot.lane.b32.xlu1 %v1913_v34, %s3736_s11 }
 0x8eb   : > { %1979 = vperm.xlu1 %3628, %v4968_v52   ;;  %1983 = vperm.xlu0 %3629, %v4973_v17  }
 0x8ef   : > { %1987 = vperm.xlu1 %3628, %v4980_v46   ;;  %3631 = vset.pattern.permute.xlu0 %v3760_v3 }
 0x8f3   : > { %3630 = vset.pattern.permute.xlu1 %v3760_v3 }
 0x945   : > { %v5263_v6 = vpop.permute.xlu1 %1927  ;;  %v5265_v24 = vpop.permute.xlu0 %1929 }
 0x946   : > { %6978 = vst [vmem:[#allocation49_spill] sm:$0xff] %v5263_v6  ;;  %6979 = vst [vmem:[#allocation51_spill] sm:$0xff] %v5265_v24 }
 0x949   : > { %v5267_v12 = vpop.permute.xlu1 %1931  ;;  %v5269_v62 = vpop.permute.xlu0 %1933 }
 0x94a   : > { %6980 = vst [vmem:[#allocation52_spill] sm:$0xff] %v5267_v12  ;;  %6981 = vst [vmem:[#allocation54_spill] sm:$0xff] %v5269_v62 }
 0x94d   : > { %v5271_v7 = vpop.permute.xlu1 %1935  ;;  %v5273_v33 = vpop.permute.xlu0 %1937 }
 0x94e   : > { %6982 = vst [vmem:[#allocation53_spill] sm:$0xff] %v5271_v7  ;;  %6983 = vst [vmem:[#allocation55_spill] sm:$0xff] %v5273_v33 }
 0x951   : > { %v5275_v63 = vpop.permute.xlu1 %1939  ;;  %v5277_v38 = vpop.permute.xlu0 %1941 }
 0x952   : > { %6984 = vst [vmem:[#allocation56_spill] sm:$0xff] %v5275_v63  ;;  %6985 = vst [vmem:[#allocation70_spill] sm:$0xff] %v5277_v38 }
 0x955   : > { %v5279_v35 = vpop.permute.xlu1 %1943  ;;  %v5281_v61 = vpop.permute.xlu0 %1945 }
 0x956   : > { %6986 = vst [vmem:[#allocation69_spill] sm:$0xff] %v5279_v35  ;;  %6987 = vst [vmem:[#allocation71_spill] sm:$0xff] %v5281_v61 }
 0x959   : > { %v5283_v28 = vpop.permute.xlu1 %1947  ;;  %v5285_v39 = vpop.permute.xlu0 %1949 }
 0x95a   : > { %6988 = vst [vmem:[#allocation72_spill] sm:$0xff] %v5283_v28  ;;  %6989 = vst [vmem:[#allocation74_spill] sm:$0xff] %v5285_v39 }
 0x96a   : > { %v1980_v18 = vpop.permute.xlu1 %1979  ;;  %v1984_v5 = vpop.permute.xlu0 %1983 }
 0x96b   : > { %v1991_v51 = vmul.f32 %v1980_v18, %v3909_v29  ;;  %v1990_v21 = vmul.f32 %v1980_v18, %v3911_v30  ;;  %v1993_v25 = vmul.f32 %v1980_v18, %v3917_v37  ;;  %v1992_v32 = vmul.f32 %v1980_v18, %v3921_v41 }
 0x96c   : > { %v1995_v42 = vmul.f32 %v1984_v5, %v3926_v43  ;;  %v1994_v45 = vmul.f32 %v1984_v5, %v3930_v47  ;;  %v1997_v44 = vmul.f32 %v1984_v5, %v3940_v56  ;;  %v1996_v48 = vmul.f32 %v1984_v5, %v3943_v59 }
 0x96d   : > { %2016 = vrot.lane.b32.xlu0 %v1991_v51, %s3736_s11  ;;  %2014 = vrot.lane.b32.xlu1 %v1990_v21, %s3736_s11 }
 0x96e   : > { %v1988_v1 = vpop.permute.xlu1 %1987 }
 0x96f   : > { %v1999_v22 = vmul.f32 %v1988_v1, %v3953_v9  ;;  %v1998_v60 = vmul.f32 %v1988_v1, %v3957_v13  ;;  %v2001_v57 = vmul.f32 %v1988_v1, %v3962_v19  ;;  %v2000_v49 = vmul.f32 %v1988_v1, %v3964_v20 }
 0x971   : > { %2020 = vrot.lane.b32.xlu0 %v1993_v25, %s3736_s11  ;;  %2018 = vrot.lane.b32.xlu1 %v1992_v32, %s3736_s11 }
 0x975   : > { %2024 = vrot.lane.b32.xlu0 %v1995_v42, %s3736_s11  ;;  %2022 = vrot.lane.b32.xlu1 %v1994_v45, %s3736_s11 }
 0x979   : > { %2028 = vrot.lane.b32.xlu0 %v1997_v44, %s3736_s11  ;;  %2026 = vrot.lane.b32.xlu1 %v1996_v48, %s3736_s11 }
 0x97d   : > { %2032 = vrot.lane.b32.xlu0 %v1999_v22, %s3736_s11  ;;  %2030 = vrot.lane.b32.xlu1 %v1998_v60, %s3736_s11 }
 0x981   : > { %2036 = vrot.lane.b32.xlu0 %v2001_v57, %s3736_s11  ;;  %2034 = vrot.lane.b32.xlu1 %v2000_v49, %s3736_s11  ;;  %v3762_v49 = vmov 14  }
 0x985   : > { %2066 = vperm.xlu1 %3630, %v4968_v52   ;;  %2070 = vperm.xlu0 %3631, %v4973_v17  }
 0x989   : > { %2074 = vperm.xlu1 %3630, %v4980_v46   ;;  %3633 = vset.pattern.permute.xlu0 %v3761_v11 }
 0x98d   : > { %3632 = vset.pattern.permute.xlu1 %v3761_v11 }
 0x9df   : > { %v5314_v4 = vpop.permute.xlu1 %2014  ;;  %v5316_v16 = vpop.permute.xlu0 %2016 }
 0x9e3   : > { %v5318_v36 = vpop.permute.xlu1 %2018  ;;  %v5320_v40 = vpop.permute.xlu0 %2020 }
 0x9e7   : > { %v5322_v27 = vpop.permute.xlu1 %2022  ;;  %v5324_v58 = vpop.permute.xlu0 %2024 }
 0x9eb   : > { %v5326_v14 = vpop.permute.xlu1 %2026  ;;  %v5328_v15 = vpop.permute.xlu0 %2028 }
 0x9ec   : > { %6990 = vst [vmem:[#allocation73_spill] sm:$0xff] %v5328_v15 }
 0x9ef   : > { %v5330_v53 = vpop.permute.xlu1 %2030  ;;  %v5332_v23 = vpop.permute.xlu0 %2032 }
 0x9f0   : > { %6991 = vst [vmem:[#allocation75_spill] sm:$0xff] %v5330_v53  ;;  %6992 = vst [vmem:[#allocation76_spill] sm:$0xff] %v5332_v23 }
 0x9f3   : > { %v5334_v10 = vpop.permute.xlu1 %2034  ;;  %v5336_v34 = vpop.permute.xlu0 %2036 }
 0x9f4   : > { %6993 = vst [vmem:[#allocation78_spill] sm:$0xff] %v5334_v10  ;;  %6994 = vst [vmem:[#allocation77_spill] sm:$0xff] %v5336_v34 }
 0xa04   : > { %v2067_v3 = vpop.permute.xlu1 %2066  ;;  %v2071_v21 = vpop.permute.xlu0 %2070 }
 0xa05   : > { %v2078_v18 = vmul.f32 %v2067_v3, %v3909_v29  ;;  %v2077_v51 = vmul.f32 %v2067_v3, %v3911_v30  ;;  %v2080_v5 = vmul.f32 %v2067_v3, %v3917_v37  ;;  %v2079_v25 = vmul.f32 %v2067_v3, %v3921_v41 }
 0xa06   : > { %v2082_v32 = vmul.f32 %v2071_v21, %v3926_v43  ;;  %v2081_v42 = vmul.f32 %v2071_v21, %v3930_v47  ;;  %v2084_v45 = vmul.f32 %v2071_v21, %v3940_v56  ;;  %v2083_v44 = vmul.f32 %v2071_v21, %v3943_v59 }
 0xa07   : > { %2103 = vrot.lane.b32.xlu0 %v2078_v18, %s3737_s17  ;;  %2101 = vrot.lane.b32.xlu1 %v2077_v51, %s3737_s17 }
 0xa08   : > { %v2075_v48 = vpop.permute.xlu1 %2074 }
 0xa09   : > { %v2086_v1 = vmul.f32 %v2075_v48, %v3953_v9  ;;  %v2085_v22 = vmul.f32 %v2075_v48, %v3957_v13  ;;  %v2088_v60 = vmul.f32 %v2075_v48, %v3962_v19  ;;  %v2087_v57 = vmul.f32 %v2075_v48, %v3964_v20 }
 0xa0b   : > { %2107 = vrot.lane.b32.xlu0 %v2080_v5, %s3737_s17  ;;  %2105 = vrot.lane.b32.xlu1 %v2079_v25, %s3737_s17 }
 0xa0f   : > { %2111 = vrot.lane.b32.xlu0 %v2082_v32, %s3737_s17  ;;  %2109 = vrot.lane.b32.xlu1 %v2081_v42, %s3737_s17 }
 0xa13   : > { %2115 = vrot.lane.b32.xlu0 %v2084_v45, %s3737_s17  ;;  %2113 = vrot.lane.b32.xlu1 %v2083_v44, %s3737_s17 }
 0xa17   : > { %2119 = vrot.lane.b32.xlu0 %v2086_v1, %s3737_s17  ;;  %2117 = vrot.lane.b32.xlu1 %v2085_v22, %s3737_s17 }
 0xa1b   : > { %2123 = vrot.lane.b32.xlu0 %v2088_v60, %s3737_s17  ;;  %2121 = vrot.lane.b32.xlu1 %v2087_v57, %s3737_s17 }
 0xa1f   : > { %2153 = vperm.xlu1 %3632, %v4968_v52   ;;  %2157 = vperm.xlu0 %3633, %v4973_v17  }
 0xa23   : > { %2161 = vperm.xlu1 %3632, %v4980_v46   ;;  %3635 = vset.pattern.permute.xlu0 %v3762_v49 }
 0xa27   : > { %3634 = vset.pattern.permute.xlu1 %v3762_v49 }
 0xa79   : > { %v5365_v11 = vpop.permute.xlu1 %2101  ;;  %v5367_v3 = vpop.permute.xlu0 %2103 }
 0xa7a   : > { %6995 = vst [vmem:[#allocation79_spill] sm:$0xff] %v5365_v11  ;;  %6996 = vst [vmem:[#allocation80_spill] sm:$0xff] %v5367_v3 }
 0xa7d   : > { %v5369_v18 = vpop.permute.xlu1 %2105  ;;  %v5371_v51 = vpop.permute.xlu0 %2107 }
 0xa7e   : > { %6997 = vst [vmem:[#allocation94_spill] sm:$0xff] %v5369_v18  ;;  %6998 = vst [vmem:[#allocation93_spill] sm:$0xff] %v5371_v51 }
 0xa81   : > { %v5373_v21 = vpop.permute.xlu1 %2109  ;;  %v5375_v5 = vpop.permute.xlu0 %2111 }
 0xa82   : > { %6999 = vst [vmem:[#allocation95_spill] sm:$0xff] %v5373_v21  ;;  %7000 = vst [vmem:[#allocation96_spill] sm:$0xff] %v5375_v5 }
 0xa85   : > { %v5377_v25 = vpop.permute.xlu1 %2113  ;;  %v5379_v32 = vpop.permute.xlu0 %2115 }
 0xa86   : > { %7001 = vst [vmem:[#allocation98_spill] sm:$0xff] %v5377_v25  ;;  %7002 = vst [vmem:[#allocation97_spill] sm:$0xff] %v5379_v32 }
 0xa89   : > { %v5381_v42 = vpop.permute.xlu1 %2117  ;;  %v5383_v45 = vpop.permute.xlu0 %2119 }
 0xa8a   : > { %7003 = vst [vmem:[#allocation99_spill] sm:$0xff] %v5381_v42  ;;  %7004 = vst [vmem:[#allocation100_spill] sm:$0xff] %v5383_v45 }
 0xa8d   : > { %v5385_v44 = vpop.permute.xlu1 %2121  ;;  %v5387_v48 = vpop.permute.xlu0 %2123 }
 0xa8e   : > { %7005 = vst [vmem:[#allocation102_spill] sm:$0xff] %v5385_v44  ;;  %7006 = vst [vmem:[#allocation101_spill] sm:$0xff] %v5387_v48 }
 0xa9e   : > { %v2154_v1 = vpop.permute.xlu1 %2153  ;;  %v2158_v57 = vpop.permute.xlu0 %2157 }
 0xa9f   : > { %v2165_v22 = vmul.f32 %v2154_v1, %v3909_v29  ;;  %v2164_v60 = vmul.f32 %v2154_v1, %v3911_v30  ;;  %v2167_v49 = vmul.f32 %v2154_v1, %v3917_v37  ;;  %v2166_v31 = vmul.f32 %v2154_v1, %v3921_v41 }
 0xaa0   : > { %v2169_v26 = vmul.f32 %v2158_v57, %v3926_v43  ;;  %v2168_v48 = vmul.f32 %v2158_v57, %v3930_v47 }
 0xaa1   : > { %2190 = vrot.lane.b32.xlu0 %v2165_v22, %s3737_s17  ;;  %2188 = vrot.lane.b32.xlu1 %v2164_v60, %s3737_s17  ;;  %v2171_v22 = vmul.f32 %v2158_v57, %v3940_v56  ;;  %v2170_v60 = vmul.f32 %v2158_v57, %v3943_v59  ;;  %v3763_v57 = vmov 15  }
 0xaa2   : > { %v2162_v34 = vpop.permute.xlu1 %2161 }
 0xaa3   : > { %v2173_v1 = vmul.f32 %v2162_v34, %v3953_v9 }
 0xaa5   : > { %2194 = vrot.lane.b32.xlu0 %v2167_v49, %s3737_s17  ;;  %2192 = vrot.lane.b32.xlu1 %v2166_v31, %s3737_s17  ;;  %v2172_v31 = vmul.f32 %v2162_v34, %v3957_v13 }
 0xaa9   : > { %2198 = vrot.lane.b32.xlu0 %v2169_v26, %s3737_s17  ;;  %2196 = vrot.lane.b32.xlu1 %v2168_v48, %s3737_s17  ;;  %v2175_v26 = vmul.f32 %v2162_v34, %v3962_v19  ;;  %v2174_v48 = vmul.f32 %v2162_v34, %v3964_v20 }
 0xaad   : > { %2202 = vrot.lane.b32.xlu0 %v2171_v22, %s3737_s17  ;;  %2200 = vrot.lane.b32.xlu1 %v2170_v60, %s3737_s17 }
 0xab1   : > { %2206 = vrot.lane.b32.xlu0 %v2173_v1, %s3737_s17  ;;  %2204 = vrot.lane.b32.xlu1 %v2172_v31, %s3737_s17 }
 0xab5   : > { %2210 = vrot.lane.b32.xlu0 %v2175_v26, %s3737_s17  ;;  %2208 = vrot.lane.b32.xlu1 %v2174_v48, %s3737_s17 }
 0xab9   : > { %2240 = vperm.xlu1 %3634, %v4968_v52   ;;  %2244 = vperm.xlu0 %3635, %v4973_v17  }
 0xabd   : > { %2248 = vperm.xlu1 %3634, %v4980_v46   ;;  %3637 = vset.pattern.permute.xlu0 %v3763_v57 }
 0xac1   : > { %3636 = vset.pattern.permute.xlu1 %v3763_v57 }
 0xb13   : > { %v5416_v49 = vpop.permute.xlu1 %2188  ;;  %v5418_v22 = vpop.permute.xlu0 %2190 }
 0xb17   : > { %v5420_v60 = vpop.permute.xlu1 %2192  ;;  %v5422_v34 = vpop.permute.xlu0 %2194 }
 0xb1b   : > { %v5424_v1 = vpop.permute.xlu1 %2196  ;;  %v5426_v31 = vpop.permute.xlu0 %2198 }
 0xb1f   : > { %v5428_v26 = vpop.permute.xlu1 %2200  ;;  %v5430_v48 = vpop.permute.xlu0 %2202 }
 0xb20   : > { %7007 = vst [vmem:[#allocation103_spill] sm:$0xff] %v5430_v48 }
 0xb23   : > { %v5432_v39 = vpop.permute.xlu1 %2204  ;;  %v5434_v44 = vpop.permute.xlu0 %2206 }
 0xb24   : > { %7008 = vst [vmem:[#allocation122_spill] sm:$0xff] %v5432_v39  ;;  %7009 = vst [vmem:[#allocation121_spill] sm:$0xff] %v5434_v44 }
 0xb27   : > { %v5436_v57 = vpop.permute.xlu1 %2208  ;;  %v5438_v28 = vpop.permute.xlu0 %2210 }
 0xb28   : > { %7010 = vst [vmem:[#allocation118_spill] sm:$0xff] %v5436_v57  ;;  %7011 = vst [vmem:[#allocation117_spill] sm:$0xff] %v5438_v28 }
 0xb38   : > { %v2241_v32 = vpop.permute.xlu1 %2240  ;;  %v2245_v62 = vpop.permute.xlu0 %2244 }
 0xb39   : > { %v2252_v51 = vmul.f32 %v2241_v32, %v3909_v29  ;;  %v2251_v38 = vmul.f32 %v2241_v32, %v3911_v30  ;;  %v2254_v42 = vmul.f32 %v2241_v32, %v3917_v37  ;;  %v2253_v45 = vmul.f32 %v2241_v32, %v3921_v41 }
 0xb3a   : > { %v2256_v28 = vmul.f32 %v2245_v62, %v3926_v43  ;;  %v2255_v2 = vmul.f32 %v2245_v62, %v3930_v47 }
 0xb3b   : > { %2277 = vrot.lane.b32.xlu0 %v2252_v51, %s3739_s19  ;;  %2275 = vrot.lane.b32.xlu1 %v2251_v38, %s3739_s19  ;;  %v2258_v51 = vmul.f32 %v2245_v62, %v3940_v56  ;;  %v2257_v38 = vmul.f32 %v2245_v62, %v3943_v59  ;;  %v3764_v62 = vmov 18  }
 0xb3c   : > { %v2249_v35 = vpop.permute.xlu1 %2248 }
 0xb3d   : > { %v2260_v32 = vmul.f32 %v2249_v35, %v3953_v9 }
 0xb3f   : > { %2281 = vrot.lane.b32.xlu0 %v2254_v42, %s3739_s19  ;;  %2279 = vrot.lane.b32.xlu1 %v2253_v45, %s3739_s19  ;;  %v2259_v42 = vmul.f32 %v2249_v35, %v3957_v13 }
 0xb43   : > { %2285 = vrot.lane.b32.xlu0 %v2256_v28, %s3739_s19  ;;  %2283 = vrot.lane.b32.xlu1 %v2255_v2, %s3739_s19  ;;  %v2262_v28 = vmul.f32 %v2249_v35, %v3962_v19  ;;  %v2261_v2 = vmul.f32 %v2249_v35, %v3964_v20 }
 0xb47   : > { %2289 = vrot.lane.b32.xlu0 %v2258_v51, %s3739_s19  ;;  %2287 = vrot.lane.b32.xlu1 %v2257_v38, %s3739_s19 }
 0xb4b   : > { %2293 = vrot.lane.b32.xlu0 %v2260_v32, %s3739_s19  ;;  %2291 = vrot.lane.b32.xlu1 %v2259_v42, %s3739_s19 }
 0xb4f   : > { %2297 = vrot.lane.b32.xlu0 %v2262_v28, %s3739_s19  ;;  %2295 = vrot.lane.b32.xlu1 %v2261_v2, %s3739_s19 }
 0xb53   : > { %2327 = vperm.xlu1 %3636, %v4968_v52   ;;  %2331 = vperm.xlu0 %3637, %v4973_v17  }
 0xb57   : > { %2335 = vperm.xlu1 %3636, %v4980_v46   ;;  %3639 = vset.pattern.permute.xlu0 %v3764_v62 }
 0xb5b   : > { %3638 = vset.pattern.permute.xlu1 %v3764_v62 }
 0xbad   : > { %v5467_v45 = vpop.permute.xlu1 %2275  ;;  %v5469_v51 = vpop.permute.xlu0 %2277 }
 0xbae   : > { %7012 = vst [vmem:[#allocation123_spill] sm:$0xff] %v5467_v45  ;;  %7013 = vst [vmem:[#allocation124_spill] sm:$0xff] %v5469_v51 }
 0xbb1   : > { %v5471_v38 = vpop.permute.xlu1 %2279  ;;  %v5473_v35 = vpop.permute.xlu0 %2281 }
 0xbb2   : > { %7014 = vst [vmem:[#allocation126_spill] sm:$0xff] %v5471_v38  ;;  %7015 = vst [vmem:[#allocation125_spill] sm:$0xff] %v5473_v35 }
 0xbb5   : > { %v5475_v32 = vpop.permute.xlu1 %2283  ;;  %v5477_v42 = vpop.permute.xlu0 %2285 }
 0xbb6   : > { %7016 = vst [vmem:[#allocation104_spill] sm:$0xff] %v5475_v32  ;;  %7017 = vst [vmem:[#allocation119_spill] sm:$0xff] %v5477_v42 }
 0xbb9   : > { %v5479_v28 = vpop.permute.xlu1 %2287  ;;  %v5481_v2 = vpop.permute.xlu0 %2289 }
 0xbba   : > { %7018 = vst [vmem:[#allocation120_spill] sm:$0xff] %v5479_v28  ;;  %7019 = vst [vmem:[#allocation127_spill] sm:$0xff] %v5481_v2 }
 0xbbd   : > { %v5483_v61 = vpop.permute.xlu1 %2291  ;;  %v5485_v25 = vpop.permute.xlu0 %2293 }
 0xbbe   : > { %7020 = vst [vmem:[#allocation128_spill] sm:$0xff] %v5483_v61  ;;  %7021 = vst [vmem:[#allocation5_spill] sm:$0xff] %v5485_v25 }
 0xbc1   : > { %v5487_v62 = vpop.permute.xlu1 %2295  ;;  %v5489_v21 = vpop.permute.xlu0 %2297 }
 0xbc2   : > { %7022 = vst [vmem:[#allocation6_spill] sm:$0xff] %v5487_v62  ;;  %7023 = vst [vmem:[#allocation8_spill] sm:$0xff] %v5489_v21 }
 0xbd2   : > { %v2328_v5 = vpop.permute.xlu1 %2327  ;;  %v2332_v28 = vpop.permute.xlu0 %2331 }
 0xbd3   : > { %v2339_v0 = vmul.f32 %v2328_v5, %v3909_v29  ;;  %v2338_v35 = vmul.f32 %v2328_v5, %v3911_v30  ;;  %v2341_v2 = vmul.f32 %v2328_v5, %v3917_v37  ;;  %v2340_v61 = vmul.f32 %v2328_v5, %v3921_v41 }
 0xbd4   : > { %v2343_v21 = vmul.f32 %v2332_v28, %v3926_v43  ;;  %v2342_v62 = vmul.f32 %v2332_v28, %v3930_v47 }
 0xbd5   : > { %2364 = vrot.lane.b32.xlu0 %v2339_v0, %s3739_s19  ;;  %2362 = vrot.lane.b32.xlu1 %v2338_v35, %s3739_s19  ;;  %v2345_v0 = vmul.f32 %v2332_v28, %v3940_v56  ;;  %v2344_v35 = vmul.f32 %v2332_v28, %v3943_v59  ;;  %v3765_v28 = vmov 19  }
 0xbd6   : > { %v2336_v25 = vpop.permute.xlu1 %2335 }
 0xbd7   : > { %v2347_v5 = vmul.f32 %v2336_v25, %v3953_v9 }
 0xbd9   : > { %2368 = vrot.lane.b32.xlu0 %v2341_v2, %s3739_s19  ;;  %2366 = vrot.lane.b32.xlu1 %v2340_v61, %s3739_s19  ;;  %v2346_v61 = vmul.f32 %v2336_v25, %v3957_v13  ;;  %v2348_v2 = vmul.f32 %v2336_v25, %v3964_v20 }
 0xbdd   : > { %2372 = vrot.lane.b32.xlu0 %v2343_v21, %s3739_s19  ;;  %2370 = vrot.lane.b32.xlu1 %v2342_v62, %s3739_s19  ;;  %v2349_v21 = vmul.f32 %v2336_v25, %v3962_v19 }
 0xbe1   : > { %2376 = vrot.lane.b32.xlu0 %v2345_v0, %s3739_s19  ;;  %2374 = vrot.lane.b32.xlu1 %v2344_v35, %s3739_s19 }
 0xbe5   : > { %2380 = vrot.lane.b32.xlu0 %v2347_v5, %s3739_s19  ;;  %2378 = vrot.lane.b32.xlu1 %v2346_v61, %s3739_s19 }
 0xbe9   : > { %2384 = vrot.lane.b32.xlu0 %v2349_v21, %s3739_s19  ;;  %2382 = vrot.lane.b32.xlu1 %v2348_v2, %s3739_s19 }
 0xbed   : > { %2414 = vperm.xlu1 %3638, %v4968_v52   ;;  %2418 = vperm.xlu0 %3639, %v4973_v17  }
 0xbf1   : > { %2422 = vperm.xlu1 %3638, %v4980_v46   ;;  %3641 = vset.pattern.permute.xlu0 %v3765_v28 }
 0xbf5   : > { %3640 = vset.pattern.permute.xlu1 %v3765_v28 }
 0xc47   : > { %v5518_v62 = vpop.permute.xlu1 %2362  ;;  %v5520_v0 = vpop.permute.xlu0 %2364 }
 0xc4b   : > { %v5522_v35 = vpop.permute.xlu1 %2366  ;;  %v5524_v25 = vpop.permute.xlu0 %2368 }
 0xc4f   : > { %v5526_v5 = vpop.permute.xlu1 %2370  ;;  %v5528_v61 = vpop.permute.xlu0 %2372 }
 0xc53   : > { %v5530_v52 = vpop.permute.xlu1 %2374  ;;  %v5532_v17 = vpop.permute.xlu0 %2376 }
 0xc54   : > { %7024 = vst [vmem:[#allocation9_spill] sm:$0xff] %v5532_v17 }
 0xc57   : > { %v5534_v46 = vpop.permute.xlu1 %2378  ;;  %v5536_v21 = vpop.permute.xlu0 %2380 }
 0xc58   : > { %7025 = vst [vmem:[#allocation11_spill] sm:$0xff] %v5534_v46  ;;  %7026 = vst [vmem:[#allocation7_spill] sm:$0xff] %v5536_v21 }
 0xc5b   : > { %v5538_v2 = vpop.permute.xlu1 %2382  ;;  %v5540_v28 = vpop.permute.xlu0 %2384 }
 0xc5c   : > { %7027 = vst [vmem:[#allocation10_spill] sm:$0xff] %v5538_v2  ;;  %7028 = vst [vmem:[#allocation12_spill] sm:$0xff] %v5540_v28 }
 0xc6c   : > { %v2415_v32 = vpop.permute.xlu1 %2414  ;;  %v2419_v63 = vpop.permute.xlu0 %2418 }
 0xc6d   : > { %v2426_v42 = vmul.f32 %v2415_v32, %v3909_v29  ;;  %v2425_v38 = vmul.f32 %v2415_v32, %v3911_v30  ;;  %v2428_v7 = vmul.f32 %v2415_v32, %v3917_v37  ;;  %v2427_v33 = vmul.f32 %v2415_v32, %v3921_v41 }
 0xc6e   : > { %v2430_v28 = vmul.f32 %v2419_v63, %v3926_v43  ;;  %v2429_v18 = vmul.f32 %v2419_v63, %v3930_v47 }
 0xc6f   : > { %2451 = vrot.lane.b32.xlu0 %v2426_v42, %s3742_s20  ;;  %2449 = vrot.lane.b32.xlu1 %v2425_v38, %s3742_s20  ;;  %v2432_v42 = vmul.f32 %v2419_v63, %v3940_v56  ;;  %v2431_v38 = vmul.f32 %v2419_v63, %v3943_v59  ;;  %v5569_v63 = vld [vmem:[%s6577_s0] sm:$0xff] }
 0xc70   : > { %v2423_v45 = vpop.permute.xlu1 %2422 }
 0xc71   : > { %v2436_v32 = vmul.f32 %v2423_v45, %v3962_v19 }
 0xc73   : > { %2455 = vrot.lane.b32.xlu0 %v2428_v7, %s3742_s20  ;;  %2453 = vrot.lane.b32.xlu1 %v2427_v33, %s3742_s20  ;;  %v2434_v7 = vmul.f32 %v2423_v45, %v3953_v9  ;;  %v2433_v33 = vmul.f32 %v2423_v45, %v3957_v13 }
 0xc77   : > { %2459 = vrot.lane.b32.xlu0 %v2430_v28, %s3742_s20  ;;  %2457 = vrot.lane.b32.xlu1 %v2429_v18, %s3742_s20  ;;  %v2435_v18 = vmul.f32 %v2423_v45, %v3964_v20  ;;  %v5575_v28 = vld [vmem:[%s6577_s0 + $0x8] sm:$0xff]  ;;  %v5581_v45 = vld [vmem:[%s6577_s0 + $0x10] sm:$0xf] }
 0xc7b   : > { %2463 = vrot.lane.b32.xlu0 %v2432_v42, %s3742_s20  ;;  %2461 = vrot.lane.b32.xlu1 %v2431_v38, %s3742_s20  ;;  %v3766_v42 = vmov 22  }
 0xc7f   : > { %2467 = vrot.lane.b32.xlu0 %v2434_v7, %s3742_s20  ;;  %2465 = vrot.lane.b32.xlu1 %v2433_v33, %s3742_s20 }
 0xc83   : > { %2471 = vrot.lane.b32.xlu0 %v2436_v32, %s3742_s20  ;;  %2469 = vrot.lane.b32.xlu1 %v2435_v18, %s3742_s20 }
 0xc87   : > { %2501 = vperm.xlu1 %3640, %v5569_v63   ;;  %2505 = vperm.xlu0 %3641, %v5575_v28  }
 0xc8b   : > { %2509 = vperm.xlu1 %3640, %v5581_v45   ;;  %3643 = vset.pattern.permute.xlu0 %v3766_v42 }
 0xc8f   : > { %3642 = vset.pattern.permute.xlu1 %v3766_v42 }
 0xce1   : > { %v5584_v38 = vpop.permute.xlu1 %2449  ;;  %v5586_v7 = vpop.permute.xlu0 %2451 }
 0xce2   : > { %7029 = vst [vmem:[#allocation13_spill] sm:$0xff] %v5584_v38  ;;  %7030 = vst [vmem:[#allocation15_spill] sm:$0xff] %v5586_v7 }
 0xce5   : > { %v5588_v33 = vpop.permute.xlu1 %2453  ;;  %v5590_v32 = vpop.permute.xlu0 %2455 }
 0xce6   : > { %7031 = vst [vmem:[#allocation14_spill] sm:$0xff] %v5588_v33  ;;  %7032 = vst [vmem:[#allocation16_spill] sm:$0xff] %v5590_v32 }
 0xce9   : > { %v5592_v18 = vpop.permute.xlu1 %2457  ;;  %v5594_v51 = vpop.permute.xlu0 %2459 }
 0xcea   : > { %7033 = vst [vmem:[#allocation17_spill] sm:$0xff] %v5592_v18  ;;  %7034 = vst [vmem:[#allocation19_spill] sm:$0xff] %v5594_v51 }
 0xced   : > { %v5596_v12 = vpop.permute.xlu1 %2461  ;;  %v5598_v11 = vpop.permute.xlu0 %2463 }
 0xcee   : > { %7035 = vst [vmem:[#allocation18_spill] sm:$0xff] %v5596_v12  ;;  %7036 = vst [vmem:[#allocation21_spill] sm:$0xff] %v5598_v11 }
 0xcf1   : > { %v5600_v3 = vpop.permute.xlu1 %2465  ;;  %v5602_v8 = vpop.permute.xlu0 %2467 }
 0xcf2   : > { %7037 = vst [vmem:[#allocation20_spill] sm:$0xff] %v5600_v3  ;;  %7038 = vst [vmem:[#allocation22_spill] sm:$0xff] %v5602_v8 }
 0xcf5   : > { %v5604_v42 = vpop.permute.xlu1 %2469  ;;  %v5606_v38 = vpop.permute.xlu0 %2471 }
 0xcf6   : > { %7039 = vst [vmem:[#allocation23_spill] sm:$0xff] %v5604_v42  ;;  %7040 = vst [vmem:[#allocation25_spill] sm:$0xff] %v5606_v38 }
 0xd06   : > { %v2502_v7 = vpop.permute.xlu1 %2501  ;;  %v2506_v12 = vpop.permute.xlu0 %2505 }
 0xd07   : > { %v2513_v33 = vmul.f32 %v2502_v7, %v3909_v29  ;;  %v2512_v32 = vmul.f32 %v2502_v7, %v3911_v30  ;;  %v2515_v11 = vmul.f32 %v2502_v7, %v3917_v37  ;;  %v2514_v3 = vmul.f32 %v2502_v7, %v3921_v41 }
 0xd08   : > { %v2517_v38 = vmul.f32 %v2506_v12, %v3926_v43  ;;  %v2516_v42 = vmul.f32 %v2506_v12, %v3930_v47 }
 0xd09   : > { %2538 = vrot.lane.b32.xlu0 %v2513_v33, %s3742_s20  ;;  %2536 = vrot.lane.b32.xlu1 %v2512_v32, %s3742_s20  ;;  %v2519_v33 = vmul.f32 %v2506_v12, %v3940_v56  ;;  %v2518_v32 = vmul.f32 %v2506_v12, %v3943_v59  ;;  %v3767_v12 = vmov 23  }
 0xd0a   : > { %v2510_v8 = vpop.permute.xlu1 %2509 }
 0xd0b   : > { %v2522_v7 = vmul.f32 %v2510_v8, %v3964_v20 }
 0xd0d   : > { %2542 = vrot.lane.b32.xlu0 %v2515_v11, %s3742_s20  ;;  %2540 = vrot.lane.b32.xlu1 %v2514_v3, %s3742_s20  ;;  %v2521_v11 = vmul.f32 %v2510_v8, %v3953_v9  ;;  %v2520_v3 = vmul.f32 %v2510_v8, %v3957_v13 }
 0xd11   : > { %2546 = vrot.lane.b32.xlu0 %v2517_v38, %s3742_s20  ;;  %2544 = vrot.lane.b32.xlu1 %v2516_v42, %s3742_s20  ;;  %v2523_v38 = vmul.f32 %v2510_v8, %v3962_v19 }
 0xd15   : > { %2550 = vrot.lane.b32.xlu0 %v2519_v33, %s3742_s20  ;;  %2548 = vrot.lane.b32.xlu1 %v2518_v32, %s3742_s20 }
 0xd19   : > { %2554 = vrot.lane.b32.xlu0 %v2521_v11, %s3742_s20  ;;  %2552 = vrot.lane.b32.xlu1 %v2520_v3, %s3742_s20 }
 0xd1d   : > { %2558 = vrot.lane.b32.xlu0 %v2523_v38, %s3742_s20  ;;  %2556 = vrot.lane.b32.xlu1 %v2522_v7, %s3742_s20  ;;  %s3501_s20 = smul.u32 192, %s3816_s16  ;;  %s3402_s16 = scalar_lea.sflag [#allocation3], %s176_s7 }
 0xd21   : > { %2588 = vperm.xlu1 %3642, %v5569_v63   ;;  %2592 = vperm.xlu0 %3643, %v5575_v28  }
 0xd25   : > { %2596 = vperm.xlu1 %3642, %v5581_v45   ;;  %3645 = vset.pattern.permute.xlu0 %v3767_v12 }
 0xd29   : > { %3644 = vset.pattern.permute.xlu1 %v3767_v12 }
 0xd7b   : > { %v5635_v42 = vpop.permute.xlu1 %2536  ;;  %v5637_v33 = vpop.permute.xlu0 %2538 }
 0xd7f   : > { %v5639_v32 = vpop.permute.xlu1 %2540  ;;  %v5641_v8 = vpop.permute.xlu0 %2542 }
 0xd83   : > { %v5643_v11 = vpop.permute.xlu1 %2544  ;;  %v5645_v3 = vpop.permute.xlu0 %2546 }
 0xd87   : > { %v5647_v38 = vpop.permute.xlu1 %2548  ;;  %v5649_v7 = vpop.permute.xlu0 %2550 }
 0xd88   : > { %7041 = vst [vmem:[#allocation24_spill] sm:$0xff] %v5647_v38  ;;  %7042 = vst [vmem:[#allocation26_spill] sm:$0xff] %v5649_v7 }
 0xd8b   : > { %v5651_v18 = vpop.permute.xlu1 %2552  ;;  %v5653_v51 = vpop.permute.xlu0 %2554 }
 0xd8c   : > { %7043 = vst [vmem:[#allocation27_spill] sm:$0xff] %v5651_v18  ;;  %7044 = vst [vmem:[#allocation29_spill] sm:$0xff] %v5653_v51 }
 0xd8f   : > { %v5655_v12 = vpop.permute.xlu1 %2556  ;;  %v5657_v6 = vpop.permute.xlu0 %2558 }
 0xd90   : > { %7045 = vst [vmem:[#allocation28_spill] sm:$0xff] %v5655_v12  ;;  %7046 = vst [vmem:[#allocation30_spill] sm:$0xff] %v5657_v6 }
 0xda0   : > { %v2589_v24 = vpop.permute.xlu1 %2588  ;;  %v2593_v21 = vpop.permute.xlu0 %2592 }
 0xda1   : > { %v2600_v2 = vmul.f32 %v2589_v24, %v3909_v29  ;;  %v2599_v46 = vmul.f32 %v2589_v24, %v3911_v30  ;;  %v2602_v7 = vmul.f32 %v2589_v24, %v3917_v37  ;;  %v2601_v18 = vmul.f32 %v2589_v24, %v3921_v41 }
 0xda2   : > { %v2604_v6 = vmul.f32 %v2593_v21, %v3926_v43  ;;  %v2603_v12 = vmul.f32 %v2593_v21, %v3930_v47 }
 0xda3   : > { %2625 = vrot.lane.b32.xlu0 %v2600_v2, %s3745_s24  ;;  %2623 = vrot.lane.b32.xlu1 %v2599_v46, %s3745_s24  ;;  %v2606_v2 = vmul.f32 %v2593_v21, %v3940_v56  ;;  %v2605_v46 = vmul.f32 %v2593_v21, %v3943_v59  ;;  %v3768_v21 = vmov 26  }
 0xda4   : > { %v2597_v51 = vpop.permute.xlu1 %2596 }
 0xda5   : > { %v2608_v24 = vmul.f32 %v2597_v51, %v3953_v9 }
 0xda7   : > { %2629 = vrot.lane.b32.xlu0 %v2602_v7, %s3745_s24  ;;  %2627 = vrot.lane.b32.xlu1 %v2601_v18, %s3745_s24  ;;  %v2607_v18 = vmul.f32 %v2597_v51, %v3957_v13  ;;  %v2609_v7 = vmul.f32 %v2597_v51, %v3964_v20 }
 0xdab   : > { %2633 = vrot.lane.b32.xlu0 %v2604_v6, %s3745_s24  ;;  %2631 = vrot.lane.b32.xlu1 %v2603_v12, %s3745_s24  ;;  %v2610_v6 = vmul.f32 %v2597_v51, %v3962_v19 }
 0xdaf   : > { %2637 = vrot.lane.b32.xlu0 %v2606_v2, %s3745_s24  ;;  %2635 = vrot.lane.b32.xlu1 %v2605_v46, %s3745_s24 }
 0xdb3   : > { %2641 = vrot.lane.b32.xlu0 %v2608_v24, %s3745_s24  ;;  %2639 = vrot.lane.b32.xlu1 %v2607_v18, %s3745_s24 }
 0xdb7   : > { %2645 = vrot.lane.b32.xlu0 %v2610_v6, %s3745_s24  ;;  %2643 = vrot.lane.b32.xlu1 %v2609_v7, %s3745_s24 }
 0xdbb   : > { %2675 = vperm.xlu1 %3644, %v5569_v63   ;;  %2679 = vperm.xlu0 %3645, %v5575_v28  }
 0xdbf   : > { %2683 = vperm.xlu1 %3644, %v5581_v45   ;;  %3647 = vset.pattern.permute.xlu0 %v3768_v21 }
 0xdc3   : > { %3646 = vset.pattern.permute.xlu1 %v3768_v21 }
 0xe15   : > { %v5686_v12 = vpop.permute.xlu1 %2623  ;;  %v5688_v2 = vpop.permute.xlu0 %2625 }
 0xe16   : > { %7047 = vst [vmem:[#allocation31_spill] sm:$0xff] %v5686_v12  ;;  %7048 = vst [vmem:[#allocation34_spill] sm:$0xff] %v5688_v2 }
 0xe19   : > { %v5690_v46 = vpop.permute.xlu1 %2627  ;;  %v5692_v51 = vpop.permute.xlu0 %2629 }
 0xe1a   : > { %7049 = vst [vmem:[#allocation33_spill] sm:$0xff] %v5690_v46  ;;  %7050 = vst [vmem:[#allocation35_spill] sm:$0xff] %v5692_v51 }
 0xe1d   : > { %v5694_v24 = vpop.permute.xlu1 %2631  ;;  %v5696_v18 = vpop.permute.xlu0 %2633 }
 0xe1e   : > { %7051 = vst [vmem:[#allocation36_spill] sm:$0xff] %v5694_v24  ;;  %7052 = vst [vmem:[#allocation38_spill] sm:$0xff] %v5696_v18 }
 0xe21   : > { %v5698_v6 = vpop.permute.xlu1 %2635  ;;  %v5700_v7 = vpop.permute.xlu0 %2637 }
 0xe22   : > { %7053 = vst [vmem:[#allocation37_spill] sm:$0xff] %v5698_v6  ;;  %7054 = vst [vmem:[#allocation39_spill] sm:$0xff] %v5700_v7 }
 0xe25   : > { %v5702_v57 = vpop.permute.xlu1 %2639  ;;  %v5704_v39 = vpop.permute.xlu0 %2641 }
 0xe26   : > { %7055 = vst [vmem:[#allocation40_spill] sm:$0xff] %v5702_v57  ;;  %7056 = vst [vmem:[#allocation42_spill] sm:$0xff] %v5704_v39 }
 0xe29   : > { %v5706_v21 = vpop.permute.xlu1 %2643  ;;  %v5708_v12 = vpop.permute.xlu0 %2645 }
 0xe2a   : > { %7057 = vst [vmem:[#allocation41_spill] sm:$0xff] %v5706_v21  ;;  %7058 = vst [vmem:[#allocation43_spill] sm:$0xff] %v5708_v12 }
 0xe3a   : > { %v2676_v2 = vpop.permute.xlu1 %2675  ;;  %v2680_v6 = vpop.permute.xlu0 %2679 }
 0xe3b   : > { %v2687_v46 = vmul.f32 %v2676_v2, %v3909_v29  ;;  %v2686_v51 = vmul.f32 %v2676_v2, %v3911_v30  ;;  %v2689_v7 = vmul.f32 %v2676_v2, %v3917_v37  ;;  %v2688_v57 = vmul.f32 %v2676_v2, %v3921_v41 }
 0xe3c   : > { %v2690_v12 = vmul.f32 %v2680_v6, %v3930_v47  ;;  %v2691_v21 = vmul.f32 %v2680_v6, %v3926_v43 }
 0xe3d   : > { %2712 = vrot.lane.b32.xlu0 %v2687_v46, %s3745_s24  ;;  %2710 = vrot.lane.b32.xlu1 %v2686_v51, %s3745_s24  ;;  %v2692_v46 = vmul.f32 %v2680_v6, %v3943_v59  ;;  %v2693_v51 = vmul.f32 %v2680_v6, %v3940_v56  ;;  %v3769_v6 = vmov 27  }
 0xe3e   : > { %v2684_v39 = vpop.permute.xlu1 %2683 }
 0xe3f   : > { %v2695_v2 = vmul.f32 %v2684_v39, %v3953_v9 }
 0xe41   : > { %2716 = vrot.lane.b32.xlu0 %v2689_v7, %s3745_s24  ;;  %2714 = vrot.lane.b32.xlu1 %v2688_v57, %s3745_s24  ;;  %v2694_v57 = vmul.f32 %v2684_v39, %v3957_v13  ;;  %v2697_v7 = vmul.f32 %v2684_v39, %v3962_v19 }
 0xe45   : > { %2720 = vrot.lane.b32.xlu0 %v2691_v21, %s3745_s24  ;;  %2718 = vrot.lane.b32.xlu1 %v2690_v12, %s3745_s24  ;;  %v2696_v12 = vmul.f32 %v2684_v39, %v3964_v20 }
 0xe49   : > { %2724 = vrot.lane.b32.xlu0 %v2693_v51, %s3745_s24  ;;  %2722 = vrot.lane.b32.xlu1 %v2692_v46, %s3745_s24 }
 0xe4d   : > { %2728 = vrot.lane.b32.xlu0 %v2695_v2, %s3745_s24  ;;  %2726 = vrot.lane.b32.xlu1 %v2694_v57, %s3745_s24 }
 0xe51   : > { %2732 = vrot.lane.b32.xlu0 %v2697_v7, %s3745_s24  ;;  %2730 = vrot.lane.b32.xlu1 %v2696_v12, %s3745_s24  ;;  %s3416_s24 = sshll.u32 %s4948_s9, 4  ;;  %s6532_s24 = int_to_ptr.vmem [resolvable:$true] %s3416_s24 }
 0xe52   : > { %s3665_s25 = scalar_lea.vmem %s6532_s24, 192  ;;  %p3672_p0 = scmp.lt.s32.totalorder %s6532_s24, %s3670_s27 }
 0xe53   : > { %p3666_p11 = scmp.ne.s32.totalorder %s6532_s24, %s3665_s25  ;;  %p3673_p1 = scmp.lt.s32.totalorder %s3671_s28, %s3665_s25 }
 0xe55   : > { %2762 = vperm.xlu1 %3646, %v5569_v63   ;;  %2766 = vperm.xlu0 %3647, %v5575_v28   ;;  %p3667_p12 = pnand %p3666_p11, %p3833_p5  ;;  %p3674_p2 = por %p3673_p1, %p3672_p0 }
 0xe57   : > { %p3668_p13 = pneg %p3667_p12 }
 0xe59   : > { %2770 = vperm.xlu1 %3646, %v5581_v45   ;;  %3649 = vset.pattern.permute.xlu0 %v3769_v6  ;;  %p3675_p3 = pnand %p3674_p2, %p3668_p13 }
 0xe5d   : > { %3648 = vset.pattern.permute.xlu1 %v3769_v6 }
 0xeaf   : > { %v5737_v21 = vpop.permute.xlu0 %2712  ;;  %v5739_v46 = vpop.permute.xlu1 %2710 }
 0xeb3   : > { %v5741_v51 = vpop.permute.xlu0 %2716  ;;  %v5743_v39 = vpop.permute.xlu1 %2714 }
 0xeb7   : > { %v5745_v2 = vpop.permute.xlu0 %2720  ;;  %v5747_v57 = vpop.permute.xlu1 %2718 }
 0xebb   : > { %v5749_v7 = vpop.permute.xlu0 %2724  ;;  %v5751_v12 = vpop.permute.xlu1 %2722 }
 0xebc   : > { %7059 = vst [vmem:[#allocation44_spill] sm:$0xff] %v5749_v7  ;;  %7060 = vst [vmem:[#allocation58_spill] sm:$0xff] %v5751_v12 }
 0xebf   : > { %v5753_v24 = vpop.permute.xlu0 %2728  ;;  %v5755_v18 = vpop.permute.xlu1 %2726 }
 0xec0   : > { %7061 = vst [vmem:[#allocation57_spill] sm:$0xff] %v5753_v24  ;;  %7062 = vst [vmem:[#allocation59_spill] sm:$0xff] %v5755_v18 }
 0xec3   : > { %v2733_v6 = vpop.permute.xlu0 %2732  ;;  %v2731_v44 = vpop.permute.xlu1 %2730 }
 0xec4   : > { %v5759_v50 = vsel %vm1063_vm4, %v5753_v24, %v2731_v44  ;;  %v5762_v17 = vsel %vm1063_vm4, %v2731_v44, %v2733_v6 }
 0xec5   : > { %7063 = vst [vmem:[#allocation60_spill] sm:$0xff] %v5759_v50  ;;  %7064 = vst [vmem:[#allocation62_spill] sm:$0xff] %v5762_v17 }
 0xed4   : > { %v2763_v10 = vpop.permute.xlu1 %2762  ;;  %v2767_v23 = vpop.permute.xlu0 %2766 }
 0xed5   : > { %v2773_v53 = vmul.f32 %v2763_v10, %v3911_v30  ;;  %v2774_v7 = vmul.f32 %v2763_v10, %v3909_v29  ;;  %v2775_v18 = vmul.f32 %v2763_v10, %v3921_v41  ;;  %v2776_v48 = vmul.f32 %v2763_v10, %v3917_v37 }
 0xed6   : > { %v2777_v44 = vmul.f32 %v2767_v23, %v3930_v47  ;;  %v2778_v6 = vmul.f32 %v2767_v23, %v3926_v43 }
 0xed7   : > { %2799 = vrot.lane.b32.xlu0 %v2774_v7, %s3748_s4  ;;  %2797 = vrot.lane.b32.xlu1 %v2773_v53, %s3748_s4  ;;  %v2779_v7 = vmul.f32 %v2767_v23, %v3943_v59  ;;  %v2780_v53 = vmul.f32 %v2767_v23, %v3940_v56  ;;  %v3770_v23 = vmov 30  }
 0xed8   : > { %v2771_v17 = vpop.permute.xlu1 %2770 }
 0xed9   : > { %v2781_v10 = vmul.f32 %v2771_v17, %v3957_v13 }
 0xedb   : > { %2803 = vrot.lane.b32.xlu0 %v2776_v48, %s3748_s4  ;;  %2801 = vrot.lane.b32.xlu1 %v2775_v18, %s3748_s4  ;;  %v2782_v48 = vmul.f32 %v2771_v17, %v3953_v9  ;;  %v2783_v18 = vmul.f32 %v2771_v17, %v3964_v20 }
 0xedf   : > { %2807 = vrot.lane.b32.xlu0 %v2778_v6, %s3748_s4  ;;  %2805 = vrot.lane.b32.xlu1 %v2777_v44, %s3748_s4  ;;  %v2784_v44 = vmul.f32 %v2771_v17, %v3962_v19 }
 0xee3   : > { %2811 = vrot.lane.b32.xlu0 %v2780_v53, %s3748_s4  ;;  %2809 = vrot.lane.b32.xlu1 %v2779_v7, %s3748_s4 }
 0xee7   : > { %2815 = vrot.lane.b32.xlu0 %v2782_v48, %s3748_s4  ;;  %2813 = vrot.lane.b32.xlu1 %v2781_v10, %s3748_s4 }
 0xeeb   : > { %2819 = vrot.lane.b32.xlu0 %v2784_v44, %s3748_s4  ;;  %2817 = vrot.lane.b32.xlu1 %v2783_v18, %s3748_s4 }
 0xeef   : > { %2849 = vperm.xlu1 %3648, %v5569_v63   ;;  %2853 = vperm.xlu0 %3649, %v5575_v28  }
 0xef3   : > { %2857 = vperm.xlu1 %3648, %v5581_v45   ;;  %3651 = vset.pattern.permute.xlu0 %v3770_v23 }
 0xef7   : > { %3650 = vset.pattern.permute.xlu1 %v3770_v23 }
 0xf49   : > { %v2800_v6 = vpop.permute.xlu0 %2799  ;;  %v2798_v7 = vpop.permute.xlu1 %2797 }
 0xf4a   : > { %v5792_v53 = vsel %vm1238_vm5, %v2798_v7, %v2800_v6 }
 0xf4b   : > { %7065 = vst [vmem:[#allocation61_spill] sm:$0xff] %v5792_v53 }
 0xf4d   : > { %v2804_v10 = vpop.permute.xlu0 %2803  ;;  %v2802_v17 = vpop.permute.xlu1 %2801 }
 0xf4e   : > { %v5795_v48 = vsel %vm1238_vm5, %v2800_v6, %v2802_v17  ;;  %v5798_v18 = vsel %vm1238_vm5, %v2802_v17, %v2804_v10 }
 0xf4f   : > { %7066 = vst [vmem:[#allocation63_spill] sm:$0xff] %v5798_v18 }
 0xf51   : > { %v2808_v44 = vpop.permute.xlu0 %2807  ;;  %v2806_v50 = vpop.permute.xlu1 %2805 }
 0xf52   : > { %v5801_v24 = vsel %vm1238_vm5, %v2806_v50, %v2808_v44 }
 0xf53   : > { %7067 = vst [vmem:[#allocation64_spill] sm:$0xff] %v5801_v24 }
 0xf55   : > { %v2812_v15 = vpop.permute.xlu0 %2811  ;;  %v2810_v23 = vpop.permute.xlu1 %2809 }
 0xf56   : > { %v5804_v12 = vsel %vm1238_vm5, %v2808_v44, %v2810_v23  ;;  %v5807_v7 = vsel %vm1238_vm5, %v2810_v23, %v2812_v15 }
 0xf57   : > { %7068 = vst [vmem:[#allocation66_spill] sm:$0xff] %v5804_v12 }
 0xf59   : > { %v2816_v53 = vpop.permute.xlu0 %2815  ;;  %v2814_v38 = vpop.permute.xlu1 %2813 }
 0xf5a   : > { %v5810_v6 = vsel %vm1238_vm5, %v2814_v38, %v2816_v53 }
 0xf5d   : > { %v2820_v10 = vpop.permute.xlu0 %2819  ;;  %v2818_v17 = vpop.permute.xlu1 %2817 }
 0xf5e   : > { %v5813_v18 = vsel %vm1238_vm5, %v2816_v53, %v2818_v17  ;;  %v5816_v50 = vsel %vm1238_vm5, %v2818_v17, %v2820_v10  ;;  %v3773_v17 = vmov 35  }
 0xf5f   : > { %7069 = vst [vmem:[#allocation65_spill] sm:$0xff] %v5816_v50 }
 0xf6e   : > { %v2850_v24 = vpop.permute.xlu1 %2849  ;;  %v2854_v15 = vpop.permute.xlu0 %2853 }
 0xf6f   : > { %v2860_v44 = vmul.f32 %v2850_v24, %v3911_v30  ;;  %v2861_v12 = vmul.f32 %v2850_v24, %v3909_v29  ;;  %v2862_v38 = vmul.f32 %v2850_v24, %v3921_v41  ;;  %v2863_v23 = vmul.f32 %v2850_v24, %v3917_v37 }
 0xf70   : > { %v2864_v53 = vmul.f32 %v2854_v15, %v3930_v47  ;;  %v2865_v10 = vmul.f32 %v2854_v15, %v3926_v43  ;;  %v3772_v24 = vmov 34  }
 0xf71   : > { %2886 = vrot.lane.b32.xlu0 %v2861_v12, %s3748_s4  ;;  %2884 = vrot.lane.b32.xlu1 %v2860_v44, %s3748_s4  ;;  %v3771_v12 = vmov 31   ;;  %v2866_v44 = vmul.f32 %v2854_v15, %v3943_v59 }
 0xf75   : > { %2890 = vrot.lane.b32.xlu0 %v2863_v23, %s3748_s4  ;;  %2888 = vrot.lane.b32.xlu1 %v2862_v38, %s3748_s4  ;;  %v2858_v38 = vpop.permute.xlu1 %2857 }
 0xf76   : > { %v2868_v23 = vmul.f32 %v2858_v38, %v3957_v13 }
 0xf79   : > { %2894 = vrot.lane.b32.xlu0 %v2865_v10, %s3748_s4  ;;  %2892 = vrot.lane.b32.xlu1 %v2864_v53, %s3748_s4  ;;  %v2870_v53 = vmul.f32 %v2858_v38, %v3964_v20  ;;  %v2867_v10 = vmul.f32 %v2854_v15, %v3940_v56 }
 0xf7d   : > { %2940 = vperm.xlu0 %3651, %v5575_v28   ;;  %2936 = vperm.xlu1 %3650, %v5569_v63  }
 0xf81   : > { %2944 = vperm.xlu0 %3651, %v5581_v45   ;;  %3652 = vset.pattern.permute.xlu1 %v3771_v12  ;;  %v2038_v12 = vsel %vm363_vm0, %v5314_v4, %v5316_v16  ;;  %v2386_v4 = vsel %vm713_vm2, %v5518_v62, %v5520_v0 }
 0xf82   : > { %3023 = vperm.xlu1 %3652, %v5569_v63  }
 0xf85   : > { %3653 = vset.pattern.permute.xlu0 %v3772_v24 }
 0xf86   : > { %3110 = vperm.xlu0 %3653, %v5569_v63   ;;  %3027 = vperm.xlu1 %3652, %v5575_v28  }
 0xf8a   : > { %3656 = vset.pattern.permute.xlu0 %v3773_v17  ;;  %3031 = vperm.xlu1 %3652, %v5581_v45  }
 0xf8b   : > { %3201 = vperm.xlu0 %3656, %v5575_v28  }
 0xf8e   : > { %3654 = vset.pattern.permute.xlu1 %v3772_v24 }
 0xf8f   : > { %2896 = vrot.lane.b32.xlu0 %v2866_v44, %s3748_s4  ;;  %3114 = vperm.xlu1 %3654, %v5575_v28   ;;  %v2869_v28 = vmul.f32 %v2858_v38, %v3953_v9  ;;  %v2040_v44 = vsel %vm363_vm0, %v5318_v36, %v5320_v40 }
 0xf93   : > { %3655 = vset.pattern.permute.xlu1 %v3773_v17  ;;  %2900 = vrot.lane.b32.xlu0 %v2868_v23, %s3748_s4  ;;  %v1875_v23 = vmul.f32 %v5224_v54, %v3921_v41 }
 0xf94   : > { %3197 = vperm.xlu1 %3655, %v5569_v63   ;;  %v2871_v63 = vmul.f32 %v2858_v38, %v3962_v19  ;;  %v1874_v38 = vmul.f32 %v5224_v54, %v3909_v29 }
 0xf95   : > { %v2058_v62 = vadd.f32 %v2040_v44, %v1875_v23  ;;  %v2389_v44 = vsel %vm713_vm2, %v5526_v5, %v5528_v61 }
 0xf97   : > { %2904 = vrot.lane.b32.xlu0 %v2870_v53, %s3748_s4  ;;  %v2213_v53 = vsel %vm538_vm1, %v5418_v22, %v5420_v60 }
 0xf98   : > { %3657 = vset.pattern.permute.xlu1 %v3772_v24  ;;  %v1873_v24 = vmul.f32 %v5224_v54, %v3911_v30  ;;  %v2041_v54 = vsel %vm363_vm0, %v5322_v27, %v5324_v58  ;;  %v2215_v27 = vsel %vm538_vm1, %v5424_v1, %v5426_v31  ;;  %v2735_v1 = vsel %vm1063_vm4, %v5737_v21, %v5743_v39 }
 0xf99   : > { %3118 = vperm.xlu1 %3657, %v5581_v45  }
 0xf9a   : > { %v2056_v15 = vadd.f32 %v2038_v12, %v1873_v24 }
 0xf9d   : > { %3658 = vset.pattern.permute.xlu1 %v3773_v17  ;;  %v2039_v17 = vsel %vm363_vm0, %v5316_v16, %v5318_v36  ;;  %v2214_v16 = vsel %vm538_vm1, %v5420_v60, %v5422_v34  ;;  %v2560_v36 = vsel %vm888_vm3, %v5635_v42, %v5637_v33  ;;  %v2734_v60 = vsel %vm1063_vm4, %v5739_v46, %v5737_v21 }
 0xf9e   : > { %3205 = vperm.xlu1 %3658, %v5581_v45   ;;  %v2212_v45 = vsel %vm538_vm1, %v5416_v49, %v5418_v22  ;;  %v2057_v40 = vadd.f32 %v2039_v17, %v1874_v38  ;;  %v2388_v22 = vsel %vm713_vm2, %v5522_v35, %v5524_v25  ;;  %v1876_v34 = vmul.f32 %v5234_v55, %v3930_v47 }
 0xf9f   : > { %v2230_v49 = vadd.f32 %v2212_v45, %v2056_v15 }
 0xfa0   : > { %v2231_v42 = vadd.f32 %v2213_v53, %v2057_v40  ;;  %v2059_v25 = vadd.f32 %v2041_v54, %v1876_v34 }
 0xfa2   : > { %2898 = vrot.lane.b32.xlu1 %v2867_v10, %s3748_s4  ;;  %v2404_v10 = vadd.f32 %v2386_v4, %v2230_v49  ;;  %v2563_v49 = vsel %vm888_vm3, %v5643_v11, %v5645_v3 }
 0xfa4   : > { %v2578_v12 = vadd.f32 %v2560_v36, %v2404_v10 }
 0xfa6   : > { %2902 = vrot.lane.b32.xlu1 %v2869_v28, %s3748_s4  ;;  %v2387_v28 = vsel %vm713_vm2, %v5520_v0, %v5522_v35  ;;  %v2561_v0 = vsel %vm888_vm3, %v5637_v33, %v5639_v32  ;;  %v2562_v35 = vsel %vm888_vm3, %v5639_v32, %v5641_v8  ;;  %v2752_v45 = vadd.f32 %v2734_v60, %v2578_v12 }
 0xfa7   : > { %v2405_v46 = vadd.f32 %v2387_v28, %v2231_v42  ;;  %v2736_v33 = vsel %vm1063_vm4, %v5743_v39, %v5741_v51  ;;  %v2233_v8 = vadd.f32 %v2215_v27, %v2059_v25  ;;  %v2737_v51 = vsel %vm1063_vm4, %v5747_v57, %v5745_v2 }
 0xfa9   : > { %v2579_v4 = vadd.f32 %v2561_v0, %v2405_v46  ;;  %v2407_v5 = vadd.f32 %v2389_v44, %v2233_v8  ;;  %v2042_v46 = vsel %vm363_vm0, %v5324_v58, %v5326_v14 }
 0xfaa   : > { %2906 = vrot.lane.b32.xlu1 %v2871_v63, %s3748_s4  ;;  %v2232_v63 = vadd.f32 %v2214_v16, %v2058_v62 }
 0xfab   : > { %v2753_v53 = vadd.f32 %v2735_v1, %v2579_v4  ;;  %v2581_v62 = vadd.f32 %v2563_v49, %v2407_v5  ;;  %v7070_v4 = vld [vmem:[#allocation24_spill] sm:$0xff] }
 0xfac   : > { %v2406_v24 = vadd.f32 %v2388_v22, %v2232_v63 }
 0xfad   : > { %v2755_v28 = vadd.f32 %v2737_v51, %v2581_v62 }
 0xfae   : > { %v2580_v38 = vadd.f32 %v2562_v35, %v2406_v24  ;;  %v1877_v24 = vmul.f32 %v5234_v55, %v3926_v43 }
 0xfb0   : > { %v2754_v16 = vadd.f32 %v2736_v33, %v2580_v38  ;;  %v2060_v44 = vadd.f32 %v2042_v46, %v1877_v24  ;;  %v2390_v33 = vsel %vm713_vm2, %v5528_v61, %v5530_v52  ;;  %v2564_v38 = vsel %vm888_vm3, %v5645_v3, %v7070_v4  ;;  %v7071_v61 = vld [vmem:[#allocation58_spill] sm:$0xff]  ;;  %v7073_v46 = vld [vmem:[#allocation103_spill] sm:$0xff] }
 0xfb1   : > { %v2217_v24 = vsel %vm538_vm1, %v5428_v26, %v7073_v46 }
 0xfe3   : > { %v2887_v15 = vpop.permute.xlu0 %2886  ;;  %v2885_v17 = vpop.permute.xlu1 %2884 }
 0xfe4   : > { %v2908_v32 = vsel %vm1238_vm5, %v2885_v17, %v2887_v15 }
 0xfe5   : > { %v5917_v23 = vadd.f32 %v2908_v32, %v2752_v45  ;;  %v2216_v45 = vsel %vm538_vm1, %v5426_v31, %v5428_v26 }
 0xfe6   : > { %v2234_v32 = vadd.f32 %v2216_v45, %v2060_v44  ;;  %v7074_v44 = vld [vmem:[#allocation76_spill] sm:$0xff] }
 0xfe7   : > { %v2891_v36 = vpop.permute.xlu0 %2890  ;;  %v2889_v21 = vpop.permute.xlu1 %2888 }
 0xfe8   : > { %v2909_v39 = vsel %vm1238_vm5, %v2887_v15, %v2889_v21  ;;  %v2910_v40 = vsel %vm1238_vm5, %v2889_v21, %v2891_v36  ;;  %v2408_v49 = vadd.f32 %v2390_v33, %v2234_v32  ;;  %v7076_v33 = vld [vmem:[#allocation78_spill] sm:$0xff] }
 0xfe9   : > { %v5927_v10 = vadd.f32 %v2909_v39, %v2753_v53  ;;  %v5929_v54 = vadd.f32 %v2910_v40, %v2754_v16  ;;  %v2738_v16 = vsel %vm1063_vm4, %v5745_v2, %v7071_v61  ;;  %v2045_v32 = vsel %vm363_vm0, %v7074_v44, %v7076_v33 }
 0xfea   : > { %v2582_v36 = vadd.f32 %v2564_v38, %v2408_v49  ;;  %v7078_v38 = vld [vmem:[#allocation50_spill] sm:$0xff] }
 0xfeb   : > { %v2895_v11 = vpop.permute.xlu0 %2894  ;;  %v2893_v22 = vpop.permute.xlu1 %2892  ;;  %v1880_v49 = vmul.f32 %v7078_v38, %v3953_v9 }
 0xfec   : > { %v2911_v60 = vsel %vm1238_vm5, %v2893_v22, %v2895_v11  ;;  %v2756_v21 = vadd.f32 %v2738_v16, %v2582_v36  ;;  %v1879_v16 = vmul.f32 %v7078_v38, %v3957_v13 }
 0xfed   : > { %v5932_v34 = vadd.f32 %v2911_v60, %v2755_v28 }
 0xffc   : > { %v5934_v42 = vpop.permute.xlu0 %2940  ;;  %v5936_v63 = vpop.permute.xlu1 %2936 }
 0xffd   : > { %v2947_v57 = vmul.f32 %v5936_v63, %v3911_v30  ;;  %v2948_v12 = vmul.f32 %v5936_v63, %v3909_v29  ;;  %v2951_v27 = vmul.f32 %v5934_v42, %v3930_v47  ;;  %v2949_v25 = vmul.f32 %v5936_v63, %v3921_v41 }
 0xffe   : > { %v2952_v1 = vmul.f32 %v5934_v42, %v3926_v43  ;;  %v2953_v58 = vmul.f32 %v5934_v42, %v3943_v59 }
 0xfff   : > { %2973 = vrot.lane.b32.xlu1 %v2948_v12, %s3751_s5  ;;  %2971 = vrot.lane.b32.xlu0 %v2947_v57, %s3751_s5  ;;  %v7072_v57 = vld [vmem:[#allocation73_spill] sm:$0xff] }
0x1000   : > { %v5946_v0 = vpop.permute.xlu0 %2944 }
0x1001   : > { %v5948_v35 = vpop.permute.xlu1 %3023  ;;  %v2955_v12 = vmul.f32 %v5946_v0, %v3957_v13  ;;  %v2957_v26 = vmul.f32 %v5946_v0, %v3964_v20 }
0x1002   : > { %v3034_v8 = vmul.f32 %v5948_v35, %v3911_v30  ;;  %v3035_v31 = vmul.f32 %v5948_v35, %v3909_v29  ;;  %v3036_v51 = vmul.f32 %v5948_v35, %v3921_v41 }
0x1003   : > { %2979 = vrot.lane.b32.xlu1 %v2951_v27, %s3751_s5  ;;  %2975 = vrot.lane.b32.xlu0 %v2949_v25, %s3751_s5  ;;  %v2956_v27 = vmul.f32 %v5946_v0, %v3953_v9  ;;  %v1878_v25 = vmul.f32 %v5234_v55, %v3943_v59  ;;  %v7077_v55 = vld [vmem:[#allocation9_spill] sm:$0xff] }
0x1005   : > { %v5962_v15 = vpop.permute.xlu1 %3027  ;;  %v5964_v17 = vpop.permute.xlu0 %3110 }
0x1006   : > { %v3038_v3 = vmul.f32 %v5962_v15, %v3930_v47  ;;  %v3039_v2 = vmul.f32 %v5962_v15, %v3926_v43  ;;  %v3040_v22 = vmul.f32 %v5962_v15, %v3943_v59 }
0x1007   : > { %2983 = vrot.lane.b32.xlu1 %v2953_v58, %s3751_s5  ;;  %2981 = vrot.lane.b32.xlu0 %v2952_v1, %s3751_s5  ;;  %v7075_v1 = vld [vmem:[#allocation75_spill] sm:$0xff] }
0x1008   : > { %v2044_v58 = vsel %vm363_vm0, %v7075_v1, %v7074_v44  ;;  %v7086_v1 = vld [vmem:[#allocation44_spill] sm:$0xff] }
0x1009   : > { %v5982_v5 = vpop.permute.xlu1 %3031 }
0x100a   : > { %v5984_v53 = vpop.permute.xlu0 %3201 }
0x100b   : > { %3060 = vrot.lane.b32.xlu1 %v3035_v31, %s3751_s5  ;;  %3058 = vrot.lane.b32.xlu0 %v3034_v8, %s3751_s5  ;;  %v2391_v8 = vsel %vm713_vm2, %v5530_v52, %v7077_v55  ;;  %v3042_v31 = vmul.f32 %v5982_v5, %v3957_v13  ;;  %v3043_v55 = vmul.f32 %v5982_v5, %v3953_v9 }
0x100e   : > { %v2897_v39 = vpop.permute.xlu0 %2896  ;;  %v5995_v40 = vpop.permute.xlu1 %3114 }
0x100f   : > { %v2912_v62 = vsel %vm1238_vm5, %v2895_v11, %v2897_v39  ;;  %3062 = vrot.lane.b32.xlu0 %v3036_v51, %s3751_s5  ;;  %3066 = vrot.lane.b32.xlu1 %v3038_v3, %s3751_s5  ;;  %v2043_v11 = vsel %vm363_vm0, %v5326_v14, %v7072_v57  ;;  %v7080_v51 = vld [vmem:[#allocation122_spill] sm:$0xff]  ;;  %v2062_v57 = vadd.f32 %v2044_v58, %v1879_v16  ;;  %v7088_v16 = vld [vmem:[#allocation27_spill] sm:$0xff] }
0x1010   : > { %v5998_v28 = vadd.f32 %v2912_v62, %v2756_v21  ;;  %v2061_v14 = vadd.f32 %v2043_v11, %v1878_v25  ;;  %v7079_v21 = vld [vmem:[#allocation121_spill] sm:$0xff]  ;;  %v7081_v62 = vld [vmem:[#allocation118_spill] sm:$0xff]  ;;  %v2063_v11 = vadd.f32 %v2045_v32, %v1880_v49  ;;  %v7084_v25 = vld [vmem:[#allocation11_spill] sm:$0xff]  ;;  %v3044_v58 = vmul.f32 %v5982_v5, %v3964_v20 }
0x1011   : > { %v2218_v3 = vsel %vm538_vm1, %v7080_v51, %v7079_v21  ;;  %v2219_v52 = vsel %vm538_vm1, %v7079_v21, %v7081_v62  ;;  %v7087_v49 = vld [vmem:[#allocation29_spill] sm:$0xff]  ;;  %v7089_v21 = vld [vmem:[#allocation28_spill] sm:$0xff] }
0x1012   : > { %v2235_v36 = vadd.f32 %v2217_v24, %v2061_v14  ;;  %v7085_v14 = vld [vmem:[#allocation10_spill] sm:$0xff]  ;;  %v2236_v32 = vadd.f32 %v2218_v3, %v2062_v57  ;;  %v2567_v51 = vsel %vm888_vm3, %v7087_v49, %v7089_v21  ;;  %v7090_v3 = vld [vmem:[#allocation57_spill] sm:$0xff]  ;;  %v2954_v57 = vmul.f32 %v5934_v42, %v3940_v56 }
0x1013   : > { %v6006_v60 = vpop.permute.xlu1 %3197  ;;  %3068 = vrot.lane.b32.xlu0 %v3039_v2, %s3751_s5  ;;  %3070 = vrot.lane.b32.xlu1 %v3040_v22, %s3751_s5  ;;  %v7082_v2 = vld [vmem:[#allocation26_spill] sm:$0xff]  ;;  %v3037_v42 = vmul.f32 %v5948_v35, %v3917_v37  ;;  %v3125_v35 = vmul.f32 %v5995_v40, %v3930_v47 }
0x1014   : > { %v2565_v22 = vsel %vm888_vm3, %v7070_v4, %v7082_v2  ;;  %v2739_v4 = vsel %vm1063_vm4, %v7071_v61, %v7086_v1 }
0x1017   : > { %2987 = vrot.lane.b32.xlu0 %v2955_v12, %s3751_s5  ;;  %2989 = vrot.lane.b32.xlu1 %v2956_v27, %s3751_s5  ;;  %v2409_v12 = vadd.f32 %v2391_v8, %v2235_v36  ;;  %v7083_v27 = vld [vmem:[#allocation7_spill] sm:$0xff]  ;;  %v2237_v8 = vadd.f32 %v2219_v52, %v2063_v11  ;;  %v2566_v36 = vsel %vm888_vm3, %v7088_v16, %v7087_v49 }
0x1018   : > { %v6024_v45 = vpop.permute.xlu1 %3118  ;;  %v2392_v46 = vsel %vm713_vm2, %v7084_v25, %v7083_v27  ;;  %v2393_v44 = vsel %vm713_vm2, %v7083_v27, %v7085_v14  ;;  %v7091_v52 = vld [vmem:[#allocation59_spill] sm:$0xff]  ;;  %v2950_v11 = vmul.f32 %v5936_v63, %v3917_v37  ;;  %v3041_v63 = vmul.f32 %v5962_v15, %v3940_v56 }
0x1019   : > { %v2410_v61 = vadd.f32 %v2392_v46, %v2236_v32  ;;  %v2411_v2 = vadd.f32 %v2393_v44, %v2237_v8  ;;  %v7092_v44 = vld [vmem:[#allocation60_spill] sm:$0xff]  ;;  %v3123_v15 = vmul.f32 %v5964_v17, %v3921_v41 }
0x101b   : > { %2991 = vrot.lane.b32.xlu0 %v2957_v26, %s3751_s5  ;;  %3074 = vrot.lane.b32.xlu1 %v3042_v31, %s3751_s5  ;;  %v2583_v26 = vadd.f32 %v2565_v22, %v2409_v12  ;;  %v2901_v31 = vpop.permute.xlu0 %2900  ;;  %v2740_v22 = vsel %vm1063_vm4, %v7091_v52, %v7090_v3  ;;  %v2584_v1 = vadd.f32 %v2566_v36, %v2410_v61 }
0x101c   : > { %v3121_v36 = vmul.f32 %v5964_v17, %v3911_v30  ;;  %v3127_v61 = vmul.f32 %v5995_v40, %v3943_v59  ;;  %v3210_v3 = vmul.f32 %v6006_v60, %v3921_v41  ;;  %v3213_v52 = vmul.f32 %v5984_v53, %v3926_v43 }
0x101d   : > { %v6057_v24 = vpop.permute.xlu1 %3205  ;;  %v2757_v27 = vadd.f32 %v2739_v4, %v2583_v26  ;;  %v2758_v46 = vadd.f32 %v2740_v22, %v2584_v1  ;;  %v3214_v22 = vmul.f32 %v5984_v53, %v3943_v59  ;;  %v3130_v1 = vmul.f32 %v6024_v45, %v3953_v9 }
0x101f   : > { %3076 = vrot.lane.b32.xlu0 %v3043_v55, %s3751_s5  ;;  %3078 = vrot.lane.b32.xlu1 %v3044_v58, %s3751_s5  ;;  %v2585_v55 = vadd.f32 %v2567_v51, %v2411_v2  ;;  %v6090_v58 = vpop.permute.xlu0 %2904  ;;  %v3122_v51 = vmul.f32 %v5964_v17, %v3909_v29  ;;  %v3208_v2 = vmul.f32 %v6006_v60, %v3911_v30 }
0x1021   : > { %v2899_v25 = vpop.permute.xlu1 %2898  ;;  %v2759_v4 = vadd.f32 %v7092_v44, %v2585_v55  ;;  %v3216_v55 = vmul.f32 %v6057_v24, %v3957_v13  ;;  %v3124_v44 = vmul.f32 %v5964_v17, %v3917_v37  ;;  %v3132_v17 = vmul.f32 %v6024_v45, %v3962_v19 }
0x1022   : > { %v2913_v12 = vsel %vm1238_vm5, %v2897_v39, %v2899_v25  ;;  %v3212_v25 = vmul.f32 %v5984_v53, %v3930_v47 }
0x1023   : > { %v6085_v49 = vadd.f32 %v2913_v12, %v2757_v27  ;;  %2977 = vrot.lane.b32.xlu0 %v2950_v11, %s3751_s5  ;;  %2985 = vrot.lane.b32.xlu1 %v2954_v57, %s3751_s5  ;;  %v3209_v27 = vmul.f32 %v6006_v60, %v3909_v29  ;;  %v2958_v57 = vmul.f32 %v5946_v0, %v3962_v19 }
0x1024   : > { %v3045_v11 = vmul.f32 %v5982_v5, %v3962_v19  ;;  %v3129_v12 = vmul.f32 %v6024_v45, %v3957_v13  ;;  %v3131_v0 = vmul.f32 %v6024_v45, %v3964_v20  ;;  %v3217_v5 = vmul.f32 %v6057_v24, %v3953_v9  ;;  %v7098_v45 = vld [vmem:[#allocation52_spill] sm:$0xff] }
0x1025   : > { %v2903_v32 = vpop.permute.xlu1 %2902 }
0x1026   : > { %v2914_v39 = vsel %vm1238_vm5, %v2901_v31, %v2903_v32  ;;  %v2915_v8 = vsel %vm1238_vm5, %v2903_v32, %v6090_v58  ;;  %v3126_v31 = vmul.f32 %v5995_v40, %v3926_v43  ;;  %v3215_v32 = vmul.f32 %v5984_v53, %v3940_v56 }
0x1027   : > { %v6099_v26 = vadd.f32 %v2914_v39, %v2758_v46  ;;  %v6101_v16 = vadd.f32 %v2915_v8, %v2759_v4  ;;  %3064 = vrot.lane.b32.xlu0 %v3037_v42, %s3751_s5  ;;  %3072 = vrot.lane.b32.xlu1 %v3041_v63, %s3751_s5  ;;  %v3218_v46 = vmul.f32 %v6057_v24, %v3964_v20  ;;  %v7093_v63 = vld [vmem:[#allocation51_spill] sm:$0xff]  ;;  %v7094_v39 = vld [vmem:[#allocation49_spill] sm:$0xff] }
0x1028   : > { %v3128_v4 = vmul.f32 %v5995_v40, %v3940_v56  ;;  %v3211_v42 = vmul.f32 %v6006_v60, %v3917_v37  ;;  %v3219_v40 = vmul.f32 %v6057_v24, %v3962_v19  ;;  %v1951_v56 = vsel %vm363_vm0, %v7094_v39, %v7093_v63  ;;  %v7095_v37 = vld [vmem:[#allocation45_spill] sm:$0xff]  ;;  %v7096_v60 = vld [vmem:[#allocation80_spill] sm:$0xff]  ;;  %v7097_v8 = vld [vmem:[#allocation79_spill] sm:$0xff] }
0x1029   : > { %v1843_v53 = vmul.f32 %v7095_v37, %v3911_v30  ;;  %v1952_v19 = vsel %vm363_vm0, %v7093_v63, %v7098_v45  ;;  %v7099_v24 = vld [vmem:[#allocation124_spill] sm:$0xff]  ;;  %v6221_v63 = vpop.permute.xlu1 %2906 }
0x102a   : > { %v7111_v39 = vld [vmem:[#allocation96_spill] sm:$0xff] }
0x102b   : > { %3145 = vrot.lane.b32.xlu0 %v3121_v36, %s3754_s6  ;;  %3147 = vrot.lane.b32.xlu1 %v3122_v51, %s3754_s6  ;;  %v2125_v36 = vsel %vm538_vm1, %v7097_v8, %v7096_v60  ;;  %v1969_v51 = vadd.f32 %v1951_v56, %v1843_v53  ;;  %v7112_v56 = vld [vmem:[#allocation95_spill] sm:$0xff] }
0x102c   : > { %v2128_v53 = vsel %vm538_vm1, %v7112_v56, %v7111_v39 }
0x102f   : > { %3149 = vrot.lane.b32.xlu0 %v3123_v15, %s3754_s6  ;;  %3153 = vrot.lane.b32.xlu1 %v3125_v35, %s3754_s6  ;;  %v7100_v35 = vld [vmem:[#allocation123_spill] sm:$0xff] }
0x1030   : > { %v2299_v15 = vsel %vm713_vm2, %v7100_v35, %v7099_v24  ;;  %v7115_v35 = vld [vmem:[#allocation119_spill] sm:$0xff] }
0x1033   : > { %3155 = vrot.lane.b32.xlu0 %v3126_v31, %s3754_s6  ;;  %3157 = vrot.lane.b32.xlu1 %v3127_v61, %s3754_s6  ;;  %v1844_v31 = vmul.f32 %v7095_v37, %v3909_v29  ;;  %v2143_v61 = vadd.f32 %v2125_v36, %v1969_v51  ;;  %v7107_v29 = vld [vmem:[#allocation126_spill] sm:$0xff] }
0x1034   : > { %v7114_v36 = vld [vmem:[#allocation14_spill] sm:$0xff] }
0x1037   : > { %3234 = vrot.lane.b32.xlu1 %v3209_v27, %s3754_s6  ;;  %3232 = vrot.lane.b32.xlu0 %v3208_v2, %s3754_s6  ;;  %v7101_v2 = vld [vmem:[#allocation94_spill] sm:$0xff]  ;;  %v7102_v27 = vld [vmem:[#allocation15_spill] sm:$0xff] }
0x1038   : > { %v2126_v30 = vsel %vm538_vm1, %v7096_v60, %v7101_v2  ;;  %v7113_v60 = vld [vmem:[#allocation98_spill] sm:$0xff]  ;;  %v2474_v51 = vsel %vm888_vm3, %v7102_v27, %v7114_v36 }
0x1039   : > { %v2129_v8 = vsel %vm538_vm1, %v7111_v39, %v7113_v60 }
0x103b   : > { %3240 = vrot.lane.b32.xlu1 %v3212_v25, %s3754_s6  ;;  %3236 = vrot.lane.b32.xlu0 %v3210_v3, %s3754_s6  ;;  %v7103_v25 = vld [vmem:[#allocation13_spill] sm:$0xff] }
0x103c   : > { %v2473_v3 = vsel %vm888_vm3, %v7103_v25, %v7102_v27  ;;  %v7118_v25 = vld [vmem:[#allocation33_spill] sm:$0xff] }
0x103d   : > { %v7119_v27 = vld [vmem:[#allocation61_spill] sm:$0xff] }
0x103f   : > { %3244 = vrot.lane.b32.xlu1 %v3214_v22, %s3754_s6  ;;  %3242 = vrot.lane.b32.xlu0 %v3213_v52, %s3754_s6  ;;  %v1970_v52 = vadd.f32 %v1952_v19, %v1844_v31  ;;  %v2317_v22 = vadd.f32 %v2299_v15, %v2143_v61  ;;  %v7116_v15 = vld [vmem:[#allocation104_spill] sm:$0xff] }
0x1040   : > { %v2302_v31 = vsel %vm713_vm2, %v7116_v15, %v7115_v35  ;;  %v7117_v61 = vld [vmem:[#allocation120_spill] sm:$0xff] }
0x1043   : > { %3080 = vrot.lane.b32.xlu1 %v3045_v11, %s3751_s5  ;;  %2993 = vrot.lane.b32.xlu0 %v2958_v57, %s3751_s5  ;;  %v7104_v57 = vld [vmem:[#allocation55_spill] sm:$0xff]  ;;  %v7105_v11 = vld [vmem:[#allocation53_spill] sm:$0xff] }
0x1047   : > { %3163 = vrot.lane.b32.xlu1 %v3130_v1, %s3754_s6  ;;  %3161 = vrot.lane.b32.xlu0 %v3129_v12, %s3754_s6  ;;  %v1954_v12 = vsel %vm363_vm0, %v7105_v11, %v7104_v57  ;;  %v7106_v1 = vld [vmem:[#allocation56_spill] sm:$0xff] }
0x104b   : > { %3165 = vrot.lane.b32.xlu0 %v3131_v0, %s3754_s6  ;;  %3248 = vrot.lane.b32.xlu1 %v3216_v55, %s3754_s6  ;;  %v1955_v55 = vsel %vm363_vm0, %v7104_v57, %v7106_v1  ;;  %v2300_v0 = vsel %vm713_vm2, %v7099_v24, %v7107_v29 }
0x104f   : > { %3250 = vrot.lane.b32.xlu0 %v3217_v5, %s3754_s6  ;;  %3252 = vrot.lane.b32.xlu1 %v3218_v46, %s3754_s6  ;;  %v7108_v5 = vld [vmem:[#allocation34_spill] sm:$0xff]  ;;  %v7109_v46 = vld [vmem:[#allocation31_spill] sm:$0xff] }
0x1053   : > { %3151 = vrot.lane.b32.xlu0 %v3124_v44, %s3754_s6  ;;  %3159 = vrot.lane.b32.xlu1 %v3128_v4, %s3754_s6  ;;  %v2647_v44 = vsel %vm1063_vm4, %v7109_v46, %v7108_v5  ;;  %v7110_v4 = vld [vmem:[#allocation48_spill] sm:$0xff]  ;;  %v7121_v46 = vld [vmem:[#allocation17_spill] sm:$0xff] }
0x1057   : > { %3238 = vrot.lane.b32.xlu0 %v3211_v42, %s3754_s6  ;;  %3246 = vrot.lane.b32.xlu1 %v3215_v32, %s3754_s6  ;;  %v1847_v32 = vmul.f32 %v7110_v4, %v3926_v43  ;;  %v1846_v42 = vmul.f32 %v7110_v4, %v3930_v47 }
0x1059   : > { %v1972_v43 = vadd.f32 %v1954_v12, %v1846_v42  ;;  %v1973_v19 = vadd.f32 %v1955_v55, %v1847_v32  ;;  %v7122_v32 = vld [vmem:[#allocation18_spill] sm:$0xff] }
0x105b   : > { %3167 = vrot.lane.b32.xlu0 %v3132_v17, %s3754_s6  ;;  %3254 = vrot.lane.b32.xlu1 %v3219_v40, %s3754_s6  ;;  %v2144_v17 = vadd.f32 %v2126_v30, %v1970_v52  ;;  %v2491_v40 = vadd.f32 %v2473_v3, %v2317_v22  ;;  %v2303_v30 = vsel %vm713_vm2, %v7115_v35, %v7117_v61  ;;  %s6530_s6 = scalar_lea.hbm %s6580_s3, %s3501_s20 }
0x105c   : > { %v2648_v3 = vsel %vm1063_vm4, %v7108_v5, %v7118_v25  ;;  %v2146_v52 = vadd.f32 %v2128_v53, %v1972_v43  ;;  %v2147_v22 = vadd.f32 %v2129_v8, %v1973_v19  ;;  %v7123_v53 = vld [vmem:[#allocation38_spill] sm:$0xff]  ;;  %v7124_v8 = vld [vmem:[#allocation36_spill] sm:$0xff]  ;;  %v7125_v43 = vld [vmem:[#allocation37_spill] sm:$0xff] }
0x105d   : > { %v2318_v24 = vadd.f32 %v2300_v0, %v2144_v17  ;;  %v2665_v47 = vadd.f32 %v2647_v44, %v2491_v40  ;;  %v7120_v0 = vld [vmem:[#allocation19_spill] sm:$0xff]  ;;  %v2651_v19 = vsel %vm1063_vm4, %v7123_v53, %v7125_v43 }
0x105e   : > { %v2476_v44 = vsel %vm888_vm3, %v7121_v46, %v7120_v0  ;;  %v2477_v42 = vsel %vm888_vm3, %v7120_v0, %v7122_v32  ;;  %v2320_v40 = vadd.f32 %v2302_v31, %v2146_v52  ;;  %v2321_v39 = vadd.f32 %v2303_v30, %v2147_v22  ;;  %v7126_v22 = vld [vmem:[#allocation64_spill] sm:$0xff] }
0x105f   : > { %v2492_v57 = vadd.f32 %v2474_v51, %v2318_v24  ;;  %v2839_v11 = vadd.f32 %v7119_v27, %v2665_v47  ;;  %v2650_v51 = vsel %vm1063_vm4, %v7124_v8, %v7123_v53 }
0x1060   : > { %v2494_v24 = vadd.f32 %v2476_v44, %v2320_v40  ;;  %v2495_v47 = vadd.f32 %v2477_v42, %v2321_v39  ;;  %v7129_v40 = vld [vmem:[#allocation69_spill] sm:$0xff] }
0x1061   : > { %v2666_v5 = vadd.f32 %v2648_v3, %v2492_v57 }
0x1062   : > { %v2668_v30 = vadd.f32 %v2650_v51, %v2494_v24  ;;  %v2669_v3 = vadd.f32 %v2651_v19, %v2495_v47  ;;  %v7131_v19 = vld [vmem:[#allocation100_spill] sm:$0xff]  ;;  %v7132_v24 = vld [vmem:[#allocation99_spill] sm:$0xff] }
0x1063   : > { %v2840_v35 = vadd.f32 %v5795_v48, %v2666_v5  ;;  %v7130_v5 = vld [vmem:[#allocation47_spill] sm:$0xff]  ;;  %v2131_v47 = vsel %vm538_vm1, %v7132_v24, %v7131_v19 }
0x1064   : > { %v2842_v57 = vadd.f32 %v7126_v22, %v2668_v30  ;;  %v1849_v53 = vmul.f32 %v7130_v5, %v3957_v13  ;;  %v7133_v30 = vld [vmem:[#allocation5_spill] sm:$0xff]  ;;  %v7135_v13 = vld [vmem:[#allocation22_spill] sm:$0xff] }
0x1071   : > { %v2972_v12 = vpop.permute.xlu0 %2971  ;;  %v2974_v55 = vpop.permute.xlu1 %2973 }
0x1072   : > { %v2995_v17 = vsel %vm1413_vm6, %v2972_v12, %v2974_v55 }
0x1073   : > { %v6249_v56 = vadd.f32 %v2995_v17, %v2839_v11  ;;  %v7127_v11 = vld [vmem:[#allocation66_spill] sm:$0xff] }
0x1074   : > { %v2843_v12 = vadd.f32 %v7127_v11, %v2669_v3  ;;  %v7134_v3 = vld [vmem:[#allocation128_spill] sm:$0xff] }
0x1075   : > { %v6258_v15 = vpop.permute.xlu0 %2975  ;;  %v2980_v27 = vpop.permute.xlu1 %2979  ;;  %v2305_v22 = vsel %vm713_vm2, %v7134_v3, %v7133_v30 }
0x1076   : > { %v2996_v31 = vsel %vm1413_vm6, %v2974_v55, %v6258_v15  ;;  %v7128_v55 = vld [vmem:[#allocation71_spill] sm:$0xff] }
0x1077   : > { %v6262_v52 = vadd.f32 %v2996_v31, %v2840_v35  ;;  %v1957_v39 = vsel %vm363_vm0, %v7129_v40, %v7128_v55 }
0x1079   : > { %v2982_v0 = vpop.permute.xlu0 %2981  ;;  %v6266_v46 = vpop.permute.xlu1 %2983 }
0x107a   : > { %v2998_v44 = vsel %vm1413_vm6, %v2980_v27, %v2982_v0  ;;  %v2999_v48 = vsel %vm1413_vm6, %v2982_v0, %v6266_v46  ;;  %v1975_v27 = vadd.f32 %v1957_v39, %v1849_v53  ;;  %v7136_v0 = vld [vmem:[#allocation20_spill] sm:$0xff]  ;;  %v7137_v39 = vld [vmem:[#allocation42_spill] sm:$0xff] }
0x107b   : > { %v6271_v42 = vadd.f32 %v2998_v44, %v2842_v57  ;;  %v6273_v17 = vadd.f32 %v2999_v48, %v2843_v12  ;;  %v2479_v44 = vsel %vm888_vm3, %v7136_v0, %v7135_v13 }
0x107c   : > { %v2149_v57 = vadd.f32 %v2131_v47, %v1975_v27 }
0x107d   : > { %v3059_v8 = vpop.permute.xlu0 %3058  ;;  %v3061_v51 = vpop.permute.xlu1 %3060 }
0x107e   : > { %v3082_v35 = vsel %vm1413_vm6, %v3059_v8, %v3061_v51  ;;  %v2323_v40 = vadd.f32 %v2305_v22, %v2149_v57  ;;  %v7140_v57 = vld [vmem:[#allocation70_spill] sm:$0xff] }
0x107f   : > { %v6285_v31 = vadd.f32 %v3082_v35, %v5917_v23  ;;  %v7138_v23 = vld [vmem:[#allocation40_spill] sm:$0xff] }
0x1080   : > { %v2653_v53 = vsel %vm1063_vm4, %v7138_v23, %v7137_v39  ;;  %v2497_v24 = vadd.f32 %v2479_v44, %v2323_v40  ;;  %v1956_v44 = vsel %vm363_vm0, %v7106_v1, %v7140_v57  ;;  %v7146_v57 = vld [vmem:[#allocation21_spill] sm:$0xff] }
0x1081   : > { %v3063_v11 = vpop.permute.xlu0 %3062  ;;  %v3067_v12 = vpop.permute.xlu1 %3066 }
0x1082   : > { %v3083_v48 = vsel %vm1413_vm6, %v3061_v51, %v3063_v11  ;;  %v2671_v50 = vadd.f32 %v2653_v53, %v2497_v24 }
0x1083   : > { %v6295_v8 = vadd.f32 %v3083_v48, %v5927_v10  ;;  %v7139_v10 = vld [vmem:[#allocation54_spill] sm:$0xff]  ;;  %v1848_v48 = vmul.f32 %v7110_v4, %v3943_v59  ;;  %v7143_v59 = vld [vmem:[#allocation125_spill] sm:$0xff] }
0x1084   : > { %v1953_v22 = vsel %vm363_vm0, %v7098_v45, %v7139_v10  ;;  %v7142_v45 = vld [vmem:[#allocation97_spill] sm:$0xff]  ;;  %v7145_v10 = vld [vmem:[#allocation16_spill] sm:$0xff] }
0x1085   : > { %v3069_v35 = vpop.permute.xlu0 %3068  ;;  %v3071_v3 = vpop.permute.xlu1 %3070  ;;  %v2130_v24 = vsel %vm538_vm1, %v7113_v60, %v7142_v45 }
0x1086   : > { %v3085_v47 = vsel %vm1413_vm6, %v3067_v12, %v3069_v35  ;;  %v3086_v27 = vsel %vm1413_vm6, %v3069_v35, %v3071_v3  ;;  %v1845_v12 = vmul.f32 %v7095_v37, %v3921_v41  ;;  %v1974_v37 = vadd.f32 %v1956_v44, %v1848_v48  ;;  %v7147_v48 = vld [vmem:[#allocation35_spill] sm:$0xff] }
0x1087   : > { %v6303_v0 = vadd.f32 %v3085_v47, %v5932_v34  ;;  %v6306_v51 = vadd.f32 %v3086_v27, %v5998_v28  ;;  %v2845_v34 = vadd.f32 %v5810_v6, %v2671_v50  ;;  %v7141_v28 = vld [vmem:[#allocation93_spill] sm:$0xff]  ;;  %v2301_v6 = vsel %vm713_vm2, %v7107_v29, %v7143_v59  ;;  %v7144_v50 = vld [vmem:[#allocation127_spill] sm:$0xff] }
0x1088   : > { %v2127_v53 = vsel %vm538_vm1, %v7101_v2, %v7141_v28  ;;  %v1971_v41 = vadd.f32 %v1953_v22, %v1845_v12  ;;  %v2304_v4 = vsel %vm713_vm2, %v7117_v61, %v7144_v50  ;;  %v2148_v47 = vadd.f32 %v2130_v24, %v1974_v37 }
0x1089   : > { %v2988_v40 = vpop.permute.xlu0 %2987  ;;  %v6319_v23 = vpop.permute.xlu1 %2989  ;;  %v2475_v22 = vsel %vm888_vm3, %v7114_v36, %v7145_v10  ;;  %v2478_v44 = vsel %vm888_vm3, %v7122_v32, %v7146_v57  ;;  %v2649_v61 = vsel %vm1063_vm4, %v7118_v25, %v7147_v48 }
0x108a   : > { %v3001_v1 = vsel %vm1413_vm6, %v2988_v40, %v6319_v23  ;;  %v2145_v2 = vadd.f32 %v2127_v53, %v1971_v41  ;;  %v2322_v29 = vadd.f32 %v2304_v4, %v2148_v47  ;;  %v7149_v41 = vld [vmem:[#allocation63_spill] sm:$0xff] }
0x108b   : > { %v6329_v35 = vadd.f32 %v3001_v1, %v2845_v34  ;;  %v7148_v34 = vld [vmem:[#allocation39_spill] sm:$0xff] }
0x108c   : > { %v2319_v12 = vadd.f32 %v2301_v6, %v2145_v2  ;;  %v2652_v40 = vsel %vm1063_vm4, %v7125_v43, %v7148_v34  ;;  %v2496_v53 = vadd.f32 %v2478_v44, %v2322_v29 }
0x108d   : > { %v6337_v27 = vpop.permute.xlu0 %2991  ;;  %v6339_v60 = vpop.permute.xlu1 %3074 }
0x108e   : > { %v2493_v28 = vadd.f32 %v2475_v22, %v2319_v12  ;;  %v2670_v1 = vadd.f32 %v2652_v40, %v2496_v53 }
0x1090   : > { %v2667_v36 = vadd.f32 %v2649_v61, %v2493_v28  ;;  %v2844_v37 = vadd.f32 %v5807_v7, %v2670_v1 }
0x1091   : > { %v6353_v45 = vpop.permute.xlu0 %3076  ;;  %v6355_v24 = vpop.permute.xlu1 %3078 }
0x1092   : > { %v2841_v32 = vadd.f32 %v7149_v41, %v2667_v36 }
0x1095   : > { %v2978_v59 = vpop.permute.xlu0 %2977  ;;  %v2986_v6 = vpop.permute.xlu1 %2985 }
0x1096   : > { %v2997_v25 = vsel %vm1413_vm6, %v6258_v15, %v2978_v59  ;;  %v3000_v43 = vsel %vm1413_vm6, %v6266_v46, %v2986_v6 }
0x1097   : > { %v6363_v50 = vadd.f32 %v2997_v25, %v2841_v32  ;;  %v6365_v4 = vadd.f32 %v3000_v43, %v2844_v37  ;;  %v7150_v32 = vld [vmem:[#allocation72_spill] sm:$0xff] }
0x1098   : > { %v1958_v37 = vsel %vm363_vm0, %v7128_v55, %v7150_v32 }
0x1099   : > { %v3065_v2 = vpop.permute.xlu0 %3064  ;;  %v3073_v47 = vpop.permute.xlu1 %3072 }
0x109a   : > { %v3084_v10 = vsel %vm1413_vm6, %v3063_v11, %v3065_v2  ;;  %v3087_v22 = vsel %vm1413_vm6, %v3071_v3, %v3073_v47 }
0x109b   : > { %v6370_v7 = vadd.f32 %v3084_v10, %v5929_v54  ;;  %v6373_v57 = vadd.f32 %v3087_v22, %v6085_v49  ;;  %v7152_v10 = vld [vmem:[#allocation6_spill] sm:$0xff] }
0x109c   : > { %v2306_v22 = vsel %vm713_vm2, %v7133_v30, %v7152_v10 }
0x109d   : > { %v3146_v15 = vpop.permute.xlu0 %3145  ;;  %v3148_v44 = vpop.permute.xlu1 %3147 }
0x109e   : > { %v3169_v29 = vsel %vm1588_vm7, %v3146_v15, %v3148_v44 }
0x109f   : > { %v3187_v49 = vadd.f32 %v3169_v29, %v6249_v56  ;;  %v1850_v56 = vmul.f32 %v7130_v5, %v3953_v9 }
0x10a1   : > { %v6375_v12 = vpop.permute.xlu0 %3149  ;;  %v3154_v46 = vpop.permute.xlu1 %3153 }
0x10a2   : > { %v3170_v48 = vsel %vm1588_vm7, %v3148_v44, %v6375_v12 }
0x10a3   : > { %v3188_v34 = vadd.f32 %v3170_v48, %v6262_v52  ;;  %v7151_v52 = vld [vmem:[#allocation102_spill] sm:$0xff]  ;;  %v7153_v48 = vld [vmem:[#allocation23_spill] sm:$0xff] }
0x10a5   : > { %v3156_v61 = vpop.permute.xlu0 %3155  ;;  %v6380_v11 = vpop.permute.xlu1 %3157 }
0x10a6   : > { %v3172_v3 = vsel %vm1588_vm7, %v3154_v46, %v3156_v61  ;;  %v3173_v54 = vsel %vm1588_vm7, %v3156_v61, %v6380_v11  ;;  %v2480_v61 = vsel %vm888_vm3, %v7135_v13, %v7153_v48  ;;  %v1851_v13 = vmul.f32 %v7130_v5, %v3964_v20 }
0x10a7   : > { %v3190_v40 = vadd.f32 %v3172_v3, %v6271_v42  ;;  %v3191_v28 = vadd.f32 %v3173_v54, %v6273_v17  ;;  %v2132_v42 = vsel %vm538_vm1, %v7131_v19, %v7151_v52  ;;  %v1976_v17 = vadd.f32 %v1958_v37, %v1850_v56  ;;  %v7157_v37 = vld [vmem:[#allocation101_spill] sm:$0xff] }
0x10a8   : > { %v3002_v5 = vsel %vm1413_vm6, %v6319_v23, %v6337_v27 }
0x10a9   : > { %v3283_v53 = vadd.f32 %v3190_v40, %v3187_v49  ;;  %v6389_v36 = vadd.f32 %v3191_v28, %v3188_v34  ;;  %v3233_v1 = vpop.permute.xlu0 %3232  ;;  %v3235_v41 = vpop.permute.xlu1 %3234  ;;  %v2150_v55 = vadd.f32 %v2132_v42, %v1976_v17  ;;  %v7156_v28 = vld [vmem:[#allocation77_spill] sm:$0xff] }
0x10aa   : > { %v3256_v25 = vsel %vm1588_vm7, %v3233_v1, %v3235_v41  ;;  %v2046_v1 = vsel %vm363_vm0, %v7076_v33, %v7156_v28 }
0x10ab   : > { %v3274_v19 = vadd.f32 %v3256_v25, %v6285_v31  ;;  %v2324_v3 = vadd.f32 %v2306_v22, %v2150_v55  ;;  %v7154_v31 = vld [vmem:[#allocation41_spill] sm:$0xff] }
0x10ad   : > { %v6394_v59 = vpop.permute.xlu0 %3236  ;;  %v3241_v6 = vpop.permute.xlu1 %3240  ;;  %v2498_v40 = vadd.f32 %v2480_v61, %v2324_v3  ;;  %v7161_v3 = vld [vmem:[#allocation25_spill] sm:$0xff] }
0x10ae   : > { %v3257_v43 = vsel %vm1588_vm7, %v3235_v41, %v6394_v59  ;;  %v1881_v41 = vmul.f32 %v7078_v38, %v3964_v20 }
0x10af   : > { %v3275_v44 = vadd.f32 %v3257_v43, %v6295_v8  ;;  %v2654_v8 = vsel %vm1063_vm4, %v7137_v39, %v7154_v31 }
0x10b0   : > { %v2672_v39 = vadd.f32 %v2654_v8, %v2498_v40  ;;  %v2064_v43 = vadd.f32 %v2046_v1, %v1881_v41  ;;  %v2481_v8 = vsel %vm888_vm3, %v7153_v48, %v7161_v3  ;;  %v7163_v40 = vld [vmem:[#allocation43_spill] sm:$0xff] }
0x10b1   : > { %v3243_v2 = vpop.permute.xlu0 %3242  ;;  %v6404_v47 = vpop.permute.xlu1 %3244 }
0x10b2   : > { %v3259_v9 = vsel %vm1588_vm7, %v3241_v6, %v3243_v2  ;;  %v3260_v15 = vsel %vm1588_vm7, %v3243_v2, %v6404_v47  ;;  %v2133_v6 = vsel %vm538_vm1, %v7151_v52, %v7157_v37  ;;  %v2846_v20 = vadd.f32 %v5813_v18, %v2672_v39  ;;  %v7159_v2 = vld [vmem:[#allocation8_spill] sm:$0xff] }
0x10b3   : > { %v3277_v46 = vadd.f32 %v3259_v9, %v6303_v0  ;;  %v3278_v29 = vadd.f32 %v3260_v15, %v6306_v51  ;;  %v7155_v0 = vld [vmem:[#allocation74_spill] sm:$0xff]  ;;  %v2307_v55 = vsel %vm713_vm2, %v7152_v10, %v7159_v2  ;;  %v7160_v9 = vld [vmem:[#allocation12_spill] sm:$0xff]  ;;  %v3088_v18 = vsel %vm1413_vm6, %v6339_v60, %v6353_v45 }
0x10b4   : > { %v1959_v51 = vsel %vm363_vm0, %v7150_v32, %v7155_v0  ;;  %v7158_v32 = vld [vmem:[#allocation117_spill] sm:$0xff]  ;;  %v3020_v15 = vadd.f32 %v3002_v5, %v2846_v20  ;;  %v7162_v0 = vld [vmem:[#allocation30_spill] sm:$0xff] }
0x10b5   : > { %v6419_v54 = vadd.f32 %v3277_v46, %v3274_v19  ;;  %v6421_v30 = vadd.f32 %v3278_v29, %v3275_v44  ;;  %v6423_v49 = vpop.permute.xlu0 %2993  ;;  %v6425_v34 = vpop.permute.xlu1 %3080  ;;  %v1977_v17 = vadd.f32 %v1959_v51, %v1851_v13  ;;  %v2220_v25 = vsel %vm538_vm1, %v7081_v62, %v7158_v32  ;;  %v7164_v2 = vld [vmem:[#allocation62_spill] sm:$0xff] }
0x10b6   : > { %v2238_v22 = vadd.f32 %v2220_v25, %v2064_v43  ;;  %v2394_v62 = vsel %vm713_vm2, %v7085_v14, %v7160_v9  ;;  %v2568_v51 = vsel %vm888_vm3, %v7089_v21, %v7162_v0 }
0x10b7   : > { %v2151_v52 = vadd.f32 %v2133_v6, %v1977_v17 }
0x10b8   : > { %v2412_v61 = vadd.f32 %v2394_v62, %v2238_v22  ;;  %v7165_v22 = vld [vmem:[#allocation65_spill] sm:$0xff] }
0x10b9   : > { %v3162_v56 = vpop.permute.xlu0 %3161  ;;  %v3164_v42 = vpop.permute.xlu1 %3163  ;;  %v2325_v29 = vadd.f32 %v2307_v55, %v2151_v52 }
0x10ba   : > { %v3175_v33 = vsel %vm1588_vm7, %v3162_v56, %v3164_v42  ;;  %v2586_v17 = vadd.f32 %v2568_v51, %v2412_v61 }
0x10bb   : > { %v3193_v38 = vadd.f32 %v3175_v33, %v6329_v35  ;;  %v3089_v35 = vsel %vm1413_vm6, %v6353_v45, %v6355_v24  ;;  %v2655_v45 = vsel %vm1063_vm4, %v7154_v31, %v7163_v40  ;;  %v2499_v39 = vadd.f32 %v2481_v8, %v2325_v29 }
0x10bc   : > { %v3107_v13 = vadd.f32 %v3089_v35, %v6101_v16  ;;  %v2916_v16 = vsel %vm1238_vm5, %v6090_v58, %v6221_v63  ;;  %v2760_v55 = vadd.f32 %v7164_v2, %v2586_v17 }
0x10bd   : > { %v3284_v23 = vsel %vm1704_vm8, %v3193_v38, 0.0  ;;  %v6459_v19 = vpop.permute.xlu0 %3165  ;;  %v3249_v44 = vpop.permute.xlu1 %3248 }
0x10be   : > { %v3285_v10 = vadd.f32 %v3284_v23, %v3283_v53  ;;  %v3176_v46 = vsel %vm1588_vm7, %v3164_v42, %v6459_v19  ;;  %v3106_v53 = vadd.f32 %v3088_v18, %v6099_v26  ;;  %v2673_v26 = vadd.f32 %v2655_v45, %v2499_v39 }
0x10bf   : > { %v3194_v14 = vadd.f32 %v3176_v46, %v3020_v15  ;;  %v2934_v18 = vadd.f32 %v2916_v16, %v2760_v55 }
0x10c0   : > { %v3286_v60 = vrot.slane %v3285_v10, 4  ;;  %v2847_v9 = vadd.f32 %v7165_v22, %v2673_v26 }
0x10c1   : > { %v3293_v28 = vsel %vm1704_vm8, %v3194_v14, 0.0  ;;  %v3251_v1 = vpop.permute.xlu0 %3250  ;;  %v3253_v41 = vpop.permute.xlu1 %3252 }
0x10c2   : > { %v3287_v37 = vadd.f32 %v3286_v60, %v3285_v10  ;;  %v3294_v48 = vadd.f32 %v3293_v28, %v6389_v36  ;;  %v3262_v6 = vsel %vm1588_vm7, %v3249_v44, %v3251_v1  ;;  %v3263_v21 = vsel %vm1588_vm7, %v3251_v1, %v3253_v41 }
0x10c3   : > { %v3280_v56 = vadd.f32 %v3262_v6, %v3106_v53  ;;  %v3281_v42 = vadd.f32 %v3263_v21, %v3107_v13 }
0x10c4   : > { %v3288_v31 = vrot.slane %v3287_v37, 2  ;;  %v3295_v32 = vrot.slane %v3294_v48, 4 }
0x10c5   : > { %v3343_v25 = vsel %vm1704_vm8, %v3280_v56, 0.0  ;;  %v3352_v5 = vsel %vm1704_vm8, %v3281_v42, 0.0  ;;  %v3152_v36 = vpop.permute.xlu0 %3151  ;;  %v3160_v33 = vpop.permute.xlu1 %3159 }
0x10c6   : > { %v3289_v43 = vadd.f32 %v3288_v31, %v3287_v37  ;;  %v3296_v20 = vadd.f32 %v3295_v32, %v3294_v48  ;;  %v3344_v38 = vadd.f32 %v3343_v25, %v6419_v54  ;;  %v3353_v52 = vadd.f32 %v3352_v5, %v6421_v30 }
0x10c7   : > { %v3171_v62 = vsel %vm1588_vm7, %v6375_v12, %v3152_v36  ;;  %v3174_v58 = vsel %vm1588_vm7, %v6380_v11, %v3160_v33  ;;  %v3003_v54 = vsel %vm1413_vm6, %v6337_v27, %v6423_v49  ;;  %v3090_v12 = vsel %vm1413_vm6, %v6355_v24, %v6425_v34 }
0x10c8   : > { %v3290_v63 = vrot.slane %v3289_v43, 1  ;;  %v3297_v15 = vrot.slane %v3296_v20, 2  ;;  %v3345_v23 = vrot.slane %v3344_v38, 4  ;;  %v3354_v44 = vrot.slane %v3353_v52, 4 }
0x10c9   : > { %v3189_v30 = vadd.f32 %v3171_v62, %v6363_v50  ;;  %v3192_v35 = vadd.f32 %v3174_v58, %v6365_v4  ;;  %v3239_v10 = vpop.permute.xlu0 %3238  ;;  %v3247_v46 = vpop.permute.xlu1 %3246  ;;  %v3021_v0 = vadd.f32 %v3003_v54, %v2847_v9  ;;  %v3108_v51 = vadd.f32 %v3090_v12, %v2934_v18  ;;  %v7166_v62 = vld [vmem:[#allocation32_spill] sm:$0xff] }
0x10ca   : > { %v3298_v11 = vadd.f32 %v3297_v15, %v3296_v20  ;;  %v3346_v29 = vadd.f32 %v3345_v23, %v3344_v38  ;;  %v3355_v14 = vadd.f32 %v3354_v44, %v3353_v52  ;;  %v3291_v61 = vadd.f32 %v3290_v63, %v3289_v43 }
0x10cb   : > { %v3301_v3 = vadd.f32 %v3192_v35, %v3189_v30  ;;  %v3258_v8 = vsel %vm1588_vm7, %v6394_v59, %v3239_v10  ;;  %v3261_v27 = vsel %vm1588_vm7, %v6404_v47, %v3247_v46 }
0x10cc   : > { %v3299_v50 = vrot.slane %v3298_v11, 1  ;;  %v3347_v49 = vrot.slane %v3346_v29, 2  ;;  %v3356_v4 = vrot.slane %v3355_v14, 2  ;;  %v3276_v60 = vadd.f32 %v3258_v8, %v6370_v7 }
0x10cd   : > { %v3279_v24 = vadd.f32 %v3261_v27, %v6373_v57  ;;  %v3168_v34 = vpop.permute.xlu0 %3167  ;;  %v3255_v40 = vpop.permute.xlu1 %3254  ;;  %v3310_v28 = vadd.f32 0.016820775, %v3291_v61 }
0x10ce   : > { %v3300_v45 = vadd.f32 %v3299_v50, %v3298_v11  ;;  %v3348_v53 = vadd.f32 %v3347_v49, %v3346_v29  ;;  %v3357_v13 = vadd.f32 %v3356_v4, %v3355_v14  ;;  %v3177_v59 = vsel %vm1588_vm7, %v6459_v19, %v3168_v34 }
0x10cf   : > { %v3360_v1 = vadd.f32 %v3279_v24, %v3276_v60  ;;  %v3195_v47 = vadd.f32 %v3177_v59, %v3021_v0  ;;  %v3264_v37 = vsel %vm1588_vm7, %v3253_v41, %v3255_v40 }
0x10d0   : > { %v3311_v48 = vadd.f32 0.016820775, %v3300_v45  ;;  %v3349_v6 = vrot.slane %v3348_v53, 1  ;;  %v3358_v21 = vrot.slane %v3357_v13, 1  ;;  %v3282_v39 = vadd.f32 %v3264_v37, %v3108_v51 }
0x10d1   : > { %v3302_v7 = vsel %vm1704_vm8, %v3195_v47, 0.0 }
0x10d2   : > { %v3316_v57 = vcombine.low %v3310_v28, %v3311_v48  ;;  %v3350_v56 = vadd.f32 %v3349_v6, %v3348_v53  ;;  %v3359_v42 = vadd.f32 %v3358_v21, %v3357_v13  ;;  %v3303_v17 = vadd.f32 %v3302_v7, %v3301_v3 }
0x10d3   : > { %v3361_v31 = vsel %vm1704_vm8, %v3282_v39, 0.0 }
0x10d4   : > { %v3369_v32 = vadd.f32 -0.008080128, %v3350_v56  ;;  %v3370_v26 = vadd.f32 -0.008080128, %v3359_v42  ;;  %v3304_v19 = vrot.slane %v3303_v17, 4  ;;  %v3362_v16 = vadd.f32 %v3361_v31, %v3360_v1 }
0x10d5   : > { %v3323_v58 = vrot.slane %v3316_v57, %v7166_v62 }
0x10d6   : > { %v3375_v25 = vcombine.low %v3369_v32, %v3370_v26  ;;  %v3305_v5 = vadd.f32 %v3304_v19, %v3303_v17  ;;  %v3363_v36 = vrot.slane %v3362_v16, 4 }
0x10d8   : > { %v3306_v41 = vrot.slane %v3305_v5, 2  ;;  %v3364_v33 = vadd.f32 %v3363_v36, %v3362_v16  ;;  %v3382_v44 = vrot.slane %v3375_v25, %v7166_v62 }
0x10da   : > { %v3307_v43 = vadd.f32 %v3306_v41, %v3305_v5  ;;  %v3365_v20 = vrot.slane %v3364_v33, 2 }
0x10dc   : > { %v3308_v38 = vrot.slane %v3307_v43, 1  ;;  %v3366_v52 = vadd.f32 %v3365_v20, %v3364_v33 }
0x10de   : > { %v3309_v2 = vadd.f32 %v3308_v38, %v3307_v43  ;;  %v3367_v55 = vrot.slane %v3366_v52, 1 }
0x10e0   : > { %v3312_v22 = vadd.f32 0.016820775, %v3309_v2  ;;  %v3368_v9 = vadd.f32 %v3367_v55, %v3366_v52 }
0x10e2   : > { %v3330_v63 = vrot.slane %v3312_v22, %v7166_v62  ;;  %v3371_v15 = vadd.f32 -0.008080128, %v3368_v9 }
0x10e4   : > { %v3331_v23 = vcombine.low %v3323_v58, %v3330_v63  ;;  %v3389_v18 = vrot.slane %v3371_v15, %v7166_v62 }
0x10e6   : > { %v3338_v54 = vrot.slane %v3331_v23, %v7166_v62  ;;  %v3390_v30 = vcombine.low %v3382_v44, %v3389_v18 }
0x10e8   : > { %3494 = vst.msk [vmem:[%s4948_s9 + $0x2] ss:$4 sm:$0x7] %vm4941_vm9, %v3338_v54  ;;  %v3397_v10 = vrot.slane %v3390_v30, %v7166_v62 }
0x10ea   : > { %3495 = vst.msk [vmem:[%s4948_s9 + $0x3] ss:$4 sm:$0x7] %vm4941_vm9, %v3397_v10 }
0x10eb   : > { %3678 = shalt.err (!%p3675_p3)
}
0x10ec   : > { %s3679_s7 = scalar_lea.hbm %s6530_s6, 192  ;;  %s3683_s11 = scalar_lea.hbm %s6580_s3, 384 }
0x10ed   : > { %p3680_p4 = scmp.ne.s32.totalorder %s6530_s6, %s3679_s7  ;;  %p3684_p9 = scmp.lt.u32.totalorder %s6530_s6, %s6580_s3 }
0x10ee   : > { %p3685_p10 = scmp.lt.u32.totalorder %s3683_s11, %s3679_s7  ;;  %p3687_p12 = scmp.lt.u32.totalorder %s3679_s7, %s6530_s6 }
0x10ef   : > { %p3681_p7 = pnand %p3680_p4, %p3833_p5 }
0x10f0   : > { %p3686_p11 = por %p3685_p10, %p3684_p9 }
0x10f1   : > { %p3682_p8 = pneg %p3681_p7 }
0x10f2   : > { %p3688_p13 = por %p3687_p12, %p3686_p11 }
0x10f4   : > { %p3689_p0 = pnand %p3688_p13, %p3682_p8 }
0x10f6   : > { %3692 = shalt.err (!%p3689_p0)
}
0x10f7   : > { %3502 = dma.vmem_to_hbm [thread:$0]  (%p3833_p5), %s6532_s24, 192, %s6530_s6, %s3402_s16  }
0x10f8 PF: > { %p3508_p1 = scmp.ge.s32.totalorder %s3727_s15, 2  ;;  %s3428_s30 = sand.u32 1, %s3715_s12  }
0x10f9   : > { %s3429_s8 = scalar_lea.sflag [#allocation3], %s3428_s30 }
0x10fa   : > { %p3505_p2 = pnand %p3508_p1, %p3837_p6 }
0x10fc   : > { %3710 = dma.done.wait (!%p3505_p2), %s3429_s8, 192  }
0x10fd   : > { %3712 = vsyncadd (!%p3505_p2), %s3429_s8, 4294967104  ;;  %p13_p3 = scmp.ge.s32.totalorder %s3820_s18, 4   ;;  %s7168_s12 = smov %s3719_s13 }
0x10fe   : > { %s7169_s13 = smov %s3723_s14  ;;  %s7170_s14 = smov %s3831_s21 }
0x10ff   : > { %s7171_s15 = smov %s3820_s18  ;;  %15 = sbr.rel (!%p13_p3) target bundleno = 3 (0x3), region = 73 }
0x1106   :  { %3434 = vsyncpa [#allocation3], 1 }
0x1107   :  { %3436 = vsyncpa [#allocation3 + $0x1], 1 }

</bundles_post_ra>
